<compile_context>
chip_gen: v5e
topology: v5e:2x2
jax: 0.10.0
libtpu: 0.0.40
codegen_flags: <defaults>
</compile_context>

<pallas_src>
import functools

import jax
import jax.numpy as jnp
from jax import lax
from jax.experimental import pallas as pl
from jax.experimental.pallas import tpu as pltpu

BN_EPS = 1e-5


def _vmem_limit_bytes():
    cap = 64 * 1024 * 1024            # conservative fallback (v7x physical)
    try:
        cap = int(pltpu.get_tpu_info().vmem_capacity_bytes)
    except Exception:
        pass
    # ~48 MiB on v7x (64 MiB VMEM), ~96-100 MiB on v5e/v6e (128 MiB VMEM).
    return max(32 * 1024 * 1024, min(cap * 3 // 4, 100 * 1024 * 1024))


VMEM_LIMIT = _vmem_limit_bytes()


def _cparams(*dim_sems):
    return pltpu.CompilerParams(dimension_semantics=tuple(dim_sems),
                                vmem_limit_bytes=VMEM_LIMIT)


def _cout_tile(cout):
    # 256-wide Cout tiles for wide layers (MXU-friendly), full Cout otherwise.
    return 256 if (cout > 256 and cout % 256 == 0) else cout


def _kpad(cin):
    # Pad K = 9*Cin up to 128 (tiny Cin) or a sublane multiple of 8.
    k = 9 * cin
    return 128 if k <= 128 else ((k + 7) // 8) * 8


def _conv_h_tile(H, W, KP):
    budget = VMEM_LIMIT // 6          # bf16 im2col patch budget
    for th in (64, 32, 16, 8, 4, 2):
        if th < H and H % th == 0 and th * W * KP * 2 <= budget:
            return th
    return H


def _bn_h_tile(H, W, C):
    budget = VMEM_LIMIT // 6          # f32 activation tile budget
    for th in (64, 32, 16, 8, 4, 2):
        if th < H and H % th == 0 and th * W * C * 4 <= budget:
            return th
    return H


def _fc_tile(d, cap=2048):
    if d <= cap:
        return d
    for c in (2048, 1024, 512, 256, 128):
        if d % c == 0:
            return c
    return d


# --------------------------------------------------------------------------
# Pass 1: Conv3x3 (pad=1) via row-tiled in-VMEM im2col + bias, emitting the
#         pre-BN activation (bf16) and per-(image, row-tile) [sum, sum_sq]
#         BatchNorm partial statistics (f32).
# Grid: (batch, H-tiles, Cout-tiles); Cout is innermost and "arbitrary" so
# the pad/im2col scratch built at cout_tile == 0 is reused across Cout tiles.
# --------------------------------------------------------------------------
def conv3x3_kernel(x_ref, w_ref, b_ref, y_ref, stat_ref, xpad_ref, patch_ref):
    # x_ref:    (1, H, W, Cin)    full image (revisited across h / cout tiles)
    # w_ref:    (KP, TCO)   bf16  taps (dy, dx, cin) flattened + zero pad rows
    # b_ref:    (1, TCO)    f32
    # y_ref:    (1, TH, W, TCO)   bf16 pre-BN conv output row tile
    # stat_ref: (1, 1, 2, TCO)    f32 [sum, sum_sq] over this row tile
    # xpad_ref: VMEM (TH+2, W+2, Cin) f32  padded input slab (1-row halo)
    # patch_ref:VMEM (TH*W, KP)       bf16 im2col patch
    TH, W = y_ref.shape[1], y_ref.shape[2]
    Cin = x_ref.shape[3]
    K9 = 9 * Cin
    KP = patch_ref.shape[1]
    h = pl.program_id(1)
    n_h = pl.num_programs(1)
    r0 = h * TH

    @pl.when(pl.program_id(2) == 0)
    def _build_patch():
        xpad_ref[...] = jnp.zeros_like(xpad_ref)
        rows = x_ref[0:1, pl.ds(r0, TH), :, :].reshape(TH, W, Cin)
        xpad_ref[1:TH + 1, 1:W + 1, :] = rows.astype(xpad_ref.dtype)

        @pl.when(h > 0)
        def _():
            top = x_ref[0:1, pl.ds(r0 - 1, 1), :, :].reshape(1, W, Cin)
            xpad_ref[0:1, 1:W + 1, :] = top.astype(xpad_ref.dtype)

        @pl.when(h < n_h - 1)
        def _():
            bot = x_ref[0:1, pl.ds(r0 + TH, 1), :, :].reshape(1, W, Cin)
            xpad_ref[TH + 1:TH + 2, 1:W + 1, :] = bot.astype(xpad_ref.dtype)

        if KP > K9:   # zero the MXU K-alignment pad columns
            patch_ref[:, K9:] = jnp.zeros((TH * W, KP - K9), patch_ref.dtype)
        for dy in range(3):
            for dx in range(3):
                t = dy * 3 + dx
                patch_ref[:, t * Cin:(t + 1) * Cin] = (
                    xpad_ref[dy:dy + TH, dx:dx + W, :]
                    .reshape(TH * W, Cin).astype(patch_ref.dtype))

    # bf16 x bf16 -> f32 MXU matmul with K = KP (>= 9*Cin).
    y = jnp.dot(patch_ref[...], w_ref[...],
                preferred_element_type=jnp.float32) + b_ref[...]

    # Partial BatchNorm statistics for this (image, row-tile, cout-tile).
    s = jnp.sum(y, axis=0, keepdims=True)            # (1, TCO)
    ss = jnp.sum(y * y, axis=0, keepdims=True)
    stat_ref[0:1, 0:1, 0:1, :] = s[None, None]
    stat_ref[0:1, 0:1, 1:2, :] = ss[None, None]

    y_ref[...] = y.reshape(1, TH, W, y.shape[-1]).astype(y_ref.dtype)


def conv3x3_with_stats(x_nhwc, w9p, b):
    N, H, W, Cin = x_nhwc.shape
    KP, Cout = w9p.shape
    tco = _cout_tile(Cout)
    n_co = Cout // tco
    TH = _conv_h_tile(H, W, KP)
    n_h = H // TH
    return pl.pallas_call(
        conv3x3_kernel,
        out_shape=(
            jax.ShapeDtypeStruct((N, H, W, Cout), jnp.bfloat16),
            jax.ShapeDtypeStruct((N, n_h, 2, Cout), jnp.float32),
        ),
        grid=(N, n_h, n_co),
        in_specs=[
            pl.BlockSpec((1, H, W, Cin), lambda n, h, c: (n, 0, 0, 0)),
            pl.BlockSpec((KP, tco), lambda n, h, c: (0, c)),
            pl.BlockSpec((1, tco), lambda n, h, c: (0, c)),
        ],
        out_specs=(
            pl.BlockSpec((1, TH, W, tco), lambda n, h, c: (n, h, 0, c)),
            pl.BlockSpec((1, 1, 2, tco), lambda n, h, c: (n, h, 0, c)),
        ),
        scratch_shapes=[
            pltpu.VMEM((TH + 2, W + 2, Cin), jnp.float32),
            pltpu.VMEM((TH * W, KP), jnp.bfloat16),
        ],
        compiler_params=_cparams("parallel", "parallel", "arbitrary"),
    )(x_nhwc, w9p, b)


# --------------------------------------------------------------------------
# Pass 2a: reduce per-(image, row-tile) stats over the batch and precompute
#          the BatchNorm scale/shift per channel (one tiny kernel per layer).
# --------------------------------------------------------------------------
def bn_scale_shift_kernel(stat_ref, g_ref, beta_ref, o_ref, *, count):
    # TODO(synk): E[x^2]-E[x]^2 in f32 can lose precision at ImageNet-scale
    # reductions; a shifted/Welford combine would be more robust.
    tot = stat_ref[...].sum(axis=0).sum(axis=0)        # (2, TCO) f32
    inv = 1.0 / count
    mean = tot[0:1, :] * inv
    var = tot[1:2, :] * inv - mean * mean              # biased batch variance
    scale = g_ref[...] * lax.rsqrt(var + BN_EPS)
    shift = beta_ref[...] - mean * scale
    o_ref[0:1, :] = scale
    o_ref[1:2, :] = shift


def bn_scale_shift(stats, gamma, beta, count):
    N, n_h, _, Cout = stats.shape
    tco = _cout_tile(Cout)
    n_co = Cout // tco
    return pl.pallas_call(
        functools.partial(bn_scale_shift_kernel, count=float(count)),
        out_shape=jax.ShapeDtypeStruct((2, Cout), jnp.float32),
        grid=(n_co,),
        in_specs=[
            pl.BlockSpec((N, n_h, 2, tco), lambda c: (0, 0, 0, c)),
            pl.BlockSpec((1, tco), lambda c: (0, c)),
            pl.BlockSpec((1, tco), lambda c: (0, c)),
        ],
        out_specs=pl.BlockSpec((2, tco), lambda c: (0, c)),
        compiler_params=_cparams("parallel"),
    )(stats, gamma, beta)


# --------------------------------------------------------------------------
# Pass 2b: BN (precomputed scale/shift) + ReLU, with the 2x2 maxpool fused
#          into the epilogue when the next cfg entry is 'M'.
# Grid: (batch, H-tiles, Cout-tiles), all parallel.
# --------------------------------------------------------------------------
def bn_relu_pool_kernel(y_ref, ss_ref, o_ref, *scratch, pool):
    # y_ref: (1, TH, W, TCO) bf16;  ss_ref: (2, TCO) f32 = [scale; shift]
    TH, W = y_ref.shape[1], y_ref.shape[2]
    scale = ss_ref[0:1, :]
    shift = ss_ref[1:2, :]
    a = jnp.maximum(y_ref[0].astype(jnp.float32) * scale + shift, 0.0)
    if pool:
        # Small f32 row-tile scratch so the stride-2 W reads stay on f32.
        t_ref, = scratch
        t_ref[...] = a
        m = jnp.maximum(t_ref[:, pl.ds(0, W // 2, stride=2), :],
                        t_ref[:, pl.ds(1, W // 2, stride=2), :])
        m = m.reshape(TH // 2, 2, W // 2, m.shape[-1])
        o_ref[...] = jnp.max(m, axis=1)[None].astype(o_ref.dtype)
    else:
        o_ref[...] = a[None].astype(o_ref.dtype)


def bn_relu_maxpool(y, scale_shift, pool):
    N, H, W, Cout = y.shape
    tco = _cout_tile(Cout)
    n_co = Cout // tco
    TH = _bn_h_tile(H, W, tco)
    n_h = H // TH
    if pool:
        assert TH % 2 == 0 and W % 2 == 0
    Ho, Wo = (H // 2, W // 2) if pool else (H, W)
    THo = TH // 2 if pool else TH
    kern = functools.partial(bn_relu_pool_kernel, pool=pool)
    scratch = [pltpu.VMEM((TH, W, tco), jnp.float32)] if pool else []
    return pl.pallas_call(
        kern,
        out_shape=jax.ShapeDtypeStruct((N, Ho, Wo, Cout), y.dtype),
        grid=(N, n_h, n_co),
        in_specs=[
            pl.BlockSpec((1, TH, W, tco), lambda n, h, c: (n, h, 0, c)),
            pl.BlockSpec((2, tco), lambda n, h, c: (0, c)),
        ],
        out_specs=pl.BlockSpec((1, THo, Wo, tco), lambda n, h, c: (n, h, 0, c)),
        scratch_shapes=scratch,
        compiler_params=_cparams("parallel", "parallel", "parallel"),
    )(y, scale_shift)


# --------------------------------------------------------------------------
# Standalone MaxPool2d(2, 2) — only used for a cfg 'M' that does not directly
# follow a conv (never the case for standard VGG cfgs; kept for completeness).
# --------------------------------------------------------------------------
def maxpool2x2_kernel(x_ref, o_ref):
    H, W = x_ref.shape[1], x_ref.shape[2]
    a = jnp.maximum(x_ref[0, :, pl.ds(0, W // 2, stride=2), :],
                    x_ref[0, :, pl.ds(1, W // 2, stride=2), :])
    a = a.reshape(H // 2, 2, W // 2, a.shape[-1])
    o_ref[...] = jnp.max(a, axis=1)[None].astype(o_ref.dtype)


def maxpool2x2(x_nhwc):
    N, H, W, C = x_nhwc.shape
    return pl.pallas_call(
        maxpool2x2_kernel,
        out_shape=jax.ShapeDtypeStruct((N, H // 2, W // 2, C), x_nhwc.dtype),
        grid=(N,),
        in_specs=[pl.BlockSpec((1, H, W, C), lambda n: (n, 0, 0, 0))],
        out_specs=pl.BlockSpec((1, H // 2, W // 2, C), lambda n: (n, 0, 0, 0)),
        compiler_params=_cparams("parallel"),
    )(x_nhwc)


# --------------------------------------------------------------------------
# Linear (+ optional fused ReLU): bf16 MXU inputs, accumulate directly into
# the K-invariant f32 output block across the trailing "arbitrary" K axis.
# --------------------------------------------------------------------------
def linear_kernel(x_ref, w_ref, b_ref, o_ref, *, apply_relu):
    @pl.when(pl.program_id(1) == 0)
    def _():
        o_ref[...] = jnp.zeros_like(o_ref)

    o_ref[...] += jnp.dot(x_ref[...].astype(jnp.bfloat16), w_ref[...],
                          preferred_element_type=jnp.float32)

    @pl.when(pl.program_id(1) == pl.num_programs(1) - 1)
    def _():
        y = o_ref[...] + b_ref[...]
        if apply_relu:
            y = jnp.maximum(y, 0.0)
        o_ref[...] = y


def linear(x, w, b, apply_relu):
    M, Din = x.shape
    Dout = w.shape[1]
    tk = _fc_tile(Din)
    tn = _fc_tile(Dout)
    return pl.pallas_call(
        functools.partial(linear_kernel, apply_relu=apply_relu),
        out_shape=jax.ShapeDtypeStruct((M, Dout), jnp.float32),
        grid=(Dout // tn, Din // tk),
        in_specs=[
            pl.BlockSpec((M, tk), lambda j, k: (0, k)),
            pl.BlockSpec((tk, tn), lambda j, k: (k, j)),
            pl.BlockSpec((1, tn), lambda j, k: (0, j)),
        ],
        out_specs=pl.BlockSpec((M, tn), lambda j, k: (0, j)),
        compiler_params=_cparams("parallel", "arbitrary"),
    )(x, w, b)


# --------------------------------------------------------------------------
# Parameter init (mirrors VGG._initialize_weights); conv/FC weights in bf16.
# --------------------------------------------------------------------------
def init_vgg_params(key, cfg, in_planes, fc_in, fc_hidden, num_classes):
    params = {"convs": [], "fc": []}
    cin = in_planes
    for layer in cfg:
        if layer == 'M':
            continue
        cout = int(layer)
        key, kw = jax.random.split(key)
        fan_out = cout * 9                          # kaiming_normal(fan_out, relu)
        std = (2.0 / fan_out) ** 0.5
        w = std * jax.random.normal(kw, (3, 3, cin, cout), jnp.float32)
        w9 = w.reshape(9 * cin, cout)               # (dy, dx, cin) flattened -> K
        KP = _kpad(cin)
        if KP > 9 * cin:                            # zero-pad K for MXU alignment
            w9 = jnp.concatenate(
                [w9, jnp.zeros((KP - 9 * cin, cout), jnp.float32)], axis=0)
        w9 = w9.astype(jnp.bfloat16)
        b = jnp.zeros((1, cout), jnp.float32)       # conv bias -> 0
        gamma = jnp.ones((1, cout), jnp.float32)    # BN weight -> 1
        beta = jnp.zeros((1, cout), jnp.float32)    # BN bias -> 0
        params["convs"].append((w9, b, gamma, beta))
        cin = cout
    dims = [fc_in, fc_hidden, fc_hidden, num_classes]
    for i in range(3):
        key, kw = jax.random.split(key)
        w = (0.01 * jax.random.normal(kw, (dims[i], dims[i + 1]), jnp.float32))
        params["fc"].append((w.astype(jnp.bfloat16),
                             jnp.zeros((1, dims[i + 1]), jnp.float32)))
    return params


# --------------------------------------------------------------------------
# Forward pass (matches VGG.forward)
# --------------------------------------------------------------------------
def vgg_forward(params, x_nchw, cfg):
    x = jnp.transpose(x_nchw, (0, 2, 3, 1))          # NCHW -> NHWC
    ci = 0
    i = 0
    while i < len(cfg):
        layer = cfg[i]
        if layer == 'M':
            x = maxpool2x2(x)                        # 'M' not following a conv
            i += 1
            continue
        w9p, b, g, be = params["convs"][ci]
        ci += 1
        fuse_pool = (i + 1 < len(cfg)) and cfg[i + 1] == 'M'
        y, stats = conv3x3_with_stats(x, w9p, b)     # conv + partial BN stats
        N, H, W, _ = y.shape
        ss = bn_scale_shift(stats, g, be, count=N * H * W)
        x = bn_relu_maxpool(y, ss, pool=fuse_pool)   # BN + ReLU (+ 2x2 pool)
        i += 2 if fuse_pool else 1

    # torch.flatten(x, 1) on NCHW flattens in (C, H, W) order
    x = jnp.transpose(x, (0, 3, 1, 2)).reshape(x.shape[0], -1)
    (w1, b1), (w2, b2), (w3, b3) = params["fc"]
    x = linear(x, w1, b1, apply_relu=True)
    x = linear(x, w2, b2, apply_relu=True)
    x = linear(x, w3, b3, apply_relu=False)
    return x


if __name__ == "__main__":
    # Small VGG-style config (same layer structure as the reference module,
    # scaled dims to SMALL demo shapes).
    cfg = ['8', 'M', '16', 'M']
    in_planes = 3
    num_classes = 10
    fc_hidden = 512
    N, H, W = 2, 16, 16

    key = jax.random.PRNGKey(0)
    kx, kp = jax.random.split(key)
    x = jax.random.normal(kx, (N, in_planes, H, W), jnp.float32)  # NCHW input

    # features output: 16 channels, spatial reduced by two 2x2 pools
    fc_in = 16 * (H // 4) * (W // 4)
    params = init_vgg_params(kp, cfg, in_planes, fc_in, fc_hidden, num_classes)

    fwd = jax.jit(functools.partial(vgg_forward, cfg=cfg))
    out = jax.block_until_ready(fwd(params, x))
    assert out.shape == (N, num_classes)
    assert bool(jnp.all(jnp.isfinite(out)))
    print("KERNEL_OK")
</pallas_src>

<mosaic_0001>
module attributes {stable_mosaic.version = 11 : i64} {
  func.func @bn_scale_shift_kernel(%arg0: i32, %arg1: memref<2x2x2x8xf32, #tpu.memory_space<vmem>>, %arg2: memref<1x8xf32, #tpu.memory_space<vmem>>, %arg3: memref<1x8xf32, #tpu.memory_space<vmem>>, %arg4: memref<2x8xf32, #tpu.memory_space<vmem>>) attributes {dimension_semantics = [#tpu.dimension_semantics<parallel>], iteration_bounds = array<i64: 1>, scalar_prefetch = 0 : i64, scratch_operands = 0 : i64, tpu.core_type = #tpu.core_type<tc>, window_params = [{transform_indices = @transform_0, window_bounds = array<i64: 2, 2, 2, 8>}, {transform_indices = @transform_1, window_bounds = array<i64: 1, 8>}, {transform_indices = @transform_2, window_bounds = array<i64: 1, 8>}, {transform_indices = @transform_3, window_bounds = array<i64: 2, 8>}]} {
    %c0 = arith.constant 0 : index
    %c0_0 = arith.constant 0 : index
    %c0_1 = arith.constant 0 : index
    %c0_2 = arith.constant 0 : index
    %0 = vector.load %arg1[%c0, %c0_0, %c0_1, %c0_2] : memref<2x2x2x8xf32, #tpu.memory_space<vmem>>, vector<2x2x2x8xf32>
    %cst = arith.constant dense<0.000000e+00> : vector<2x2x8xf32>
    %1 = vector.multi_reduction <add>, %0, %cst [0] : vector<2x2x2x8xf32> to vector<2x2x8xf32>
    %cst_3 = arith.constant dense<0.000000e+00> : vector<2x8xf32>
    %2 = vector.multi_reduction <add>, %1, %cst_3 [0] : vector<2x2x8xf32> to vector<2x8xf32>
    %3 = vector.extract_strided_slice %2 {offsets = [0, 0], sizes = [1, 8], strides = [1, 1]} : vector<2x8xf32> to vector<1x8xf32>
    %cst_4 = arith.constant 0.001953125 : f32
    %4 = vector.broadcast %cst_4 : f32 to vector<1x8xf32>
    %5 = arith.mulf %3, %4 : vector<1x8xf32>
    %6 = vector.extract_strided_slice %2 {offsets = [1, 0], sizes = [1, 8], strides = [1, 1]} : vector<2x8xf32> to vector<1x8xf32>
    %cst_5 = arith.constant 0.001953125 : f32
    %7 = vector.broadcast %cst_5 : f32 to vector<1x8xf32>
    %8 = arith.mulf %6, %7 : vector<1x8xf32>
    %9 = arith.mulf %5, %5 : vector<1x8xf32>
    %10 = arith.subf %8, %9 : vector<1x8xf32>
    %c0_6 = arith.constant 0 : index
    %c0_7 = arith.constant 0 : index
    %11 = vector.load %arg2[%c0_6, %c0_7] : memref<1x8xf32, #tpu.memory_space<vmem>>, vector<1x8xf32>
    %cst_8 = arith.constant 9.99999974E-6 : f32
    %12 = vector.broadcast %cst_8 : f32 to vector<1x8xf32>
    %13 = arith.addf %10, %12 : vector<1x8xf32>
    %14 = math.rsqrt %13 : vector<1x8xf32>
    %15 = arith.mulf %11, %14 : vector<1x8xf32>
    %c0_9 = arith.constant 0 : index
    %c0_10 = arith.constant 0 : index
    %16 = vector.load %arg3[%c0_9, %c0_10] : memref<1x8xf32, #tpu.memory_space<vmem>>, vector<1x8xf32>
    %17 = arith.mulf %5, %15 : vector<1x8xf32>
    %18 = arith.subf %16, %17 : vector<1x8xf32>
    %c0_11 = arith.constant 0 : index
    %c0_12 = arith.constant 0 : index
    %19 = vector.load %arg4[%c0_11, %c0_12] : memref<2x8xf32, #tpu.memory_space<vmem>>, vector<1x8xf32>
    tpu.vector_store %arg4[%c0_11, %c0_12], %15 {strides = array<i32>} : memref<2x8xf32, #tpu.memory_space<vmem>>, vector<1x8xf32>,
    %c1 = arith.constant 1 : index
    %c0_13 = arith.constant 0 : index
    %20 = vector.load %arg4[%c1, %c0_13] : memref<2x8xf32, #tpu.memory_space<vmem>>, vector<1x8xf32>
    tpu.vector_store %arg4[%c1, %c0_13], %18 {strides = array<i32>} : memref<2x8xf32, #tpu.memory_space<vmem>>, vector<1x8xf32>,
    return
  }
  func.func @transform_0(%arg0: i32) -> (i32, i32, i32, i32) {
    %c0_i32 = arith.constant 0 : i32
    %c0_i32_0 = arith.constant 0 : i32
    %c0_i32_1 = arith.constant 0 : i32
    %c0_i32_2 = arith.constant 0 : i32
    return %c0_i32, %c0_i32_0, %c0_i32_1, %arg0 : i32, i32, i32, i32
  }
  func.func @transform_1(%arg0: i32) -> (i32, i32) {
    %c0_i32 = arith.constant 0 : i32
    %c0_i32_0 = arith.constant 0 : i32
    return %c0_i32, %arg0 : i32, i32
  }
  func.func @transform_2(%arg0: i32) -> (i32, i32) {
    %c0_i32 = arith.constant 0 : i32
    %c0_i32_0 = arith.constant 0 : i32
    return %c0_i32, %arg0 : i32, i32
  }
  func.func @transform_3(%arg0: i32) -> (i32, i32) {
    %c0_i32 = arith.constant 0 : i32
    %c0_i32_0 = arith.constant 0 : i32
    return %c0_i32, %arg0 : i32, i32
  }
}

module attributes {stable_mosaic.version = 11 : i64} {
  func.func @conv3x3_kernel(%arg0: i32, %arg1: i32, %arg2: i32, %arg3: memref<1x16x16x3xf32, #tpu.memory_space<vmem>>, %arg4: memref<128x8xbf16, #tpu.memory_space<vmem>>, %arg5: memref<1x8xf32, #tpu.memory_space<vmem>>, %arg6: memref<1x8x16x8xbf16, #tpu.memory_space<vmem>>, %arg7: memref<1x1x2x8xf32, #tpu.memory_space<vmem>>, %arg8: memref<10x18x3xf32, #tpu.memory_space<vmem>>, %arg9: memref<128x128xbf16, #tpu.memory_space<vmem>>) attributes {dimension_semantics = [#tpu.dimension_semantics<parallel>, #tpu.dimension_semantics<parallel>, #tpu.dimension_semantics<arbitrary>], iteration_bounds = array<i64: 2, 2, 1>, scalar_prefetch = 0 : i64, scratch_operands = 2 : i64, tpu.core_type = #tpu.core_type<tc>, window_params = [{transform_indices = @transform_0, window_bounds = array<i64: 1, 16, 16, 3>}, {transform_indices = @transform_1, window_bounds = array<i64: 128, 8>}, {transform_indices = @transform_2, window_bounds = array<i64: 1, 8>}, {transform_indices = @transform_3, window_bounds = array<i64: 1, 8, 16, 8>}, {transform_indices = @transform_4, window_bounds = array<i64: 1, 1, 2, 8>}]} {
    %c8_i32 = arith.constant 8 : i32
    %0 = arith.muli %arg1, %c8_i32 : i32
    %c0_i32 = arith.constant 0 : i32
    %1 = arith.cmpi eq, %arg2, %c0_i32 : i32
    %2 = arith.extui %1 : i1 to i32
    %c0_i32_0 = arith.constant 0 : i32
    %3 = arith.cmpi ne, %2, %c0_i32_0 : i32
    scf.if %3 {
      %cst_19 = arith.constant 0.000000e+00 : f32
      %22 = vector.broadcast %cst_19 : f32 to vector<10x18x3xf32>
      %c0_20 = arith.constant 0 : index
      %c0_21 = arith.constant 0 : index
      %c0_22 = arith.constant 0 : index
      %23 = vector.load %arg8[%c0_20, %c0_21, %c0_22] : memref<10x18x3xf32, #tpu.memory_space<vmem>>, vector<10x18x3xf32>
      tpu.vector_store %arg8[%c0_20, %c0_21, %c0_22], %22 {strides = array<i32>} : memref<10x18x3xf32, #tpu.memory_space<vmem>>, vector<10x18x3xf32>,
      %c0_23 = arith.constant 0 : index
      %24 = arith.index_cast %0 : i32 to index
      %c0_24 = arith.constant 0 : index
      %c0_25 = arith.constant 0 : index
      %25 = vector.load %arg3[%c0_23, %24, %c0_24, %c0_25] : memref<1x16x16x3xf32, #tpu.memory_space<vmem>>, vector<1x8x16x3xf32>
      %26 = vector.shape_cast %25 : vector<1x8x16x3xf32> to vector<8x16x3xf32>
      %c1_26 = arith.constant 1 : index
      %c1_27 = arith.constant 1 : index
      %c0_28 = arith.constant 0 : index
      %27 = vector.load %arg8[%c1_26, %c1_27, %c0_28] : memref<10x18x3xf32, #tpu.memory_space<vmem>>, vector<8x16x3xf32>
      tpu.vector_store %arg8[%c1_26, %c1_27, %c0_28], %26 {strides = array<i32>} : memref<10x18x3xf32, #tpu.memory_space<vmem>>, vector<8x16x3xf32>,
      %c0_i32_29 = arith.constant 0 : i32
      %28 = arith.cmpi sgt, %arg1, %c0_i32_29 : i32
      %29 = arith.extui %28 : i1 to i32
      %c0_i32_30 = arith.constant 0 : i32
      %30 = arith.cmpi ne, %29, %c0_i32_30 : i32
      scf.if %30 {
        %c1_i32_70 = arith.constant 1 : i32
        %72 = arith.subi %0, %c1_i32_70 : i32
        %c0_71 = arith.constant 0 : index
        %73 = arith.index_cast %72 : i32 to index
        %c0_72 = arith.constant 0 : index
        %c0_73 = arith.constant 0 : index
        %74 = vector.load %arg3[%c0_71, %73, %c0_72, %c0_73] : memref<1x16x16x3xf32, #tpu.memory_space<vmem>>, vector<1x1x16x3xf32>
        %75 = vector.shape_cast %74 : vector<1x1x16x3xf32> to vector<1x16x3xf32>
        %c0_74 = arith.constant 0 : index
        %c1_75 = arith.constant 1 : index
        %c0_76 = arith.constant 0 : index
        %76 = vector.load %arg8[%c0_74, %c1_75, %c0_76] : memref<10x18x3xf32, #tpu.memory_space<vmem>>, vector<1x16x3xf32>
        tpu.vector_store %arg8[%c0_74, %c1_75, %c0_76], %75 {strides = array<i32>} : memref<10x18x3xf32, #tpu.memory_space<vmem>>, vector<1x16x3xf32>,
      } else {
      }
      %c1_i32 = arith.constant 1 : i32
      %31 = arith.cmpi slt, %arg1, %c1_i32 : i32
      %32 = arith.extui %31 : i1 to i32
      %c0_i32_31 = arith.constant 0 : i32
      %33 = arith.cmpi ne, %32, %c0_i32_31 : i32
      scf.if %33 {
        %c8_i32_70 = arith.constant 8 : i32
        %72 = arith.addi %0, %c8_i32_70 : i32
        %c0_71 = arith.constant 0 : index
        %73 = arith.index_cast %72 : i32 to index
        %c0_72 = arith.constant 0 : index
        %c0_73 = arith.constant 0 : index
        %74 = vector.load %arg3[%c0_71, %73, %c0_72, %c0_73] : memref<1x16x16x3xf32, #tpu.memory_space<vmem>>, vector<1x1x16x3xf32>
        %75 = vector.shape_cast %74 : vector<1x1x16x3xf32> to vector<1x16x3xf32>
        %c9_74 = arith.constant 9 : index
        %c1_75 = arith.constant 1 : index
        %c0_76 = arith.constant 0 : index
        %76 = vector.load %arg8[%c9_74, %c1_75, %c0_76] : memref<10x18x3xf32, #tpu.memory_space<vmem>>, vector<1x16x3xf32>
        tpu.vector_store %arg8[%c9_74, %c1_75, %c0_76], %75 {strides = array<i32>} : memref<10x18x3xf32, #tpu.memory_space<vmem>>, vector<1x16x3xf32>,
      } else {
      }
      %cst_32 = arith.constant 0.000000e+00 : bf16
      %34 = vector.broadcast %cst_32 : bf16 to vector<128x101xbf16>
      %c0_33 = arith.constant 0 : index
      %c27 = arith.constant 27 : index
      %35 = vector.load %arg9[%c0_33, %c27] : memref<128x128xbf16, #tpu.memory_space<vmem>>, vector<128x101xbf16>
      tpu.vector_store %arg9[%c0_33, %c27], %34 {strides = array<i32>} : memref<128x128xbf16, #tpu.memory_space<vmem>>, vector<128x101xbf16>,
      %c0_34 = arith.constant 0 : index
      %c0_35 = arith.constant 0 : index
      %c0_36 = arith.constant 0 : index
      %36 = vector.load %arg8[%c0_34, %c0_35, %c0_36] : memref<10x18x3xf32, #tpu.memory_space<vmem>>, vector<8x16x3xf32>
      %37 = vector.shape_cast %36 : vector<8x16x3xf32> to vector<128x3xf32>
      %38 = arith.truncf %37 : vector<128x3xf32> to vector<128x3xbf16>
      %c0_37 = arith.constant 0 : index
      %c0_38 = arith.constant 0 : index
      %39 = vector.load %arg9[%c0_37, %c0_38] : memref<128x128xbf16, #tpu.memory_space<vmem>>, vector<128x3xbf16>
      tpu.vector_store %arg9[%c0_37, %c0_38], %38 {strides = array<i32>} : memref<128x128xbf16, #tpu.memory_space<vmem>>, vector<128x3xbf16>,
      %c0_39 = arith.constant 0 : index
      %c1_40 = arith.constant 1 : index
      %c0_41 = arith.constant 0 : index
      %40 = vector.load %arg8[%c0_39, %c1_40, %c0_41] : memref<10x18x3xf32, #tpu.memory_space<vmem>>, vector<8x16x3xf32>
      %41 = vector.shape_cast %40 : vector<8x16x3xf32> to vector<128x3xf32>
      %42 = arith.truncf %41 : vector<128x3xf32> to vector<128x3xbf16>
      %c0_42 = arith.constant 0 : index
      %c3 = arith.constant 3 : index
      %43 = vector.load %arg9[%c0_42, %c3] : memref<128x128xbf16, #tpu.memory_space<vmem>>, vector<128x3xbf16>
      tpu.vector_store %arg9[%c0_42, %c3], %42 {strides = array<i32>} : memref<128x128xbf16, #tpu.memory_space<vmem>>, vector<128x3xbf16>,
      %c0_43 = arith.constant 0 : index
      %c2 = arith.constant 2 : index
      %c0_44 = arith.constant 0 : index
      %44 = vector.load %arg8[%c0_43, %c2, %c0_44] : memref<10x18x3xf32, #tpu.memory_space<vmem>>, vector<8x16x3xf32>
      %45 = vector.shape_cast %44 : vector<8x16x3xf32> to vector<128x3xf32>
      %46 = arith.truncf %45 : vector<128x3xf32> to vector<128x3xbf16>
      %c0_45 = arith.constant 0 : index
      %c6 = arith.constant 6 : index
      %47 = vector.load %arg9[%c0_45, %c6] : memref<128x128xbf16, #tpu.memory_space<vmem>>, vector<128x3xbf16>
      tpu.vector_store %arg9[%c0_45, %c6], %46 {strides = array<i32>} : memref<128x128xbf16, #tpu.memory_space<vmem>>, vector<128x3xbf16>,
      %c1_46 = arith.constant 1 : index
      %c0_47 = arith.constant 0 : index
      %c0_48 = arith.constant 0 : index
      %48 = vector.load %arg8[%c1_46, %c0_47, %c0_48] : memref<10x18x3xf32, #tpu.memory_space<vmem>>, vector<8x16x3xf32>
      %49 = vector.shape_cast %48 : vector<8x16x3xf32> to vector<128x3xf32>
      %50 = arith.truncf %49 : vector<128x3xf32> to vector<128x3xbf16>
      %c0_49 = arith.constant 0 : index
      %c9 = arith.constant 9 : index
      %51 = vector.load %arg9[%c0_49, %c9] : memref<128x128xbf16, #tpu.memory_space<vmem>>, vector<128x3xbf16>
      tpu.vector_store %arg9[%c0_49, %c9], %50 {strides = array<i32>} : memref<128x128xbf16, #tpu.memory_space<vmem>>, vector<128x3xbf16>,
      %c1_50 = arith.constant 1 : index
      %c1_51 = arith.constant 1 : index
      %c0_52 = arith.constant 0 : index
      %52 = vector.load %arg8[%c1_50, %c1_51, %c0_52] : memref<10x18x3xf32, #tpu.memory_space<vmem>>, vector<8x16x3xf32>
      %53 = vector.shape_cast %52 : vector<8x16x3xf32> to vector<128x3xf32>
      %54 = arith.truncf %53 : vector<128x3xf32> to vector<128x3xbf16>
      %c0_53 = arith.constant 0 : index
      %c12 = arith.constant 12 : index
      %55 = vector.load %arg9[%c0_53, %c12] : memref<128x128xbf16, #tpu.memory_space<vmem>>, vector<128x3xbf16>
      tpu.vector_store %arg9[%c0_53, %c12], %54 {strides = array<i32>} : memref<128x128xbf16, #tpu.memory_space<vmem>>, vector<128x3xbf16>,
      %c1_54 = arith.constant 1 : index
      %c2_55 = arith.constant 2 : index
      %c0_56 = arith.constant 0 : index
      %56 = vector.load %arg8[%c1_54, %c2_55, %c0_56] : memref<10x18x3xf32, #tpu.memory_space<vmem>>, vector<8x16x3xf32>
      %57 = vector.shape_cast %56 : vector<8x16x3xf32> to vector<128x3xf32>
      %58 = arith.truncf %57 : vector<128x3xf32> to vector<128x3xbf16>
      %c0_57 = arith.constant 0 : index
      %c15 = arith.constant 15 : index
      %59 = vector.load %arg9[%c0_57, %c15] : memref<128x128xbf16, #tpu.memory_space<vmem>>, vector<128x3xbf16>
      tpu.vector_store %arg9[%c0_57, %c15], %58 {strides = array<i32>} : memref<128x128xbf16, #tpu.memory_space<vmem>>, vector<128x3xbf16>,
      %c2_58 = arith.constant 2 : index
      %c0_59 = arith.constant 0 : index
      %c0_60 = arith.constant 0 : index
      %60 = vector.load %arg8[%c2_58, %c0_59, %c0_60] : memref<10x18x3xf32, #tpu.memory_space<vmem>>, vector<8x16x3xf32>
      %61 = vector.shape_cast %60 : vector<8x16x3xf32> to vector<128x3xf32>
      %62 = arith.truncf %61 : vector<128x3xf32> to vector<128x3xbf16>
      %c0_61 = arith.constant 0 : index
      %c18 = arith.constant 18 : index
      %63 = vector.load %arg9[%c0_61, %c18] : memref<128x128xbf16, #tpu.memory_space<vmem>>, vector<128x3xbf16>
      tpu.vector_store %arg9[%c0_61, %c18], %62 {strides = array<i32>} : memref<128x128xbf16, #tpu.memory_space<vmem>>, vector<128x3xbf16>,
      %c2_62 = arith.constant 2 : index
      %c1_63 = arith.constant 1 : index
      %c0_64 = arith.constant 0 : index
      %64 = vector.load %arg8[%c2_62, %c1_63, %c0_64] : memref<10x18x3xf32, #tpu.memory_space<vmem>>, vector<8x16x3xf32>
      %65 = vector.shape_cast %64 : vector<8x16x3xf32> to vector<128x3xf32>
      %66 = arith.truncf %65 : vector<128x3xf32> to vector<128x3xbf16>
      %c0_65 = arith.constant 0 : index
      %c21 = arith.constant 21 : index
      %67 = vector.load %arg9[%c0_65, %c21] : memref<128x128xbf16, #tpu.memory_space<vmem>>, vector<128x3xbf16>
      tpu.vector_store %arg9[%c0_65, %c21], %66 {strides = array<i32>} : memref<128x128xbf16, #tpu.memory_space<vmem>>, vector<128x3xbf16>,
      %c2_66 = arith.constant 2 : index
      %c2_67 = arith.constant 2 : index
      %c0_68 = arith.constant 0 : index
      %68 = vector.load %arg8[%c2_66, %c2_67, %c0_68] : memref<10x18x3xf32, #tpu.memory_space<vmem>>, vector<8x16x3xf32>
      %69 = vector.shape_cast %68 : vector<8x16x3xf32> to vector<128x3xf32>
      %70 = arith.truncf %69 : vector<128x3xf32> to vector<128x3xbf16>
      %c0_69 = arith.constant 0 : index
      %c24 = arith.constant 24 : index
      %71 = vector.load %arg9[%c0_69, %c24] : memref<128x128xbf16, #tpu.memory_space<vmem>>, vector<128x3xbf16>
      tpu.vector_store %arg9[%c0_69, %c24], %70 {strides = array<i32>} : memref<128x128xbf16, #tpu.memory_space<vmem>>, vector<128x3xbf16>,
    } else {
    }
    %c0 = arith.constant 0 : index
    %c0_1 = arith.constant 0 : index
    %4 = vector.load %arg9[%c0, %c0_1] : memref<128x128xbf16, #tpu.memory_space<vmem>>, vector<128x128xbf16>
    %c0_2 = arith.constant 0 : index
    %c0_3 = arith.constant 0 : index
    %5 = vector.load %arg4[%c0_2, %c0_3] : memref<128x8xbf16, #tpu.memory_space<vmem>>, vector<128x8xbf16>
    %cst = arith.constant dense<0.000000e+00> : vector<128x8xf32>
    %6 = tpu.matmul %4, %5, %cst {dimension_numbers = #tpu.dot_dimension_numbers<[1], [0], [0], [1], [0, 0, 1, 1], [], []>} : vector<128x128xbf16>, vector<128x8xbf16>, vector<128x8xf32> -> vector<128x8xf32>
    %c0_4 = arith.constant 0 : index
    %c0_5 = arith.constant 0 : index
    %7 = vector.load %arg5[%c0_4, %c0_5] : memref<1x8xf32, #tpu.memory_space<vmem>>, vector<1x8xf32>
    %8 = vector.broadcast %7 : vector<1x8xf32> to vector<128x8xf32>
    %9 = arith.addf %6, %8 : vector<128x8xf32>
    %cst_6 = arith.constant dense<0.000000e+00> : vector<8xf32>
    %10 = vector.multi_reduction <add>, %9, %cst_6 [0] : vector<128x8xf32> to vector<8xf32>
    %11 = vector.shape_cast %10 : vector<8xf32> to vector<1x8xf32>
    %12 = arith.mulf %9, %9 : vector<128x8xf32>
    %cst_7 = arith.constant dense<0.000000e+00> : vector<8xf32>
    %13 = vector.multi_reduction <add>, %12, %cst_7 [0] : vector<128x8xf32> to vector<8xf32>
    %14 = vector.shape_cast %13 : vector<8xf32> to vector<1x8xf32>
    %15 = vector.shape_cast %11 : vector<1x8xf32> to vector<1x1x1x8xf32>
    %c0_8 = arith.constant 0 : index
    %c0_9 = arith.constant 0 : index
    %c0_10 = arith.constant 0 : index
    %c0_11 = arith.constant 0 : index
    %16 = vector.load %arg7[%c0_8, %c0_9, %c0_10, %c0_11] : memref<1x1x2x8xf32, #tpu.memory_space<vmem>>, vector<1x1x1x8xf32>
    tpu.vector_store %arg7[%c0_8, %c0_9, %c0_10, %c0_11], %15 {strides = array<i32>} : memref<1x1x2x8xf32, #tpu.memory_space<vmem>>, vector<1x1x1x8xf32>,
    %17 = vector.shape_cast %14 : vector<1x8xf32> to vector<1x1x1x8xf32>
    %c0_12 = arith.constant 0 : index
    %c0_13 = arith.constant 0 : index
    %c1 = arith.constant 1 : index
    %c0_14 = arith.constant 0 : index
    %18 = vector.load %arg7[%c0_12, %c0_13, %c1, %c0_14] : memref<1x1x2x8xf32, #tpu.memory_space<vmem>>, vector<1x1x1x8xf32>
    tpu.vector_store %arg7[%c0_12, %c0_13, %c1, %c0_14], %17 {strides = array<i32>} : memref<1x1x2x8xf32, #tpu.memory_space<vmem>>, vector<1x1x1x8xf32>,
    %19 = vector.shape_cast %9 : vector<128x8xf32> to vector<1x8x16x8xf32>
    %20 = arith.truncf %19 : vector<1x8x16x8xf32> to vector<1x8x16x8xbf16>
    %c0_15 = arith.constant 0 : index
    %c0_16 = arith.constant 0 : index
    %c0_17 = arith.constant 0 : index
    %c0_18 = arith.constant 0 : index
    %21 = vector.load %arg6[%c0_15, %c0_16, %c0_17, %c0_18] : memref<1x8x16x8xbf16, #tpu.memory_space<vmem>>, vector<1x8x16x8xbf16>
    tpu.vector_store %arg6[%c0_15, %c0_16, %c0_17, %c0_18], %20 {strides = array<i32>} : memref<1x8x16x8xbf16, #tpu.memory_space<vmem>>, vector<1x8x16x8xbf16>,
    return
  }
  func.func @transform_0(%arg0: i32, %arg1: i32, %arg2: i32) -> (i32, i32, i32, i32) {
    %c0_i32 = arith.constant 0 : i32
    %c0_i32_0 = arith.constant 0 : i32
    %c0_i32_1 = arith.constant 0 : i32
    %c0_i32_2 = arith.constant 0 : i32
    return %arg0, %c0_i32, %c0_i32_0, %c0_i32_1 : i32, i32, i32, i32
  }
  func.func @transform_1(%arg0: i32, %arg1: i32, %arg2: i32) -> (i32, i32) {
    %c0_i32 = arith.constant 0 : i32
    %c0_i32_0 = arith.constant 0 : i32
    return %c0_i32, %arg2 : i32, i32
  }
  func.func @transform_2(%arg0: i32, %arg1: i32, %arg2: i32) -> (i32, i32) {
    %c0_i32 = arith.constant 0 : i32
    %c0_i32_0 = arith.constant 0 : i32
    return %c0_i32, %arg2 : i32, i32
  }
  func.func @transform_3(%arg0: i32, %arg1: i32, %arg2: i32) -> (i32, i32, i32, i32) {
    %c0_i32 = arith.constant 0 : i32
    %c0_i32_0 = arith.constant 0 : i32
    return %arg0, %arg1, %c0_i32, %arg2 : i32, i32, i32, i32
  }
  func.func @transform_4(%arg0: i32, %arg1: i32, %arg2: i32) -> (i32, i32, i32, i32) {
    %c0_i32 = arith.constant 0 : i32
    %c0_i32_0 = arith.constant 0 : i32
    return %arg0, %arg1, %c0_i32, %arg2 : i32, i32, i32, i32
  }
}

module attributes {stable_mosaic.version = 11 : i64} {
  func.func @bn_relu_pool_kernel(%arg0: i32, %arg1: i32, %arg2: i32, %arg3: memref<1x8x16x8xbf16, #tpu.memory_space<vmem>>, %arg4: memref<2x8xf32, #tpu.memory_space<vmem>>, %arg5: memref<1x4x8x8xbf16, #tpu.memory_space<vmem>>, %arg6: memref<8x16x8xf32, #tpu.memory_space<vmem>>) attributes {dimension_semantics = [#tpu.dimension_semantics<parallel>, #tpu.dimension_semantics<parallel>, #tpu.dimension_semantics<parallel>], iteration_bounds = array<i64: 2, 2, 1>, scalar_prefetch = 0 : i64, scratch_operands = 1 : i64, tpu.core_type = #tpu.core_type<tc>, window_params = [{transform_indices = @transform_0, window_bounds = array<i64: 1, 8, 16, 8>}, {transform_indices = @transform_1, window_bounds = array<i64: 2, 8>}, {transform_indices = @transform_2, window_bounds = array<i64: 1, 4, 8, 8>}]} {
    %c0 = arith.constant 0 : index
    %c0_0 = arith.constant 0 : index
    %0 = vector.load %arg4[%c0, %c0_0] : memref<2x8xf32, #tpu.memory_space<vmem>>, vector<1x8xf32>
    %c1 = arith.constant 1 : index
    %c0_1 = arith.constant 0 : index
    %1 = vector.load %arg4[%c1, %c0_1] : memref<2x8xf32, #tpu.memory_space<vmem>>, vector<1x8xf32>
    %c0_2 = arith.constant 0 : index
    %c0_3 = arith.constant 0 : index
    %c0_4 = arith.constant 0 : index
    %c0_5 = arith.constant 0 : index
    %2 = vector.load %arg3[%c0_2, %c0_3, %c0_4, %c0_5] : memref<1x8x16x8xbf16, #tpu.memory_space<vmem>>, vector<1x8x16x8xbf16>
    %3 = vector.shape_cast %2 : vector<1x8x16x8xbf16> to vector<8x16x8xbf16>
    %4 = arith.extf %3 : vector<8x16x8xbf16> to vector<8x16x8xf32>
    %5 = vector.shape_cast %0 : vector<1x8xf32> to vector<1x1x8xf32>
    %6 = vector.broadcast %5 : vector<1x1x8xf32> to vector<8x16x8xf32>
    %7 = arith.mulf %4, %6 : vector<8x16x8xf32>
    %8 = vector.shape_cast %1 : vector<1x8xf32> to vector<1x1x8xf32>
    %9 = vector.broadcast %8 : vector<1x1x8xf32> to vector<8x16x8xf32>
    %10 = arith.addf %7, %9 : vector<8x16x8xf32>
    %cst = arith.constant 0.000000e+00 : f32
    %11 = vector.broadcast %cst : f32 to vector<8x16x8xf32>
    %12 = arith.maximumf %10, %11 : vector<8x16x8xf32>
    %c0_6 = arith.constant 0 : index
    %c0_7 = arith.constant 0 : index
    %c0_8 = arith.constant 0 : index
    %13 = vector.load %arg6[%c0_6, %c0_7, %c0_8] : memref<8x16x8xf32, #tpu.memory_space<vmem>>, vector<8x16x8xf32>
    tpu.vector_store %arg6[%c0_6, %c0_7, %c0_8], %12 {strides = array<i32>} : memref<8x16x8xf32, #tpu.memory_space<vmem>>, vector<8x16x8xf32>,
    %c0_9 = arith.constant 0 : index
    %c0_10 = arith.constant 0 : index
    %c0_11 = arith.constant 0 : index
    %14 = tpu.strided_load %arg6[%c0_9, %c0_10, %c0_11] {strides = array<i32: 1, 2, 1>} : memref<8x16x8xf32, #tpu.memory_space<vmem>>, vector<8x8x8xf32>
    %c0_12 = arith.constant 0 : index
    %c1_13 = arith.constant 1 : index
    %c0_14 = arith.constant 0 : index
    %15 = tpu.strided_load %arg6[%c0_12, %c1_13, %c0_14] {strides = array<i32: 1, 2, 1>} : memref<8x16x8xf32, #tpu.memory_space<vmem>>, vector<8x8x8xf32>
    %16 = arith.maximumf %14, %15 : vector<8x8x8xf32>
    %17 = vector.shape_cast %16 : vector<8x8x8xf32> to vector<4x2x8x8xf32>
    %cst_15 = arith.constant dense<0xFF800000> : vector<4x8x8xf32>
    %18 = vector.multi_reduction <maximumf>, %17, %cst_15 [1] : vector<4x2x8x8xf32> to vector<4x8x8xf32>
    %19 = vector.shape_cast %18 : vector<4x8x8xf32> to vector<1x4x8x8xf32>
    %20 = arith.truncf %19 : vector<1x4x8x8xf32> to vector<1x4x8x8xbf16>
    %c0_16 = arith.constant 0 : index
    %c0_17 = arith.constant 0 : index
    %c0_18 = arith.constant 0 : index
    %c0_19 = arith.constant 0 : index
    %21 = vector.load %arg5[%c0_16, %c0_17, %c0_18, %c0_19] : memref<1x4x8x8xbf16, #tpu.memory_space<vmem>>, vector<1x4x8x8xbf16>
    tpu.vector_store %arg5[%c0_16, %c0_17, %c0_18, %c0_19], %20 {strides = array<i32>} : memref<1x4x8x8xbf16, #tpu.memory_space<vmem>>, vector<1x4x8x8xbf16>,
    return
  }
  func.func @transform_0(%arg0: i32, %arg1: i32, %arg2: i32) -> (i32, i32, i32, i32) {
    %c0_i32 = arith.constant 0 : i32
    %c0_i32_0 = arith.constant 0 : i32
    return %arg0, %arg1, %c0_i32, %arg2 : i32, i32, i32, i32
  }
  func.func @transform_1(%arg0: i32, %arg1: i32, %arg2: i32) -> (i32, i32) {
    %c0_i32 = arith.constant 0 : i32
    %c0_i32_0 = arith.constant 0 : i32
    return %c0_i32, %arg2 : i32, i32
  }
  func.func @transform_2(%arg0: i32, %arg1: i32, %arg2: i32) -> (i32, i32, i32, i32) {
    %c0_i32 = arith.constant 0 : i32
    %c0_i32_0 = arith.constant 0 : i32
    return %arg0, %arg1, %c0_i32, %arg2 : i32, i32, i32, i32
  }
}

module attributes {stable_mosaic.version = 11 : i64} {
  func.func @conv3x3_kernel(%arg0: i32, %arg1: i32, %arg2: i32, %arg3: memref<1x8x8x8xbf16, #tpu.memory_space<vmem>>, %arg4: memref<128x16xbf16, #tpu.memory_space<vmem>>, %arg5: memref<1x16xf32, #tpu.memory_space<vmem>>, %arg6: memref<1x4x8x16xbf16, #tpu.memory_space<vmem>>, %arg7: memref<1x1x2x16xf32, #tpu.memory_space<vmem>>, %arg8: memref<6x10x8xf32, #tpu.memory_space<vmem>>, %arg9: memref<32x128xbf16, #tpu.memory_space<vmem>>) attributes {dimension_semantics = [#tpu.dimension_semantics<parallel>, #tpu.dimension_semantics<parallel>, #tpu.dimension_semantics<arbitrary>], iteration_bounds = array<i64: 2, 2, 1>, scalar_prefetch = 0 : i64, scratch_operands = 2 : i64, tpu.core_type = #tpu.core_type<tc>, window_params = [{transform_indices = @transform_0, window_bounds = array<i64: 1, 8, 8, 8>}, {transform_indices = @transform_1, window_bounds = array<i64: 128, 16>}, {transform_indices = @transform_2, window_bounds = array<i64: 1, 16>}, {transform_indices = @transform_3, window_bounds = array<i64: 1, 4, 8, 16>}, {transform_indices = @transform_4, window_bounds = array<i64: 1, 1, 2, 16>}]} {
    %c4_i32 = arith.constant 4 : i32
    %0 = arith.muli %arg1, %c4_i32 : i32
    %c0_i32 = arith.constant 0 : i32
    %1 = arith.cmpi eq, %arg2, %c0_i32 : i32
    %2 = arith.extui %1 : i1 to i32
    %c0_i32_0 = arith.constant 0 : i32
    %3 = arith.cmpi ne, %2, %c0_i32_0 : i32
    scf.if %3 {
      %cst_19 = arith.constant 0.000000e+00 : f32
      %22 = vector.broadcast %cst_19 : f32 to vector<6x10x8xf32>
      %c0_20 = arith.constant 0 : index
      %c0_21 = arith.constant 0 : index
      %c0_22 = arith.constant 0 : index
      %23 = vector.load %arg8[%c0_20, %c0_21, %c0_22] : memref<6x10x8xf32, #tpu.memory_space<vmem>>, vector<6x10x8xf32>
      tpu.vector_store %arg8[%c0_20, %c0_21, %c0_22], %22 {strides = array<i32>} : memref<6x10x8xf32, #tpu.memory_space<vmem>>, vector<6x10x8xf32>,
      %c0_23 = arith.constant 0 : index
      %24 = arith.index_cast %0 : i32 to index
      %c0_24 = arith.constant 0 : index
      %c0_25 = arith.constant 0 : index
      %25 = vector.load %arg3[%c0_23, %24, %c0_24, %c0_25] : memref<1x8x8x8xbf16, #tpu.memory_space<vmem>>, vector<1x4x8x8xbf16>
      %26 = vector.shape_cast %25 : vector<1x4x8x8xbf16> to vector<4x8x8xbf16>
      %27 = arith.extf %26 : vector<4x8x8xbf16> to vector<4x8x8xf32>
      %c1_26 = arith.constant 1 : index
      %c1_27 = arith.constant 1 : index
      %c0_28 = arith.constant 0 : index
      %28 = vector.load %arg8[%c1_26, %c1_27, %c0_28] : memref<6x10x8xf32, #tpu.memory_space<vmem>>, vector<4x8x8xf32>
      tpu.vector_store %arg8[%c1_26, %c1_27, %c0_28], %27 {strides = array<i32>} : memref<6x10x8xf32, #tpu.memory_space<vmem>>, vector<4x8x8xf32>,
      %c0_i32_29 = arith.constant 0 : i32
      %29 = arith.cmpi sgt, %arg1, %c0_i32_29 : i32
      %30 = arith.extui %29 : i1 to i32
      %c0_i32_30 = arith.constant 0 : i32
      %31 = arith.cmpi ne, %30, %c0_i32_30 : i32
      scf.if %31 {
        %c1_i32_70 = arith.constant 1 : i32
        %73 = arith.subi %0, %c1_i32_70 : i32
        %c0_71 = arith.constant 0 : index
        %74 = arith.index_cast %73 : i32 to index
        %c0_72 = arith.constant 0 : index
        %c0_73 = arith.constant 0 : index
        %75 = vector.load %arg3[%c0_71, %74, %c0_72, %c0_73] : memref<1x8x8x8xbf16, #tpu.memory_space<vmem>>, vector<1x1x8x8xbf16>
        %76 = vector.shape_cast %75 : vector<1x1x8x8xbf16> to vector<1x8x8xbf16>
        %77 = arith.extf %76 : vector<1x8x8xbf16> to vector<1x8x8xf32>
        %c0_74 = arith.constant 0 : index
        %c1_75 = arith.constant 1 : index
        %c0_76 = arith.constant 0 : index
        %78 = vector.load %arg8[%c0_74, %c1_75, %c0_76] : memref<6x10x8xf32, #tpu.memory_space<vmem>>, vector<1x8x8xf32>
        tpu.vector_store %arg8[%c0_74, %c1_75, %c0_76], %77 {strides = array<i32>} : memref<6x10x8xf32, #tpu.memory_space<vmem>>, vector<1x8x8xf32>,
      } else {
      }
      %c1_i32 = arith.constant 1 : i32
      %32 = arith.cmpi slt, %arg1, %c1_i32 : i32
      %33 = arith.extui %32 : i1 to i32
      %c0_i32_31 = arith.constant 0 : i32
      %34 = arith.cmpi ne, %33, %c0_i32_31 : i32
      scf.if %34 {
        %c4_i32_70 = arith.constant 4 : i32
        %73 = arith.addi %0, %c4_i32_70 : i32
        %c0_71 = arith.constant 0 : index
        %74 = arith.index_cast %73 : i32 to index
        %c0_72 = arith.constant 0 : index
        %c0_73 = arith.constant 0 : index
        %75 = vector.load %arg3[%c0_71, %74, %c0_72, %c0_73] : memref<1x8x8x8xbf16, #tpu.memory_space<vmem>>, vector<1x1x8x8xbf16>
        %76 = vector.shape_cast %75 : vector<1x1x8x8xbf16> to vector<1x8x8xbf16>
        %77 = arith.extf %76 : vector<1x8x8xbf16> to vector<1x8x8xf32>
        %c5 = arith.constant 5 : index
        %c1_74 = arith.constant 1 : index
        %c0_75 = arith.constant 0 : index
        %78 = vector.load %arg8[%c5, %c1_74, %c0_75] : memref<6x10x8xf32, #tpu.memory_space<vmem>>, vector<1x8x8xf32>
        tpu.vector_store %arg8[%c5, %c1_74, %c0_75], %77 {strides = array<i32>} : memref<6x10x8xf32, #tpu.memory_space<vmem>>, vector<1x8x8xf32>,
      } else {
      }
      %cst_32 = arith.constant 0.000000e+00 : bf16
      %35 = vector.broadcast %cst_32 : bf16 to vector<32x56xbf16>
      %c0_33 = arith.constant 0 : index
      %c72 = arith.constant 72 : index
      %36 = vector.load %arg9[%c0_33, %c72] : memref<32x128xbf16, #tpu.memory_space<vmem>>, vector<32x56xbf16>
      tpu.vector_store %arg9[%c0_33, %c72], %35 {strides = array<i32>} : memref<32x128xbf16, #tpu.memory_space<vmem>>, vector<32x56xbf16>,
      %c0_34 = arith.constant 0 : index
      %c0_35 = arith.constant 0 : index
      %c0_36 = arith.constant 0 : index
      %37 = vector.load %arg8[%c0_34, %c0_35, %c0_36] : memref<6x10x8xf32, #tpu.memory_space<vmem>>, vector<4x8x8xf32>
      %38 = vector.shape_cast %37 : vector<4x8x8xf32> to vector<32x8xf32>
      %39 = arith.truncf %38 : vector<32x8xf32> to vector<32x8xbf16>
      %c0_37 = arith.constant 0 : index
      %c0_38 = arith.constant 0 : index
      %40 = vector.load %arg9[%c0_37, %c0_38] : memref<32x128xbf16, #tpu.memory_space<vmem>>, vector<32x8xbf16>
      tpu.vector_store %arg9[%c0_37, %c0_38], %39 {strides = array<i32>} : memref<32x128xbf16, #tpu.memory_space<vmem>>, vector<32x8xbf16>,
      %c0_39 = arith.constant 0 : index
      %c1_40 = arith.constant 1 : index
      %c0_41 = arith.constant 0 : index
      %41 = vector.load %arg8[%c0_39, %c1_40, %c0_41] : memref<6x10x8xf32, #tpu.memory_space<vmem>>, vector<4x8x8xf32>
      %42 = vector.shape_cast %41 : vector<4x8x8xf32> to vector<32x8xf32>
      %43 = arith.truncf %42 : vector<32x8xf32> to vector<32x8xbf16>
      %c0_42 = arith.constant 0 : index
      %c8 = arith.constant 8 : index
      %44 = vector.load %arg9[%c0_42, %c8] : memref<32x128xbf16, #tpu.memory_space<vmem>>, vector<32x8xbf16>
      tpu.vector_store %arg9[%c0_42, %c8], %43 {strides = array<i32>} : memref<32x128xbf16, #tpu.memory_space<vmem>>, vector<32x8xbf16>,
      %c0_43 = arith.constant 0 : index
      %c2 = arith.constant 2 : index
      %c0_44 = arith.constant 0 : index
      %45 = vector.load %arg8[%c0_43, %c2, %c0_44] : memref<6x10x8xf32, #tpu.memory_space<vmem>>, vector<4x8x8xf32>
      %46 = vector.shape_cast %45 : vector<4x8x8xf32> to vector<32x8xf32>
      %47 = arith.truncf %46 : vector<32x8xf32> to vector<32x8xbf16>
      %c0_45 = arith.constant 0 : index
      %c16 = arith.constant 16 : index
      %48 = vector.load %arg9[%c0_45, %c16] : memref<32x128xbf16, #tpu.memory_space<vmem>>, vector<32x8xbf16>
      tpu.vector_store %arg9[%c0_45, %c16], %47 {strides = array<i32>} : memref<32x128xbf16, #tpu.memory_space<vmem>>, vector<32x8xbf16>,
      %c1_46 = arith.constant 1 : index
      %c0_47 = arith.constant 0 : index
      %c0_48 = arith.constant 0 : index
      %49 = vector.load %arg8[%c1_46, %c0_47, %c0_48] : memref<6x10x8xf32, #tpu.memory_space<vmem>>, vector<4x8x8xf32>
      %50 = vector.shape_cast %49 : vector<4x8x8xf32> to vector<32x8xf32>
      %51 = arith.truncf %50 : vector<32x8xf32> to vector<32x8xbf16>
      %c0_49 = arith.constant 0 : index
      %c24 = arith.constant 24 : index
      %52 = vector.load %arg9[%c0_49, %c24] : memref<32x128xbf16, #tpu.memory_space<vmem>>, vector<32x8xbf16>
      tpu.vector_store %arg9[%c0_49, %c24], %51 {strides = array<i32>} : memref<32x128xbf16, #tpu.memory_space<vmem>>, vector<32x8xbf16>,
      %c1_50 = arith.constant 1 : index
      %c1_51 = arith.constant 1 : index
      %c0_52 = arith.constant 0 : index
      %53 = vector.load %arg8[%c1_50, %c1_51, %c0_52] : memref<6x10x8xf32, #tpu.memory_space<vmem>>, vector<4x8x8xf32>
      %54 = vector.shape_cast %53 : vector<4x8x8xf32> to vector<32x8xf32>
      %55 = arith.truncf %54 : vector<32x8xf32> to vector<32x8xbf16>
      %c0_53 = arith.constant 0 : index
      %c32 = arith.constant 32 : index
      %56 = vector.load %arg9[%c0_53, %c32] : memref<32x128xbf16, #tpu.memory_space<vmem>>, vector<32x8xbf16>
      tpu.vector_store %arg9[%c0_53, %c32], %55 {strides = array<i32>} : memref<32x128xbf16, #tpu.memory_space<vmem>>, vector<32x8xbf16>,
      %c1_54 = arith.constant 1 : index
      %c2_55 = arith.constant 2 : index
      %c0_56 = arith.constant 0 : index
      %57 = vector.load %arg8[%c1_54, %c2_55, %c0_56] : memref<6x10x8xf32, #tpu.memory_space<vmem>>, vector<4x8x8xf32>
      %58 = vector.shape_cast %57 : vector<4x8x8xf32> to vector<32x8xf32>
      %59 = arith.truncf %58 : vector<32x8xf32> to vector<32x8xbf16>
      %c0_57 = arith.constant 0 : index
      %c40 = arith.constant 40 : index
      %60 = vector.load %arg9[%c0_57, %c40] : memref<32x128xbf16, #tpu.memory_space<vmem>>, vector<32x8xbf16>
      tpu.vector_store %arg9[%c0_57, %c40], %59 {strides = array<i32>} : memref<32x128xbf16, #tpu.memory_space<vmem>>, vector<32x8xbf16>,
      %c2_58 = arith.constant 2 : index
      %c0_59 = arith.constant 0 : index
      %c0_60 = arith.constant 0 : index
      %61 = vector.load %arg8[%c2_58, %c0_59, %c0_60] : memref<6x10x8xf32, #tpu.memory_space<vmem>>, vector<4x8x8xf32>
      %62 = vector.shape_cast %61 : vector<4x8x8xf32> to vector<32x8xf32>
      %63 = arith.truncf %62 : vector<32x8xf32> to vector<32x8xbf16>
      %c0_61 = arith.constant 0 : index
      %c48 = arith.constant 48 : index
      %64 = vector.load %arg9[%c0_61, %c48] : memref<32x128xbf16, #tpu.memory_space<vmem>>, vector<32x8xbf16>
      tpu.vector_store %arg9[%c0_61, %c48], %63 {strides = array<i32>} : memref<32x128xbf16, #tpu.memory_space<vmem>>, vector<32x8xbf16>,
      %c2_62 = arith.constant 2 : index
      %c1_63 = arith.constant 1 : index
      %c0_64 = arith.constant 0 : index
      %65 = vector.load %arg8[%c2_62, %c1_63, %c0_64] : memref<6x10x8xf32, #tpu.memory_space<vmem>>, vector<4x8x8xf32>
      %66 = vector.shape_cast %65 : vector<4x8x8xf32> to vector<32x8xf32>
      %67 = arith.truncf %66 : vector<32x8xf32> to vector<32x8xbf16>
      %c0_65 = arith.constant 0 : index
      %c56 = arith.constant 56 : index
      %68 = vector.load %arg9[%c0_65, %c56] : memref<32x128xbf16, #tpu.memory_space<vmem>>, vector<32x8xbf16>
      tpu.vector_store %arg9[%c0_65, %c56], %67 {strides = array<i32>} : memref<32x128xbf16, #tpu.memory_space<vmem>>, vector<32x8xbf16>,
      %c2_66 = arith.constant 2 : index
      %c2_67 = arith.constant 2 : index
      %c0_68 = arith.constant 0 : index
      %69 = vector.load %arg8[%c2_66, %c2_67, %c0_68] : memref<6x10x8xf32, #tpu.memory_space<vmem>>, vector<4x8x8xf32>
      %70 = vector.shape_cast %69 : vector<4x8x8xf32> to vector<32x8xf32>
      %71 = arith.truncf %70 : vector<32x8xf32> to vector<32x8xbf16>
      %c0_69 = arith.constant 0 : index
      %c64 = arith.constant 64 : index
      %72 = vector.load %arg9[%c0_69, %c64] : memref<32x128xbf16, #tpu.memory_space<vmem>>, vector<32x8xbf16>
      tpu.vector_store %arg9[%c0_69, %c64], %71 {strides = array<i32>} : memref<32x128xbf16, #tpu.memory_space<vmem>>, vector<32x8xbf16>,
    } else {
    }
    %c0 = arith.constant 0 : index
    %c0_1 = arith.constant 0 : index
    %4 = vector.load %arg9[%c0, %c0_1] : memref<32x128xbf16, #tpu.memory_space<vmem>>, vector<32x128xbf16>
    %c0_2 = arith.constant 0 : index
    %c0_3 = arith.constant 0 : index
    %5 = vector.load %arg4[%c0_2, %c0_3] : memref<128x16xbf16, #tpu.memory_space<vmem>>, vector<128x16xbf16>
    %cst = arith.constant dense<0.000000e+00> : vector<32x16xf32>
    %6 = tpu.matmul %4, %5, %cst {dimension_numbers = #tpu.dot_dimension_numbers<[1], [0], [0], [1], [0, 0, 1, 1], [], []>} : vector<32x128xbf16>, vector<128x16xbf16>, vector<32x16xf32> -> vector<32x16xf32>
    %c0_4 = arith.constant 0 : index
    %c0_5 = arith.constant 0 : index
    %7 = vector.load %arg5[%c0_4, %c0_5] : memref<1x16xf32, #tpu.memory_space<vmem>>, vector<1x16xf32>
    %8 = vector.broadcast %7 : vector<1x16xf32> to vector<32x16xf32>
    %9 = arith.addf %6, %8 : vector<32x16xf32>
    %cst_6 = arith.constant dense<0.000000e+00> : vector<16xf32>
    %10 = vector.multi_reduction <add>, %9, %cst_6 [0] : vector<32x16xf32> to vector<16xf32>
    %11 = vector.shape_cast %10 : vector<16xf32> to vector<1x16xf32>
    %12 = arith.mulf %9, %9 : vector<32x16xf32>
    %cst_7 = arith.constant dense<0.000000e+00> : vector<16xf32>
    %13 = vector.multi_reduction <add>, %12, %cst_7 [0] : vector<32x16xf32> to vector<16xf32>
    %14 = vector.shape_cast %13 : vector<16xf32> to vector<1x16xf32>
    %15 = vector.shape_cast %11 : vector<1x16xf32> to vector<1x1x1x16xf32>
    %c0_8 = arith.constant 0 : index
    %c0_9 = arith.constant 0 : index
    %c0_10 = arith.constant 0 : index
    %c0_11 = arith.constant 0 : index
    %16 = vector.load %arg7[%c0_8, %c0_9, %c0_10, %c0_11] : memref<1x1x2x16xf32, #tpu.memory_space<vmem>>, vector<1x1x1x16xf32>
    tpu.vector_store %arg7[%c0_8, %c0_9, %c0_10, %c0_11], %15 {strides = array<i32>} : memref<1x1x2x16xf32, #tpu.memory_space<vmem>>, vector<1x1x1x16xf32>,
    %17 = vector.shape_cast %14 : vector<1x16xf32> to vector<1x1x1x16xf32>
    %c0_12 = arith.constant 0 : index
    %c0_13 = arith.constant 0 : index
    %c1 = arith.constant 1 : index
    %c0_14 = arith.constant 0 : index
    %18 = vector.load %arg7[%c0_12, %c0_13, %c1, %c0_14] : memref<1x1x2x16xf32, #tpu.memory_space<vmem>>, vector<1x1x1x16xf32>
    tpu.vector_store %arg7[%c0_12, %c0_13, %c1, %c0_14], %17 {strides = array<i32>} : memref<1x1x2x16xf32, #tpu.memory_space<vmem>>, vector<1x1x1x16xf32>,
    %19 = vector.shape_cast %9 : vector<32x16xf32> to vector<1x4x8x16xf32>
    %20 = arith.truncf %19 : vector<1x4x8x16xf32> to vector<1x4x8x16xbf16>
    %c0_15 = arith.constant 0 : index
    %c0_16 = arith.constant 0 : index
    %c0_17 = arith.constant 0 : index
    %c0_18 = arith.constant 0 : index
    %21 = vector.load %arg6[%c0_15, %c0_16, %c0_17, %c0_18] : memref<1x4x8x16xbf16, #tpu.memory_space<vmem>>, vector<1x4x8x16xbf16>
    tpu.vector_store %arg6[%c0_15, %c0_16, %c0_17, %c0_18], %20 {strides = array<i32>} : memref<1x4x8x16xbf16, #tpu.memory_space<vmem>>, vector<1x4x8x16xbf16>,
    return
  }
  func.func @transform_0(%arg0: i32, %arg1: i32, %arg2: i32) -> (i32, i32, i32, i32) {
    %c0_i32 = arith.constant 0 : i32
    %c0_i32_0 = arith.constant 0 : i32
    %c0_i32_1 = arith.constant 0 : i32
    %c0_i32_2 = arith.constant 0 : i32
    return %arg0, %c0_i32, %c0_i32_0, %c0_i32_1 : i32, i32, i32, i32
  }
  func.func @transform_1(%arg0: i32, %arg1: i32, %arg2: i32) -> (i32, i32) {
    %c0_i32 = arith.constant 0 : i32
    %c0_i32_0 = arith.constant 0 : i32
    return %c0_i32, %arg2 : i32, i32
  }
  func.func @transform_2(%arg0: i32, %arg1: i32, %arg2: i32) -> (i32, i32) {
    %c0_i32 = arith.constant 0 : i32
    %c0_i32_0 = arith.constant 0 : i32
    return %c0_i32, %arg2 : i32, i32
  }
  func.func @transform_3(%arg0: i32, %arg1: i32, %arg2: i32) -> (i32, i32, i32, i32) {
    %c0_i32 = arith.constant 0 : i32
    %c0_i32_0 = arith.constant 0 : i32
    return %arg0, %arg1, %c0_i32, %arg2 : i32, i32, i32, i32
  }
  func.func @transform_4(%arg0: i32, %arg1: i32, %arg2: i32) -> (i32, i32, i32, i32) {
    %c0_i32 = arith.constant 0 : i32
    %c0_i32_0 = arith.constant 0 : i32
    return %arg0, %arg1, %c0_i32, %arg2 : i32, i32, i32, i32
  }
}

module attributes {stable_mosaic.version = 11 : i64} {
  func.func @bn_scale_shift_kernel(%arg0: i32, %arg1: memref<2x2x2x16xf32, #tpu.memory_space<vmem>>, %arg2: memref<1x16xf32, #tpu.memory_space<vmem>>, %arg3: memref<1x16xf32, #tpu.memory_space<vmem>>, %arg4: memref<2x16xf32, #tpu.memory_space<vmem>>) attributes {dimension_semantics = [#tpu.dimension_semantics<parallel>], iteration_bounds = array<i64: 1>, scalar_prefetch = 0 : i64, scratch_operands = 0 : i64, tpu.core_type = #tpu.core_type<tc>, window_params = [{transform_indices = @transform_0, window_bounds = array<i64: 2, 2, 2, 16>}, {transform_indices = @transform_1, window_bounds = array<i64: 1, 16>}, {transform_indices = @transform_2, window_bounds = array<i64: 1, 16>}, {transform_indices = @transform_3, window_bounds = array<i64: 2, 16>}]} {
    %c0 = arith.constant 0 : index
    %c0_0 = arith.constant 0 : index
    %c0_1 = arith.constant 0 : index
    %c0_2 = arith.constant 0 : index
    %0 = vector.load %arg1[%c0, %c0_0, %c0_1, %c0_2] : memref<2x2x2x16xf32, #tpu.memory_space<vmem>>, vector<2x2x2x16xf32>
    %cst = arith.constant dense<0.000000e+00> : vector<2x2x16xf32>
    %1 = vector.multi_reduction <add>, %0, %cst [0] : vector<2x2x2x16xf32> to vector<2x2x16xf32>
    %cst_3 = arith.constant dense<0.000000e+00> : vector<2x16xf32>
    %2 = vector.multi_reduction <add>, %1, %cst_3 [0] : vector<2x2x16xf32> to vector<2x16xf32>
    %3 = vector.extract_strided_slice %2 {offsets = [0, 0], sizes = [1, 16], strides = [1, 1]} : vector<2x16xf32> to vector<1x16xf32>
    %cst_4 = arith.constant 7.812500e-03 : f32
    %4 = vector.broadcast %cst_4 : f32 to vector<1x16xf32>
    %5 = arith.mulf %3, %4 : vector<1x16xf32>
    %6 = vector.extract_strided_slice %2 {offsets = [1, 0], sizes = [1, 16], strides = [1, 1]} : vector<2x16xf32> to vector<1x16xf32>
    %cst_5 = arith.constant 7.812500e-03 : f32
    %7 = vector.broadcast %cst_5 : f32 to vector<1x16xf32>
    %8 = arith.mulf %6, %7 : vector<1x16xf32>
    %9 = arith.mulf %5, %5 : vector<1x16xf32>
    %10 = arith.subf %8, %9 : vector<1x16xf32>
    %c0_6 = arith.constant 0 : index
    %c0_7 = arith.constant 0 : index
    %11 = vector.load %arg2[%c0_6, %c0_7] : memref<1x16xf32, #tpu.memory_space<vmem>>, vector<1x16xf32>
    %cst_8 = arith.constant 9.99999974E-6 : f32
    %12 = vector.broadcast %cst_8 : f32 to vector<1x16xf32>
    %13 = arith.addf %10, %12 : vector<1x16xf32>
    %14 = math.rsqrt %13 : vector<1x16xf32>
    %15 = arith.mulf %11, %14 : vector<1x16xf32>
    %c0_9 = arith.constant 0 : index
    %c0_10 = arith.constant 0 : index
    %16 = vector.load %arg3[%c0_9, %c0_10] : memref<1x16xf32, #tpu.memory_space<vmem>>, vector<1x16xf32>
    %17 = arith.mulf %5, %15 : vector<1x16xf32>
    %18 = arith.subf %16, %17 : vector<1x16xf32>
    %c0_11 = arith.constant 0 : index
    %c0_12 = arith.constant 0 : index
    %19 = vector.load %arg4[%c0_11, %c0_12] : memref<2x16xf32, #tpu.memory_space<vmem>>, vector<1x16xf32>
    tpu.vector_store %arg4[%c0_11, %c0_12], %15 {strides = array<i32>} : memref<2x16xf32, #tpu.memory_space<vmem>>, vector<1x16xf32>,
    %c1 = arith.constant 1 : index
    %c0_13 = arith.constant 0 : index
    %20 = vector.load %arg4[%c1, %c0_13] : memref<2x16xf32, #tpu.memory_space<vmem>>, vector<1x16xf32>
    tpu.vector_store %arg4[%c1, %c0_13], %18 {strides = array<i32>} : memref<2x16xf32, #tpu.memory_space<vmem>>, vector<1x16xf32>,
    return
  }
  func.func @transform_0(%arg0: i32) -> (i32, i32, i32, i32) {
    %c0_i32 = arith.constant 0 : i32
    %c0_i32_0 = arith.constant 0 : i32
    %c0_i32_1 = arith.constant 0 : i32
    %c0_i32_2 = arith.constant 0 : i32
    return %c0_i32, %c0_i32_0, %c0_i32_1, %arg0 : i32, i32, i32, i32
  }
  func.func @transform_1(%arg0: i32) -> (i32, i32) {
    %c0_i32 = arith.constant 0 : i32
    %c0_i32_0 = arith.constant 0 : i32
    return %c0_i32, %arg0 : i32, i32
  }
  func.func @transform_2(%arg0: i32) -> (i32, i32) {
    %c0_i32 = arith.constant 0 : i32
    %c0_i32_0 = arith.constant 0 : i32
    return %c0_i32, %arg0 : i32, i32
  }
  func.func @transform_3(%arg0: i32) -> (i32, i32) {
    %c0_i32 = arith.constant 0 : i32
    %c0_i32_0 = arith.constant 0 : i32
    return %c0_i32, %arg0 : i32, i32
  }
}

module attributes {stable_mosaic.version = 11 : i64} {
  func.func @bn_relu_pool_kernel(%arg0: i32, %arg1: i32, %arg2: i32, %arg3: memref<1x4x8x16xbf16, #tpu.memory_space<vmem>>, %arg4: memref<2x16xf32, #tpu.memory_space<vmem>>, %arg5: memref<1x2x4x16xbf16, #tpu.memory_space<vmem>>, %arg6: memref<4x8x16xf32, #tpu.memory_space<vmem>>) attributes {dimension_semantics = [#tpu.dimension_semantics<parallel>, #tpu.dimension_semantics<parallel>, #tpu.dimension_semantics<parallel>], iteration_bounds = array<i64: 2, 2, 1>, scalar_prefetch = 0 : i64, scratch_operands = 1 : i64, tpu.core_type = #tpu.core_type<tc>, window_params = [{transform_indices = @transform_0, window_bounds = array<i64: 1, 4, 8, 16>}, {transform_indices = @transform_1, window_bounds = array<i64: 2, 16>}, {transform_indices = @transform_2, window_bounds = array<i64: 1, 2, 4, 16>}]} {
    %c0 = arith.constant 0 : index
    %c0_0 = arith.constant 0 : index
    %0 = vector.load %arg4[%c0, %c0_0] : memref<2x16xf32, #tpu.memory_space<vmem>>, vector<1x16xf32>
    %c1 = arith.constant 1 : index
    %c0_1 = arith.constant 0 : index
    %1 = vector.load %arg4[%c1, %c0_1] : memref<2x16xf32, #tpu.memory_space<vmem>>, vector<1x16xf32>
    %c0_2 = arith.constant 0 : index
    %c0_3 = arith.constant 0 : index
    %c0_4 = arith.constant 0 : index
    %c0_5 = arith.constant 0 : index
    %2 = vector.load %arg3[%c0_2, %c0_3, %c0_4, %c0_5] : memref<1x4x8x16xbf16, #tpu.memory_space<vmem>>, vector<1x4x8x16xbf16>
    %3 = vector.shape_cast %2 : vector<1x4x8x16xbf16> to vector<4x8x16xbf16>
    %4 = arith.extf %3 : vector<4x8x16xbf16> to vector<4x8x16xf32>
    %5 = vector.shape_cast %0 : vector<1x16xf32> to vector<1x1x16xf32>
    %6 = vector.broadcast %5 : vector<1x1x16xf32> to vector<4x8x16xf32>
    %7 = arith.mulf %4, %6 : vector<4x8x16xf32>
    %8 = vector.shape_cast %1 : vector<1x16xf32> to vector<1x1x16xf32>
    %9 = vector.broadcast %8 : vector<1x1x16xf32> to vector<4x8x16xf32>
    %10 = arith.addf %7, %9 : vector<4x8x16xf32>
    %cst = arith.constant 0.000000e+00 : f32
    %11 = vector.broadcast %cst : f32 to vector<4x8x16xf32>
    %12 = arith.maximumf %10, %11 : vector<4x8x16xf32>
    %c0_6 = arith.constant 0 : index
    %c0_7 = arith.constant 0 : index
    %c0_8 = arith.constant 0 : index
    %13 = vector.load %arg6[%c0_6, %c0_7, %c0_8] : memref<4x8x16xf32, #tpu.memory_space<vmem>>, vector<4x8x16xf32>
    tpu.vector_store %arg6[%c0_6, %c0_7, %c0_8], %12 {strides = array<i32>} : memref<4x8x16xf32, #tpu.memory_space<vmem>>, vector<4x8x16xf32>,
    %c0_9 = arith.constant 0 : index
    %c0_10 = arith.constant 0 : index
    %c0_11 = arith.constant 0 : index
    %14 = tpu.strided_load %arg6[%c0_9, %c0_10, %c0_11] {strides = array<i32: 1, 2, 1>} : memref<4x8x16xf32, #tpu.memory_space<vmem>>, vector<4x4x16xf32>
    %c0_12 = arith.constant 0 : index
    %c1_13 = arith.constant 1 : index
    %c0_14 = arith.constant 0 : index
    %15 = tpu.strided_load %arg6[%c0_12, %c1_13, %c0_14] {strides = array<i32: 1, 2, 1>} : memref<4x8x16xf32, #tpu.memory_space<vmem>>, vector<4x4x16xf32>
    %16 = arith.maximumf %14, %15 : vector<4x4x16xf32>
    %17 = vector.shape_cast %16 : vector<4x4x16xf32> to vector<2x2x4x16xf32>
    %cst_15 = arith.constant dense<0xFF800000> : vector<2x4x16xf32>
    %18 = vector.multi_reduction <maximumf>, %17, %cst_15 [1] : vector<2x2x4x16xf32> to vector<2x4x16xf32>
    %19 = vector.shape_cast %18 : vector<2x4x16xf32> to vector<1x2x4x16xf32>
    %20 = arith.truncf %19 : vector<1x2x4x16xf32> to vector<1x2x4x16xbf16>
    %c0_16 = arith.constant 0 : index
    %c0_17 = arith.constant 0 : index
    %c0_18 = arith.constant 0 : index
    %c0_19 = arith.constant 0 : index
    %21 = vector.load %arg5[%c0_16, %c0_17, %c0_18, %c0_19] : memref<1x2x4x16xbf16, #tpu.memory_space<vmem>>, vector<1x2x4x16xbf16>
    tpu.vector_store %arg5[%c0_16, %c0_17, %c0_18, %c0_19], %20 {strides = array<i32>} : memref<1x2x4x16xbf16, #tpu.memory_space<vmem>>, vector<1x2x4x16xbf16>,
    return
  }
  func.func @transform_0(%arg0: i32, %arg1: i32, %arg2: i32) -> (i32, i32, i32, i32) {
    %c0_i32 = arith.constant 0 : i32
    %c0_i32_0 = arith.constant 0 : i32
    return %arg0, %arg1, %c0_i32, %arg2 : i32, i32, i32, i32
  }
  func.func @transform_1(%arg0: i32, %arg1: i32, %arg2: i32) -> (i32, i32) {
    %c0_i32 = arith.constant 0 : i32
    %c0_i32_0 = arith.constant 0 : i32
    return %c0_i32, %arg2 : i32, i32
  }
  func.func @transform_2(%arg0: i32, %arg1: i32, %arg2: i32) -> (i32, i32, i32, i32) {
    %c0_i32 = arith.constant 0 : i32
    %c0_i32_0 = arith.constant 0 : i32
    return %arg0, %arg1, %c0_i32, %arg2 : i32, i32, i32, i32
  }
}

module attributes {stable_mosaic.version = 11 : i64} {
  func.func @linear_kernel(%arg0: i32, %arg1: i32, %arg2: memref<2x256xbf16, #tpu.memory_space<vmem>>, %arg3: memref<256x512xbf16, #tpu.memory_space<vmem>>, %arg4: memref<1x512xf32, #tpu.memory_space<vmem>>, %arg5: memref<2x512xf32, #tpu.memory_space<vmem>>) attributes {dimension_semantics = [#tpu.dimension_semantics<parallel>, #tpu.dimension_semantics<arbitrary>], iteration_bounds = array<i64: 1, 1>, scalar_prefetch = 0 : i64, scratch_operands = 0 : i64, tpu.core_type = #tpu.core_type<tc>, window_params = [{transform_indices = @transform_0, window_bounds = array<i64: 2, 256>}, {transform_indices = @transform_1, window_bounds = array<i64: 256, 512>}, {transform_indices = @transform_2, window_bounds = array<i64: 1, 512>}, {transform_indices = @transform_3, window_bounds = array<i64: 2, 512>}]} {
    %c0_i32 = arith.constant 0 : i32
    %0 = arith.cmpi eq, %arg1, %c0_i32 : i32
    %1 = arith.extui %0 : i1 to i32
    %c0_i32_0 = arith.constant 0 : i32
    %2 = arith.cmpi ne, %1, %c0_i32_0 : i32
    scf.if %2 {
      %cst_10 = arith.constant 0.000000e+00 : f32
      %12 = vector.broadcast %cst_10 : f32 to vector<2x512xf32>
      %c0_11 = arith.constant 0 : index
      %c0_12 = arith.constant 0 : index
      %13 = vector.load %arg5[%c0_11, %c0_12] : memref<2x512xf32, #tpu.memory_space<vmem>>, vector<2x512xf32>
      tpu.vector_store %arg5[%c0_11, %c0_12], %12 {strides = array<i32>} : memref<2x512xf32, #tpu.memory_space<vmem>>, vector<2x512xf32>,
    } else {
    }
    %c0 = arith.constant 0 : index
    %c0_1 = arith.constant 0 : index
    %3 = vector.load %arg5[%c0, %c0_1] : memref<2x512xf32, #tpu.memory_space<vmem>>, vector<2x512xf32>
    %c0_2 = arith.constant 0 : index
    %c0_3 = arith.constant 0 : index
    %4 = vector.load %arg2[%c0_2, %c0_3] : memref<2x256xbf16, #tpu.memory_space<vmem>>, vector<2x256xbf16>
    %c0_4 = arith.constant 0 : index
    %c0_5 = arith.constant 0 : index
    %5 = vector.load %arg3[%c0_4, %c0_5] : memref<256x512xbf16, #tpu.memory_space<vmem>>, vector<256x512xbf16>
    %cst = arith.constant dense<0.000000e+00> : vector<2x512xf32>
    %6 = tpu.matmul %4, %5, %cst {dimension_numbers = #tpu.dot_dimension_numbers<[1], [0], [0], [1], [0, 0, 1, 1], [], []>} : vector<2x256xbf16>, vector<256x512xbf16>, vector<2x512xf32> -> vector<2x512xf32>
    %7 = arith.addf %3, %6 : vector<2x512xf32>
    %c0_6 = arith.constant 0 : index
    %c0_7 = arith.constant 0 : index
    %8 = vector.load %arg5[%c0_6, %c0_7] : memref<2x512xf32, #tpu.memory_space<vmem>>, vector<2x512xf32>
    tpu.vector_store %arg5[%c0_6, %c0_7], %7 {strides = array<i32>} : memref<2x512xf32, #tpu.memory_space<vmem>>, vector<2x512xf32>,
    %c0_i32_8 = arith.constant 0 : i32
    %9 = arith.cmpi eq, %arg1, %c0_i32_8 : i32
    %10 = arith.extui %9 : i1 to i32
    %c0_i32_9 = arith.constant 0 : i32
    %11 = arith.cmpi ne, %10, %c0_i32_9 : i32
    scf.if %11 {
      %c0_10 = arith.constant 0 : index
      %c0_11 = arith.constant 0 : index
      %12 = vector.load %arg5[%c0_10, %c0_11] : memref<2x512xf32, #tpu.memory_space<vmem>>, vector<2x512xf32>
      %c0_12 = arith.constant 0 : index
      %c0_13 = arith.constant 0 : index
      %13 = vector.load %arg4[%c0_12, %c0_13] : memref<1x512xf32, #tpu.memory_space<vmem>>, vector<1x512xf32>
      %14 = vector.broadcast %13 : vector<1x512xf32> to vector<2x512xf32>
      %15 = arith.addf %12, %14 : vector<2x512xf32>
      %cst_14 = arith.constant 0.000000e+00 : f32
      %16 = vector.broadcast %cst_14 : f32 to vector<2x512xf32>
      %17 = arith.maximumf %15, %16 : vector<2x512xf32>
      %c0_15 = arith.constant 0 : index
      %c0_16 = arith.constant 0 : index
      %18 = vector.load %arg5[%c0_15, %c0_16] : memref<2x512xf32, #tpu.memory_space<vmem>>, vector<2x512xf32>
      tpu.vector_store %arg5[%c0_15, %c0_16], %17 {strides = array<i32>} : memref<2x512xf32, #tpu.memory_space<vmem>>, vector<2x512xf32>,
    } else {
    }
    return
  }
  func.func @transform_0(%arg0: i32, %arg1: i32) -> (i32, i32) {
    %c0_i32 = arith.constant 0 : i32
    %c0_i32_0 = arith.constant 0 : i32
    return %c0_i32, %arg1 : i32, i32
  }
  func.func @transform_1(%arg0: i32, %arg1: i32) -> (i32, i32) {
    %c0_i32 = arith.constant 0 : i32
    return %arg1, %arg0 : i32, i32
  }
  func.func @transform_2(%arg0: i32, %arg1: i32) -> (i32, i32) {
    %c0_i32 = arith.constant 0 : i32
    %c0_i32_0 = arith.constant 0 : i32
    return %c0_i32, %arg0 : i32, i32
  }
  func.func @transform_3(%arg0: i32, %arg1: i32) -> (i32, i32) {
    %c0_i32 = arith.constant 0 : i32
    %c0_i32_0 = arith.constant 0 : i32
    return %c0_i32, %arg0 : i32, i32
  }
}

module attributes {stable_mosaic.version = 11 : i64} {
  func.func @linear_kernel(%arg0: i32, %arg1: i32, %arg2: memref<2x512xf32, #tpu.memory_space<vmem>>, %arg3: memref<512x512xbf16, #tpu.memory_space<vmem>>, %arg4: memref<1x512xf32, #tpu.memory_space<vmem>>, %arg5: memref<2x512xf32, #tpu.memory_space<vmem>>) attributes {dimension_semantics = [#tpu.dimension_semantics<parallel>, #tpu.dimension_semantics<arbitrary>], iteration_bounds = array<i64: 1, 1>, scalar_prefetch = 0 : i64, scratch_operands = 0 : i64, tpu.core_type = #tpu.core_type<tc>, window_params = [{transform_indices = @transform_0, window_bounds = array<i64: 2, 512>}, {transform_indices = @transform_1, window_bounds = array<i64: 512, 512>}, {transform_indices = @transform_2, window_bounds = array<i64: 1, 512>}, {transform_indices = @transform_3, window_bounds = array<i64: 2, 512>}]} {
    %c0_i32 = arith.constant 0 : i32
    %0 = arith.cmpi eq, %arg1, %c0_i32 : i32
    %1 = arith.extui %0 : i1 to i32
    %c0_i32_0 = arith.constant 0 : i32
    %2 = arith.cmpi ne, %1, %c0_i32_0 : i32
    scf.if %2 {
      %cst_10 = arith.constant 0.000000e+00 : f32
      %13 = vector.broadcast %cst_10 : f32 to vector<2x512xf32>
      %c0_11 = arith.constant 0 : index
      %c0_12 = arith.constant 0 : index
      %14 = vector.load %arg5[%c0_11, %c0_12] : memref<2x512xf32, #tpu.memory_space<vmem>>, vector<2x512xf32>
      tpu.vector_store %arg5[%c0_11, %c0_12], %13 {strides = array<i32>} : memref<2x512xf32, #tpu.memory_space<vmem>>, vector<2x512xf32>,
    } else {
    }
    %c0 = arith.constant 0 : index
    %c0_1 = arith.constant 0 : index
    %3 = vector.load %arg5[%c0, %c0_1] : memref<2x512xf32, #tpu.memory_space<vmem>>, vector<2x512xf32>
    %c0_2 = arith.constant 0 : index
    %c0_3 = arith.constant 0 : index
    %4 = vector.load %arg2[%c0_2, %c0_3] : memref<2x512xf32, #tpu.memory_space<vmem>>, vector<2x512xf32>
    %5 = arith.truncf %4 : vector<2x512xf32> to vector<2x512xbf16>
    %c0_4 = arith.constant 0 : index
    %c0_5 = arith.constant 0 : index
    %6 = vector.load %arg3[%c0_4, %c0_5] : memref<512x512xbf16, #tpu.memory_space<vmem>>, vector<512x512xbf16>
    %cst = arith.constant dense<0.000000e+00> : vector<2x512xf32>
    %7 = tpu.matmul %5, %6, %cst {dimension_numbers = #tpu.dot_dimension_numbers<[1], [0], [0], [1], [0, 0, 1, 1], [], []>} : vector<2x512xbf16>, vector<512x512xbf16>, vector<2x512xf32> -> vector<2x512xf32>
    %8 = arith.addf %3, %7 : vector<2x512xf32>
    %c0_6 = arith.constant 0 : index
    %c0_7 = arith.constant 0 : index
    %9 = vector.load %arg5[%c0_6, %c0_7] : memref<2x512xf32, #tpu.memory_space<vmem>>, vector<2x512xf32>
    tpu.vector_store %arg5[%c0_6, %c0_7], %8 {strides = array<i32>} : memref<2x512xf32, #tpu.memory_space<vmem>>, vector<2x512xf32>,
    %c0_i32_8 = arith.constant 0 : i32
    %10 = arith.cmpi eq, %arg1, %c0_i32_8 : i32
    %11 = arith.extui %10 : i1 to i32
    %c0_i32_9 = arith.constant 0 : i32
    %12 = arith.cmpi ne, %11, %c0_i32_9 : i32
    scf.if %12 {
      %c0_10 = arith.constant 0 : index
      %c0_11 = arith.constant 0 : index
      %13 = vector.load %arg5[%c0_10, %c0_11] : memref<2x512xf32, #tpu.memory_space<vmem>>, vector<2x512xf32>
      %c0_12 = arith.constant 0 : index
      %c0_13 = arith.constant 0 : index
      %14 = vector.load %arg4[%c0_12, %c0_13] : memref<1x512xf32, #tpu.memory_space<vmem>>, vector<1x512xf32>
      %15 = vector.broadcast %14 : vector<1x512xf32> to vector<2x512xf32>
      %16 = arith.addf %13, %15 : vector<2x512xf32>
      %cst_14 = arith.constant 0.000000e+00 : f32
      %17 = vector.broadcast %cst_14 : f32 to vector<2x512xf32>
      %18 = arith.maximumf %16, %17 : vector<2x512xf32>
      %c0_15 = arith.constant 0 : index
      %c0_16 = arith.constant 0 : index
      %19 = vector.load %arg5[%c0_15, %c0_16] : memref<2x512xf32, #tpu.memory_space<vmem>>, vector<2x512xf32>
      tpu.vector_store %arg5[%c0_15, %c0_16], %18 {strides = array<i32>} : memref<2x512xf32, #tpu.memory_space<vmem>>, vector<2x512xf32>,
    } else {
    }
    return
  }
  func.func @transform_0(%arg0: i32, %arg1: i32) -> (i32, i32) {
    %c0_i32 = arith.constant 0 : i32
    %c0_i32_0 = arith.constant 0 : i32
    return %c0_i32, %arg1 : i32, i32
  }
  func.func @transform_1(%arg0: i32, %arg1: i32) -> (i32, i32) {
    %c0_i32 = arith.constant 0 : i32
    return %arg1, %arg0 : i32, i32
  }
  func.func @transform_2(%arg0: i32, %arg1: i32) -> (i32, i32) {
    %c0_i32 = arith.constant 0 : i32
    %c0_i32_0 = arith.constant 0 : i32
    return %c0_i32, %arg0 : i32, i32
  }
  func.func @transform_3(%arg0: i32, %arg1: i32) -> (i32, i32) {
    %c0_i32 = arith.constant 0 : i32
    %c0_i32_0 = arith.constant 0 : i32
    return %c0_i32, %arg0 : i32, i32
  }
}

module attributes {stable_mosaic.version = 11 : i64} {
  func.func @linear_kernel(%arg0: i32, %arg1: i32, %arg2: memref<2x512xf32, #tpu.memory_space<vmem>>, %arg3: memref<512x10xbf16, #tpu.memory_space<vmem>>, %arg4: memref<1x10xf32, #tpu.memory_space<vmem>>, %arg5: memref<2x10xf32, #tpu.memory_space<vmem>>) attributes {dimension_semantics = [#tpu.dimension_semantics<parallel>, #tpu.dimension_semantics<arbitrary>], iteration_bounds = array<i64: 1, 1>, scalar_prefetch = 0 : i64, scratch_operands = 0 : i64, tpu.core_type = #tpu.core_type<tc>, window_params = [{transform_indices = @transform_0, window_bounds = array<i64: 2, 512>}, {transform_indices = @transform_1, window_bounds = array<i64: 512, 10>}, {transform_indices = @transform_2, window_bounds = array<i64: 1, 10>}, {transform_indices = @transform_3, window_bounds = array<i64: 2, 10>}]} {
    %c0_i32 = arith.constant 0 : i32
    %0 = arith.cmpi eq, %arg1, %c0_i32 : i32
    %1 = arith.extui %0 : i1 to i32
    %c0_i32_0 = arith.constant 0 : i32
    %2 = arith.cmpi ne, %1, %c0_i32_0 : i32
    scf.if %2 {
      %cst_10 = arith.constant 0.000000e+00 : f32
      %13 = vector.broadcast %cst_10 : f32 to vector<2x10xf32>
      %c0_11 = arith.constant 0 : index
      %c0_12 = arith.constant 0 : index
      %14 = vector.load %arg5[%c0_11, %c0_12] : memref<2x10xf32, #tpu.memory_space<vmem>>, vector<2x10xf32>
      tpu.vector_store %arg5[%c0_11, %c0_12], %13 {strides = array<i32>} : memref<2x10xf32, #tpu.memory_space<vmem>>, vector<2x10xf32>,
    } else {
    }
    %c0 = arith.constant 0 : index
    %c0_1 = arith.constant 0 : index
    %3 = vector.load %arg5[%c0, %c0_1] : memref<2x10xf32, #tpu.memory_space<vmem>>, vector<2x10xf32>
    %c0_2 = arith.constant 0 : index
    %c0_3 = arith.constant 0 : index
    %4 = vector.load %arg2[%c0_2, %c0_3] : memref<2x512xf32, #tpu.memory_space<vmem>>, vector<2x512xf32>
    %5 = arith.truncf %4 : vector<2x512xf32> to vector<2x512xbf16>
    %c0_4 = arith.constant 0 : index
    %c0_5 = arith.constant 0 : index
    %6 = vector.load %arg3[%c0_4, %c0_5] : memref<512x10xbf16, #tpu.memory_space<vmem>>, vector<512x10xbf16>
    %cst = arith.constant dense<0.000000e+00> : vector<2x10xf32>
    %7 = tpu.matmul %5, %6, %cst {dimension_numbers = #tpu.dot_dimension_numbers<[1], [0], [0], [1], [0, 0, 1, 1], [], []>} : vector<2x512xbf16>, vector<512x10xbf16>, vector<2x10xf32> -> vector<2x10xf32>
    %8 = arith.addf %3, %7 : vector<2x10xf32>
    %c0_6 = arith.constant 0 : index
    %c0_7 = arith.constant 0 : index
    %9 = vector.load %arg5[%c0_6, %c0_7] : memref<2x10xf32, #tpu.memory_space<vmem>>, vector<2x10xf32>
    tpu.vector_store %arg5[%c0_6, %c0_7], %8 {strides = array<i32>} : memref<2x10xf32, #tpu.memory_space<vmem>>, vector<2x10xf32>,
    %c0_i32_8 = arith.constant 0 : i32
    %10 = arith.cmpi eq, %arg1, %c0_i32_8 : i32
    %11 = arith.extui %10 : i1 to i32
    %c0_i32_9 = arith.constant 0 : i32
    %12 = arith.cmpi ne, %11, %c0_i32_9 : i32
    scf.if %12 {
      %c0_10 = arith.constant 0 : index
      %c0_11 = arith.constant 0 : index
      %13 = vector.load %arg5[%c0_10, %c0_11] : memref<2x10xf32, #tpu.memory_space<vmem>>, vector<2x10xf32>
      %c0_12 = arith.constant 0 : index
      %c0_13 = arith.constant 0 : index
      %14 = vector.load %arg4[%c0_12, %c0_13] : memref<1x10xf32, #tpu.memory_space<vmem>>, vector<1x10xf32>
      %15 = vector.broadcast %14 : vector<1x10xf32> to vector<2x10xf32>
      %16 = arith.addf %13, %15 : vector<2x10xf32>
      %c0_14 = arith.constant 0 : index
      %c0_15 = arith.constant 0 : index
      %17 = vector.load %arg5[%c0_14, %c0_15] : memref<2x10xf32, #tpu.memory_space<vmem>>, vector<2x10xf32>
      tpu.vector_store %arg5[%c0_14, %c0_15], %16 {strides = array<i32>} : memref<2x10xf32, #tpu.memory_space<vmem>>, vector<2x10xf32>,
    } else {
    }
    return
  }
  func.func @transform_0(%arg0: i32, %arg1: i32) -> (i32, i32) {
    %c0_i32 = arith.constant 0 : i32
    %c0_i32_0 = arith.constant 0 : i32
    return %c0_i32, %arg1 : i32, i32
  }
  func.func @transform_1(%arg0: i32, %arg1: i32) -> (i32, i32) {
    %c0_i32 = arith.constant 0 : i32
    return %arg1, %arg0 : i32, i32
  }
  func.func @transform_2(%arg0: i32, %arg1: i32) -> (i32, i32) {
    %c0_i32 = arith.constant 0 : i32
    %c0_i32_0 = arith.constant 0 : i32
    return %c0_i32, %arg0 : i32, i32
  }
  func.func @transform_3(%arg0: i32, %arg1: i32) -> (i32, i32) {
    %c0_i32 = arith.constant 0 : i32
    %c0_i32_0 = arith.constant 0 : i32
    return %c0_i32, %arg0 : i32, i32
  }
}

</mosaic_0001>

<bundles_post_ra>
// kernel: vgg_forward.10
= control target key start
LH: loop header
LB: loop body
LE: loop exit
PB: predicated region body
PF: predicated region fallthrough
CT: control target
= control target key end

     0   :  { %vm18_vm0 = vcmask 58368   ;;  %vm55_vm4 = vcmask 57344   ;;  %s108_s0 = inlined_call_operand.vmem [shape: f32[2,2,2,8], index: 0, kind: input, shape index: {}]   ;;  %s109_s1 = inlined_call_operand.vmem [shape: f32[1,8], index: 1, kind: input, shape index: {}]   ;;  %s110_s2 = inlined_call_operand.vmem [shape: f32[1,8], index: 2, kind: input, shape index: {}]   ;;  %s111_s3 = inlined_call_operand.vmem [shape: f32[2,8], index: 3, kind: output, shape index: {}]  }
   0x1   :  { %v14_v0 = vld [vmem:[%s108_s0] sm:$0x3]  ;;  %v15_v1 = vld [vmem:[%s108_s0 + $0x2] sm:$0x3]  ;;  %v16_v2 = vld [vmem:[%s108_s0 + $0x4] sm:$0x3] }
   0x2   :  { %v17_v3 = vld [vmem:[%s108_s0 + $0x6] sm:$0x3]  ;;  %v19_v4 = vsel %vm18_vm0, %v14_v0, 0.0  ;;  %v20_v5 = vsel %vm18_vm0, %v16_v2, 0.0  ;;  %v22_v6 = vsel %vm18_vm0, %v15_v1, 0.0 }
   0x3   :  { %v21_v7 = vadd.f32 %v20_v5, %v19_v4  ;;  %v23_v8 = vsel %vm18_vm0, %v17_v3, 0.0  ;;  %v34_v25 = vld [vmem:[%s109_s1] sm:$0x1] }
   0x4   :  { %v24_v9 = vadd.f32 %v23_v8, %v22_v6  ;;  %v52_v28 = vld [vmem:[%s110_s2] sm:$0x1] }
   0x5   :  { %v25_v10 = vsel %vm18_vm0, %v21_v7, 0.0 }
   0x6   :  { %v26_v11 = vsel %vm18_vm0, %v24_v9, 0.0 }
   0x7   :  { %v27_v12 = vadd.f32 %v26_v11, %v25_v10 }
   0x9   :  { %v28_v13 = vmul.f32 0.001953125, %v27_v12 }
   0xb   :  { %v29_v14 = vmul.f32 %v28_v13, %v28_v13 }
   0xd   :  { %v31_v15 = vrot.slane %v29_v14, 7 }
   0xf   :  { %v33_v16 = vsub.f32 %v28_v13, %v31_v15 }
  0x11   :  { %v35_v17 = vadd.f32 1e-05, %v33_v16 }
  0x13   :  { %62 = vrsqrt.f32 %v35_v17  ;;  %vm42_vm1 = vweird.f32 %v35_v17 }
  0x19   :  { %v63_v18 = vpop.eup %62 }
  0x1a   :  { %v37_v19 = vmul.f32 %v63_v18, %v35_v17  ;;  %vm43_vm2 = vweird.f32 %v63_v18 }
  0x1b   :  { %vm44_vm3 = vmor %vm42_vm1, %vm43_vm2 }
  0x1c   :  { %v38_v20 = vmul.f32 %v63_v18, %v37_v19 }
  0x1e   :  { %v39_v21 = vmul.f32 0.5, %v38_v20 }
  0x20   :  { %v40_v22 = vsub.f32 1.5, %v39_v21 }
  0x22   :  { %v41_v23 = vmul.f32 %v63_v18, %v40_v22 }
  0x24   :  { %v45_v24 = vsel %vm44_vm3, %v63_v18, %v41_v23 }
  0x25   :  { %47 = vst [vmem:[#allocation1] sm:$0xff] %v45_v24 }
  0x2c   :  { %v49_v26 = vld [vmem:[#allocation1 + $0x1] ss:$9 sm:$0xff] }
  0x2d   :  { %v51_v27 = vmul.f32 %v49_v26, %v34_v25 }
  0x2f   :  { %56 = vst.msk [vmem:[%s111_s3] sm:$0x1] %vm55_vm4, %v51_v27  ;;  %v53_v29 = vmul.f32 %v51_v27, %v28_v13 }
  0x31   :  { %v54_v30 = vsub.f32 %v52_v28, %v53_v29 }
  0x33   :  { %57 = vst.msk [vmem:[%s111_s3 + $0x1] sm:$0x1] %vm55_vm4, %v54_v30 }

// kernel: vgg_forward.11
= control target key start
LH: loop header
LB: loop body
LE: loop exit
PB: predicated region body
PF: predicated region fallthrough
CT: control target
= control target key end

     0   :  { %s665_s9 = smov 0   ;;  %s667_s10 = smov 0   ;;  %s820_s0 = inlined_call_operand.vmem [shape: bf16[2,16,16,8], index: 0, kind: input, shape index: {}]   ;;  %s821_s1 = inlined_call_operand.vmem [shape: f32[2,8], index: 1, kind: input, shape index: {}]   ;;  %s822_s2 = inlined_call_operand.vmem [shape: bf16[2,8,8,8], index: 2, kind: output, shape index: {}]  }
   0x1   :  { %s669_s11 = smov 0   ;;  %s671_s12 = smov 0  }
   0x2   :  { %s673_s13 = smov 0  }
   0x3 LB: > { %s27_s14 = sadd.s32 1, %s640_s11  ;;  %s31_s15 = sadd.s32 1, %s644_s12  ;;  %s648_s13 = sphi %s673_s13, %s12_s13   ;;  %s644_s12 = sphi %s671_s12, %s827_s12   ;;  %s640_s11 = sphi %s669_s11, %s826_s11   ;;  %s636_s10 = sphi %s667_s10, %s825_s10   ;;  %s632_s9 = sphi %s665_s9, %s824_s9  }
   0x4   : > { %p29_p0 = scmp.ge.s32.totalorder %s27_s14, 2  ;;  %p519_p1 = scmp.ge.s32.totalorder %s648_s13, 1 }
   0x5   : > { %p157_p2 = scmp.lt.s32.totalorder %s648_s13, 5 }
   0x6   : > { %s829_s14 = smov (%p29_p0, %s27_s14), 0  ;;  %s831_s15 = smov (!%p29_p0, %s31_s15), %s644_s12 }
   0x7   : > { %p158_p3 = pnand %p519_p1, %p157_p2  ;;  %p33_p4 = scmp.ge.s32.totalorder %s831_s15, 2 }
   0x8   : > { %s520_s16 = sshll.u32 (!%p158_p3), %s632_s9, 3  ;;  %p199_p5 = scmp.lt.s32.totalorder (!%p158_p3), %s636_s10, 1 }
   0x9   : > { %s833_s15 = smov (%p33_p4, %s831_s15), 0  ;;  %161 = sbr.rel (%p158_p3) target bundleno = 59 (0x3b), region = 28 }
   0xa   : > { %p201_p6 = scmp.lt.s32.totalorder (!%p158_p3), %s520_s16, 15  ;;  %s524_s28 = sshll.u32 (!%p158_p3), %s632_s9, 2 }
   0xb   : > { %p745_p7 = scmp.lt.s32.totalorder (!%p158_p3), %s524_s28, 7 }
   0xe   : > { %s835_s10 = smov (!%p199_p5, %s636_s10), 1  ;;  %s837_s16 = smov (!%p201_p6, %s520_s16), 15  ;;  %v709_v0 = vld [vmem:[%s821_s1] ss:$0 sm:$0xff]  ;;  %vm313_vm0 = vcmask 64512   ;;  %vm385_vm1 = vcmask 60416  }
   0xf   : > { %s522_s17 = sshll.u32 %s835_s10, 5  ;;  %s521_s18 = sshll.u32 %s837_s16, 1  ;;  %v717_v5 = vld [vmem:[%s821_s1 + $0x1] ss:$0 sm:$0xff] }
  0x10   : > { %s208_s19 = sadd.s32 %s522_s17, %s521_s18  ;;  %s839_s28 = smov (!%p745_p7, %s524_s28), 7 }
  0x11   : > { %s523_s20 = sshll.u32 %s208_s19, 2  ;;  %s525_s30 = sshll.u32 %s835_s10, 3 }
  0x12   : > { %s704_s23 = scalar_lea.vmem %s820_s0, %s523_s20  ;;  %s225_s3 = sadd.s32 %s525_s30, %s839_s28 }
  0x13   : > { %v530_v1 = vld [vmem:[%s704_s23] sm:$0xff]   ;;  %v561_v2 = vld [vmem:[%s704_s23 + $0x8] sm:$0xff]   ;;  %v562_v3 = vld [vmem:[%s704_s23 + $0x10] sm:$0xff]   ;;  %s526_s4 = sshll.u32 %s225_s3, 2 }
  0x14   : > { %v531_v4 = vunpack.c.l.bf16 %v530_v1  ;;  %v532_v6 = vunpack.c.h.bf16 %v530_v1  ;;  %v535_v7 = vunpack.c.l.bf16 %v561_v2  ;;  %v536_v8 = vunpack.c.h.bf16 %v561_v2  ;;  %v563_v9 = vld [vmem:[%s704_s23 + $0x18] sm:$0xff]   ;;  %v564_v30 = vld [vmem:[%s704_s23 + $0x20] sm:$0xff]   ;;  %v565_v31 = vld [vmem:[%s704_s23 + $0x28] sm:$0xff]   ;;  %s789_s7 = scalar_lea.vmem %s822_s2, %s526_s4 }
  0x15   : > { %v539_v10 = vunpack.c.l.bf16 %v562_v3  ;;  %v540_v11 = vunpack.c.h.bf16 %v562_v3  ;;  %v543_v12 = vunpack.c.l.bf16 %v563_v9  ;;  %v544_v13 = vunpack.c.h.bf16 %v563_v9  ;;  %v566_v36 = vld [vmem:[%s704_s23 + $0x30] sm:$0xff]   ;;  %v567_v37 = vld [vmem:[%s704_s23 + $0x38] sm:$0xff]  }
  0x16   : > { %v264_v14 = vmul.f32 %v709_v0, %v531_v4  ;;  %v265_v15 = vmul.f32 %v709_v0, %v532_v6  ;;  %v266_v16 = vmul.f32 %v709_v0, %v535_v7  ;;  %v267_v17 = vmul.f32 %v709_v0, %v536_v8 }
  0x17   : > { %v268_v18 = vmul.f32 %v709_v0, %v539_v10  ;;  %v269_v19 = vmul.f32 %v709_v0, %v540_v11  ;;  %v270_v20 = vmul.f32 %v709_v0, %v543_v12  ;;  %v271_v21 = vmul.f32 %v709_v0, %v544_v13 }
  0x18   : > { %v281_v22 = vadd.f32 %v717_v5, %v264_v14  ;;  %v282_v23 = vadd.f32 %v717_v5, %v265_v15  ;;  %v283_v24 = vadd.f32 %v717_v5, %v266_v16  ;;  %v284_v25 = vadd.f32 %v717_v5, %v267_v17 }
  0x19   : > { %v285_v26 = vadd.f32 %v717_v5, %v268_v18  ;;  %v286_v27 = vadd.f32 %v717_v5, %v269_v19  ;;  %v287_v28 = vadd.f32 %v717_v5, %v270_v20  ;;  %v288_v29 = vadd.f32 %v717_v5, %v271_v21 }
  0x1a   : > { %v297_v32 = vmax.f32 %v281_v22, 0.0  ;;  %v298_v33 = vmax.f32 %v282_v23, 0.0  ;;  %v299_v34 = vmax.f32 %v283_v24, 0.0  ;;  %v300_v35 = vmax.f32 %v284_v25, 0.0 }
  0x1b   : > { %v301_v38 = vmax.f32 %v285_v26, 0.0  ;;  %v302_v39 = vmax.f32 %v286_v27, 0.0  ;;  %v303_v40 = vmax.f32 %v287_v28, 0.0  ;;  %v304_v41 = vmax.f32 %v288_v29, 0.0 }
  0x1c   : > { %314 = vst.msk [vmem:[#allocation2] sm:$0xff] %vm313_vm0, %v297_v32  ;;  %v547_v42 = vunpack.c.l.bf16 %v564_v30  ;;  %v548_v43 = vunpack.c.h.bf16 %v564_v30  ;;  %v551_v44 = vunpack.c.l.bf16 %v565_v31  ;;  %v552_v45 = vunpack.c.h.bf16 %v565_v31 }
  0x1d   : > { %315 = vst.msk [vmem:[#allocation2 + $0x8] sm:$0xff] %vm313_vm0, %v298_v33  ;;  %v555_v46 = vunpack.c.l.bf16 %v566_v36  ;;  %v556_v47 = vunpack.c.h.bf16 %v566_v36  ;;  %v559_v48 = vunpack.c.l.bf16 %v567_v37  ;;  %v560_v49 = vunpack.c.h.bf16 %v567_v37 }
  0x1e   : > { %316 = vst.msk [vmem:[#allocation2 + $0x10] sm:$0xff] %vm313_vm0, %v299_v34  ;;  %v272_v50 = vmul.f32 %v709_v0, %v547_v42  ;;  %v273_v51 = vmul.f32 %v709_v0, %v548_v43  ;;  %v274_v52 = vmul.f32 %v709_v0, %v551_v44  ;;  %v275_v53 = vmul.f32 %v709_v0, %v552_v45 }
  0x1f   : > { %317 = vst.msk [vmem:[#allocation2 + $0x18] sm:$0xff] %vm313_vm0, %v300_v35  ;;  %v276_v54 = vmul.f32 %v709_v0, %v555_v46  ;;  %v277_v55 = vmul.f32 %v709_v0, %v556_v47  ;;  %v278_v56 = vmul.f32 %v709_v0, %v559_v48  ;;  %v279_v57 = vmul.f32 %v709_v0, %v560_v49 }
  0x20   : > { %318 = vst.msk [vmem:[#allocation2 + $0x20] sm:$0xff] %vm313_vm0, %v301_v38  ;;  %v289_v58 = vadd.f32 %v717_v5, %v272_v50  ;;  %v290_v59 = vadd.f32 %v717_v5, %v273_v51  ;;  %v291_v60 = vadd.f32 %v717_v5, %v274_v52  ;;  %v292_v61 = vadd.f32 %v717_v5, %v275_v53 }
  0x21   : > { %319 = vst.msk [vmem:[#allocation2 + $0x28] sm:$0xff] %vm313_vm0, %v302_v39  ;;  %v293_v62 = vadd.f32 %v717_v5, %v276_v54  ;;  %v294_v63 = vadd.f32 %v717_v5, %v277_v55  ;;  %v295_v3 = vadd.f32 %v717_v5, %v278_v56  ;;  %v296_v6 = vadd.f32 %v717_v5, %v279_v57 }
  0x22   : > { %320 = vst.msk [vmem:[#allocation2 + $0x30] sm:$0xff] %vm313_vm0, %v303_v40  ;;  %v305_v0 = vmax.f32 %v289_v58, 0.0  ;;  %v306_v1 = vmax.f32 %v290_v59, 0.0  ;;  %v307_v2 = vmax.f32 %v291_v60, 0.0  ;;  %v308_v4 = vmax.f32 %v292_v61, 0.0 }
  0x23   : > { %321 = vst.msk [vmem:[#allocation2 + $0x38] sm:$0xff] %vm313_vm0, %v304_v41  ;;  %v309_v7 = vmax.f32 %v293_v62, 0.0  ;;  %v310_v10 = vmax.f32 %v294_v63, 0.0  ;;  %v311_v12 = vmax.f32 %v295_v3, 0.0  ;;  %v312_v15 = vmax.f32 %v296_v6, 0.0 }
  0x24   : > { %322 = vst.msk [vmem:[#allocation2 + $0x40] sm:$0xff] %vm313_vm0, %v305_v0  ;;  %v330_v8 = vld [vmem:[#allocation2] ss:$2 sm:$0xff]  ;;  %v346_v9 = vld [vmem:[#allocation2 + $0x1] ss:$2 sm:$0xff] }
  0x25   : > { %323 = vst.msk [vmem:[#allocation2 + $0x48] sm:$0xff] %vm313_vm0, %v306_v1  ;;  %v361_v11 = vmax.f32 %v330_v8, %v346_v9 }
  0x26   : > { %324 = vst.msk [vmem:[#allocation2 + $0x50] sm:$0xff] %vm313_vm0, %v307_v2  ;;  %v332_v13 = vld [vmem:[#allocation2 + $0x10] ss:$2 sm:$0xff]  ;;  %v348_v14 = vld [vmem:[#allocation2 + $0x11] ss:$2 sm:$0xff] }
  0x27   : > { %325 = vst.msk [vmem:[#allocation2 + $0x58] sm:$0xff] %vm313_vm0, %v308_v4  ;;  %v362_v16 = vmax.f32 %v332_v13, %v348_v14  ;;  %v369_v5 = vsel %vm313_vm0, %v361_v11, -inf }
  0x28   : > { %326 = vst.msk [vmem:[#allocation2 + $0x60] sm:$0xff] %vm313_vm0, %v309_v7  ;;  %v334_v17 = vld [vmem:[#allocation2 + $0x20] ss:$2 sm:$0xff]  ;;  %v350_v18 = vld [vmem:[#allocation2 + $0x21] ss:$2 sm:$0xff] }
  0x29   : > { %327 = vst.msk [vmem:[#allocation2 + $0x68] sm:$0xff] %vm313_vm0, %v310_v10  ;;  %v370_v19 = vsel %vm313_vm0, %v362_v16, -inf  ;;  %v363_v20 = vmax.f32 %v334_v17, %v350_v18 }
  0x2a   : > { %328 = vst.msk [vmem:[#allocation2 + $0x70] sm:$0xff] %vm313_vm0, %v311_v12  ;;  %v371_v21 = vmax.f32 %v369_v5, %v370_v19  ;;  %v336_v22 = vld [vmem:[#allocation2 + $0x30] ss:$2 sm:$0xff]  ;;  %v352_v23 = vld [vmem:[#allocation2 + $0x31] ss:$2 sm:$0xff] }
  0x2b   : > { %329 = vst.msk [vmem:[#allocation2 + $0x78] sm:$0xff] %vm313_vm0, %v312_v15  ;;  %v364_v24 = vmax.f32 %v336_v22, %v352_v23  ;;  %v372_v25 = vsel %vm313_vm0, %v363_v20, -inf }
  0x2c   : > { %v381_v26 = vpack.c.bf16 %v371_v21, %v371_v21  ;;  %v338_v27 = vld [vmem:[#allocation2 + $0x40] ss:$2 sm:$0xff]  ;;  %v354_v28 = vld [vmem:[#allocation2 + $0x41] ss:$2 sm:$0xff] }
  0x2d   : > { %v373_v29 = vsel %vm313_vm0, %v364_v24, -inf  ;;  %v365_v30 = vmax.f32 %v338_v27, %v354_v28 }
  0x2e   : > { %386 = vst.msk [vmem:[%s789_s7] sm:$0xf] %vm385_vm1, %v381_v26  ;;  %v374_v31 = vmax.f32 %v372_v25, %v373_v29  ;;  %v340_v32 = vld [vmem:[#allocation2 + $0x50] ss:$2 sm:$0xff]  ;;  %v356_v33 = vld [vmem:[#allocation2 + $0x51] ss:$2 sm:$0xff] }
  0x2f   : > { %v366_v34 = vmax.f32 %v340_v32, %v356_v33  ;;  %v375_v35 = vsel %vm313_vm0, %v365_v30, -inf }
  0x30   : > { %v382_v36 = vpack.c.bf16 %v374_v31, %v374_v31  ;;  %v342_v37 = vld [vmem:[#allocation2 + $0x60] ss:$2 sm:$0xff]  ;;  %v358_v38 = vld [vmem:[#allocation2 + $0x61] ss:$2 sm:$0xff] }
  0x31   : > { %v376_v39 = vsel %vm313_vm0, %v366_v34, -inf  ;;  %v367_v40 = vmax.f32 %v342_v37, %v358_v38 }
  0x32   : > { %387 = vst.msk [vmem:[%s789_s7 + $0x4] sm:$0xf] %vm385_vm1, %v382_v36  ;;  %v377_v41 = vmax.f32 %v375_v35, %v376_v39  ;;  %v344_v42 = vld [vmem:[#allocation2 + $0x70] ss:$2 sm:$0xff]  ;;  %v360_v43 = vld [vmem:[#allocation2 + $0x71] ss:$2 sm:$0xff] }
  0x33   : > { %v368_v44 = vmax.f32 %v344_v42, %v360_v43  ;;  %v378_v45 = vsel %vm313_vm0, %v367_v40, -inf }
  0x34   : > { %v383_v46 = vpack.c.bf16 %v377_v41, %v377_v41 }
  0x35   : > { %v379_v47 = vsel %vm313_vm0, %v368_v44, -inf }
  0x36   : > { %388 = vst.msk [vmem:[%s789_s7 + $0x8] sm:$0xf] %vm385_vm1, %v383_v46  ;;  %v380_v48 = vmax.f32 %v378_v45, %v379_v47 }
  0x38   : > { %v384_v49 = vpack.c.bf16 %v380_v48, %v380_v48 }
  0x3a   : > { %389 = vst.msk [vmem:[%s789_s7 + $0xc] sm:$0xf] %vm385_vm1, %v384_v49 }
  0x3b PF: > { %s12_s13 = sadd.s32 1, %s648_s13   ;;  %s824_s9 = smov %s640_s11 }
  0x3c   : > { %p9_p8 = scmp.ge.s32.totalorder %s12_s13, 6   ;;  %s825_s10 = smov %s644_s12 }
  0x3d   : > { %s826_s11 = smov %s829_s14  ;;  %s827_s12 = smov %s833_s15 }
  0x3e   :  { %11 = sbr.rel (!%p9_p8) target bundleno = 3 (0x3), region = 76 }

// kernel: vgg_forward.13
= control target key start
LH: loop header
LB: loop body
LE: loop exit
PB: predicated region body
PF: predicated region fallthrough
CT: control target
= control target key end

     0   :  { %vm18_vm0 = vcmask 123904   ;;  %vm55_vm4 = vcmask 122880   ;;  %s108_s0 = inlined_call_operand.vmem [shape: f32[2,2,2,16], index: 0, kind: input, shape index: {}]   ;;  %s109_s1 = inlined_call_operand.vmem [shape: f32[1,16], index: 1, kind: input, shape index: {}]   ;;  %s110_s2 = inlined_call_operand.vmem [shape: f32[1,16], index: 2, kind: input, shape index: {}]   ;;  %s111_s3 = inlined_call_operand.vmem [shape: f32[2,16], index: 3, kind: output, shape index: {}]  }
   0x1   :  { %v14_v0 = vld [vmem:[%s108_s0] sm:$0x3]  ;;  %v15_v1 = vld [vmem:[%s108_s0 + $0x2] sm:$0x3]  ;;  %v16_v2 = vld [vmem:[%s108_s0 + $0x4] sm:$0x3] }
   0x2   :  { %v17_v3 = vld [vmem:[%s108_s0 + $0x6] sm:$0x3]  ;;  %v19_v4 = vsel %vm18_vm0, %v14_v0, 0.0  ;;  %v20_v5 = vsel %vm18_vm0, %v16_v2, 0.0  ;;  %v22_v6 = vsel %vm18_vm0, %v15_v1, 0.0 }
   0x3   :  { %v21_v7 = vadd.f32 %v20_v5, %v19_v4  ;;  %v23_v8 = vsel %vm18_vm0, %v17_v3, 0.0  ;;  %v34_v25 = vld [vmem:[%s109_s1] sm:$0x1] }
   0x4   :  { %v24_v9 = vadd.f32 %v23_v8, %v22_v6  ;;  %v52_v28 = vld [vmem:[%s110_s2] sm:$0x1] }
   0x5   :  { %v25_v10 = vsel %vm18_vm0, %v21_v7, 0.0 }
   0x6   :  { %v26_v11 = vsel %vm18_vm0, %v24_v9, 0.0 }
   0x7   :  { %v27_v12 = vadd.f32 %v26_v11, %v25_v10 }
   0x9   :  { %v28_v13 = vmul.f32 0.0078125, %v27_v12 }
   0xb   :  { %v29_v14 = vmul.f32 %v28_v13, %v28_v13 }
   0xd   :  { %v31_v15 = vrot.slane %v29_v14, 7 }
   0xf   :  { %v33_v16 = vsub.f32 %v28_v13, %v31_v15 }
  0x11   :  { %v35_v17 = vadd.f32 1e-05, %v33_v16 }
  0x13   :  { %62 = vrsqrt.f32 %v35_v17  ;;  %vm42_vm1 = vweird.f32 %v35_v17 }
  0x19   :  { %v63_v18 = vpop.eup %62 }
  0x1a   :  { %v37_v19 = vmul.f32 %v63_v18, %v35_v17  ;;  %vm43_vm2 = vweird.f32 %v63_v18 }
  0x1b   :  { %vm44_vm3 = vmor %vm42_vm1, %vm43_vm2 }
  0x1c   :  { %v38_v20 = vmul.f32 %v63_v18, %v37_v19 }
  0x1e   :  { %v39_v21 = vmul.f32 0.5, %v38_v20 }
  0x20   :  { %v40_v22 = vsub.f32 1.5, %v39_v21 }
  0x22   :  { %v41_v23 = vmul.f32 %v63_v18, %v40_v22 }
  0x24   :  { %v45_v24 = vsel %vm44_vm3, %v63_v18, %v41_v23 }
  0x25   :  { %47 = vst [vmem:[#allocation1] sm:$0xff] %v45_v24 }
  0x2c   :  { %v49_v26 = vld [vmem:[#allocation1 + $0x1] ss:$9 sm:$0xff] }
  0x2d   :  { %v51_v27 = vmul.f32 %v49_v26, %v34_v25 }
  0x2f   :  { %56 = vst.msk [vmem:[%s111_s3] sm:$0x1] %vm55_vm4, %v51_v27  ;;  %v53_v29 = vmul.f32 %v51_v27, %v28_v13 }
  0x31   :  { %v54_v30 = vsub.f32 %v52_v28, %v53_v29 }
  0x33   :  { %57 = vst.msk [vmem:[%s111_s3 + $0x1] sm:$0x1] %vm55_vm4, %v54_v30 }

// kernel: vgg_forward.12
= control target key start
LH: loop header
LB: loop body
LE: loop exit
PB: predicated region body
PF: predicated region fallthrough
CT: control target
= control target key end

     0   :  { %s1159_s15 = smov 0   ;;  %s1161_s16 = smov 0   ;;  %s1352_s0 = inlined_call_operand.vmem [shape: bf16[2,8,8,8], index: 0, kind: input, shape index: {}]   ;;  %s1353_s1 = inlined_call_operand.vmem [shape: bf16[128,16], index: 1, kind: input, shape index: {}]   ;;  %s1354_s2 = inlined_call_operand.vmem [shape: f32[1,16], index: 2, kind: input, shape index: {}]   ;;  %s1355_s3 = inlined_call_operand.vmem [shape: bf16[2,8,8,16], index: 3, kind: output, shape index: {0}]   ;;  %s1356_s4 = inlined_call_operand.vmem [shape: f32[2,2,2,16], index: 4, kind: output, shape index: {1}]  }
   0x1   :  { %s1163_s17 = smov 0   ;;  %s1165_s18 = smov 0  }
   0x2   :  { %s1167_s19 = smov 0  }
   0x3 LB: > { %s30_s20 = sadd.s32 1, %s1114_s17  ;;  %s34_s21 = sadd.s32 1, %s1118_s18  ;;  %s1122_s19 = sphi %s1167_s19, %s15_s19   ;;  %s1118_s18 = sphi %s1165_s18, %s1360_s18   ;;  %s1114_s17 = sphi %s1163_s17, %s1359_s17   ;;  %s1110_s16 = sphi %s1161_s16, %s1358_s16   ;;  %s1106_s15 = sphi %s1159_s15, %s1357_s15  }
   0x4   : > { %p32_p0 = scmp.ge.s32.totalorder %s30_s20, 2  ;;  %p944_p1 = scmp.ge.s32.totalorder %s1122_s19, 1 }
   0x5   : > { %p209_p2 = scmp.lt.s32.totalorder %s1122_s19, 5 }
   0x6   : > { %s1362_s20 = smov (%p32_p0, %s30_s20), 0  ;;  %s1364_s21 = smov (!%p32_p0, %s34_s21), %s1118_s18 }
   0x7   : > { %p210_p3 = pnand %p944_p1, %p209_p2  ;;  %p36_p4 = scmp.ge.s32.totalorder %s1364_s21, 2 }
   0x8   : > { %p260_p5 = scmp.lt.s32.totalorder (!%p210_p3), %s1110_s16, 1  ;;  %s1192_s22 = sshll.u32 (!%p210_p3), %s1106_s15, 2 }
   0x9   : > { %s1366_s21 = smov (%p36_p4, %s1364_s21), 0  ;;  %213 = sbr.rel (%p210_p3) target bundleno = 407 (0x197), region = 32 }
   0xa   : > { %p275_p6 = scmp.lt.s32.totalorder (!%p210_p3), %s1192_s22, 7  ;;  %p287_p7 = scmp.lt.s32.totalorder (!%p210_p3), %s1106_s15, 1 }
   0xb   : > { %s1004_s9 = sshll.u32 (!%p210_p3), %s1106_s15, 4  ;;  %p954_p8 = scmp.le.s32.totalorder (!%p210_p3), %s1106_s15, 0 }
   0xe   : > { %vm302_vm0 = vcmask 64512   ;;  %v1124_v0 = vmov 0.0   ;;  %s1368_s16 = smov (!%p260_p5, %s1110_s16), 1  ;;  %vm304_vm1 = vcmask 58368  }
   0xf   : > { %306 = vst.msk [vmem:[#allocation2 + $0x10] sm:$0xff] %vm302_vm0, %v1124_v0  ;;  %s276_s23 = scalar_select %p275_p6, %s1192_s22, 7 }
  0x10   : > { %303 = vst.msk [vmem:[#allocation2] sm:$0xff] %vm302_vm0, %v1124_v0  ;;  %s1003_s24 = sshll.u32 %s1368_s16, 5  ;;  %s948_s25 = sshll.u32 %s1368_s16, 3 }
  0x11   : > { %308 = vst.msk [vmem:[#allocation2 + $0x20] sm:$0xff] %vm302_vm0, %v1124_v0  ;;  %s1205_s28 = scalar_lea.vmem %s1352_s0, %s1003_s24  ;;  %s281_s29 = sadd.s32 %s948_s25, %s276_s23 }
  0x12   : > { %310 = vst.msk [vmem:[#allocation2 + $0x30] sm:$0xff] %vm302_vm0, %v1124_v0  ;;  %s949_s30 = sshll.u32 %s281_s29, 2  ;;  %s950_s5 = sshll.u32 %s1368_s16, 1 }
  0x13   : > { %312 = vst.msk [vmem:[#allocation2 + $0x40] sm:$0xff] %vm302_vm0, %v1124_v0  ;;  %s1212_s8 = scalar_lea.vmem %s1355_s3, %s949_s30  ;;  %s317_s11 = scalar_lea.vmem %s1205_s28, %s1004_s9 }
  0x14   : > { %314 = vst.msk [vmem:[#allocation2 + $0x50] sm:$0xff] %vm302_vm0, %v1124_v0  ;;  %s288_s10 = scalar_select %p287_p7, %s1106_s15, 1  ;;  %v1017_v1 = vld [vmem:[%s317_s11] sm:$0xff]   ;;  %v1024_v2 = vld [vmem:[%s317_s11 + $0x8] sm:$0xff]  }
  0x15   : > { %307 = vst.msk [vmem:[#allocation2 + $0x18] sm:$0x3] %vm304_vm1, %v1124_v0  ;;  %v1018_v3 = vunpack.c.l.bf16 %v1017_v1  ;;  %v1019_v4 = vunpack.c.h.bf16 %v1017_v1  ;;  %v1022_v5 = vunpack.c.l.bf16 %v1024_v2  ;;  %v1023_v6 = vunpack.c.h.bf16 %v1024_v2  ;;  %s955_s24 = sadd.s32 (!%p954_p8), 4294967295, %s1192_s22 }
  0x16   : > { %305 = vst.msk [vmem:[#allocation2 + $0x8] sm:$0x3] %vm304_vm1, %v1124_v0  ;;  %s293_s12 = sadd.s32 %s950_s5, %s288_s10  ;;  %s956_s25 = sshll.u32 (!%p954_p8), %s955_s24, 2 }
  0x17   : > { %309 = vst.msk [vmem:[#allocation2 + $0x28] sm:$0x3] %vm304_vm1, %v1124_v0  ;;  %s951_s13 = sshll.u32 %s293_s12, 1  ;;  %s337_s26 = scalar_lea.vmem (!%p954_p8), %s1205_s28, %s956_s25 }
  0x18   : > { %311 = vst.msk [vmem:[#allocation2 + $0x38] sm:$0x3] %vm304_vm1, %v1124_v0  ;;  %s1227_s23 = scalar_lea.vmem %s1356_s4, %s951_s13 }
  0x19   : > { %313 = vst.msk [vmem:[#allocation2 + $0x48] sm:$0x3] %vm304_vm1, %v1124_v0 }
  0x1a   : > { %315 = vst.msk [vmem:[#allocation2 + $0x58] sm:$0x3] %vm304_vm1, %v1124_v0  ;;  %334 = sbr.rel (%p954_p8) target bundleno = 35 (0x23), region = 40 }
  0x1b   : > { %327 = vst.msk [vmem:[#allocation2 + $0x11] sm:$0xff] %vm302_vm0, %v1018_v3 }
  0x1c   : > { %328 = vst.msk [vmem:[#allocation2 + $0x21] sm:$0xff] %vm302_vm0, %v1019_v4 }
  0x1d   : > { %329 = vst.msk [vmem:[#allocation2 + $0x31] sm:$0xff] %vm302_vm0, %v1022_v5 }
  0x1e   : > { %330 = vst.msk [vmem:[#allocation2 + $0x41] sm:$0xff] %vm302_vm0, %v1023_v6 }
  0x1f   : > { %v338_v7 = vld [vmem:[%s337_s26] sm:$0xf] }
  0x20   : > { %v339_v8 = vunpack.c.l.bf16 %v338_v7 }
  0x22   : > { %340 = vst.msk [vmem:[#allocation2 + $0x1] sm:$0xff] %vm302_vm0, %v339_v8 }
  0x23 PF: > { %p957_p9 = scmp.ge.s32.totalorder %s1106_s15, 1 }
  0x25   : > { %344 = sbr.rel (%p957_p9) target bundleno = 46 (0x2e), region = 44 }
  0x2a   : > { %v960_v9 = vld [vmem:[%s317_s11 + $0x10] sm:$0xf] }
  0x2b   : > { %v349_v10 = vunpack.c.l.bf16 %v960_v9 }
  0x2d   : > { %351 = vst.msk [vmem:[#allocation2 + $0x51] sm:$0xff] %vm302_vm0, %v349_v10 }
  0x2e PF: > { %v399_v11 = vld [vmem:[#allocation2 + $0x2] sm:$0xff]  ;;  %v428_v15 = vld [vmem:[#allocation2 + $0x10] sm:$0xff]  ;;  %s1125_s22 = smov 16   ;;  %s1126_s27 = smov 8   ;;  %vm352_vm2 = vcmask 1044032   ;;  %v1133_v47 = vmov 0  }
  0x2f   : > { %v370_v12 = vld [vmem:[#allocation2 + $0x1] sm:$0xff]  ;;  %v403_v13 = vpack.c.bf16 %v399_v11, %v399_v11  ;;  %v1239_v16 = vpack.c.bf16 %v428_v15, %v428_v15  ;;  %v400_v17 = vld [vmem:[#allocation2 + $0x12] sm:$0xff]  ;;  %s1127_s15 = smov 24   ;;  %s1128_s28 = smov 32   ;;  %353 = vst.msk [vmem:[#allocation3] sm:$0xf] %vm352_vm2, %v1133_v47 }
  0x30   : > { %v374_v14 = vpack.c.bf16 %v370_v12, %v370_v12  ;;  %v371_v18 = vld [vmem:[#allocation2 + $0x11] sm:$0xff]  ;;  %v429_v19 = vld [vmem:[#allocation2 + $0x20] sm:$0xff]  ;;  %v404_v20 = vpack.c.bf16 %v400_v17, %v400_v17  ;;  %s1129_s29 = smov 40   ;;  %s1130_s30 = smov 48   ;;  %vm365_vm3 = vcmask 60416   ;;  %vm394_vm4 = vcmask 126016  }
  0x31   : > { %411 = vrot.lane.b32.xlu1 %v403_v13, %s1125_s22  ;;  %440 = vrot.lane.b32.xlu2 %v1239_v16, %s1127_s15  ;;  %v375_v21 = vpack.c.bf16 %v371_v18, %v371_v18  ;;  %v1244_v22 = vpack.c.bf16 %v429_v19, %v429_v19  ;;  %v458_v23 = vld [vmem:[#allocation2 + $0x21] sm:$0xff]  ;;  %v373_v25 = vld [vmem:[#allocation2 + $0x31] sm:$0xff]  ;;  %s1131_s5 = smov 56   ;;  %s1132_s6 = smov 64   ;;  %354 = vst.msk [vmem:[#allocation3 + $0x4] sm:$0xf] %vm352_vm2, %v1133_v47 }
  0x32   : > { %382 = vrot.lane.b32.xlu0 %v374_v14, %s1126_s27  ;;  %v462_v24 = vpack.c.bf16 %v458_v23, %v458_v23  ;;  %v377_v26 = vpack.c.bf16 %v373_v25, %v373_v25  ;;  %v401_v27 = vld [vmem:[#allocation2 + $0x22] sm:$0xff]  ;;  %v402_v29 = vld [vmem:[#allocation2 + $0x32] sm:$0xff]  ;;  %355 = vst.msk [vmem:[#allocation3 + $0x8] sm:$0xf] %vm352_vm2, %v1133_v47  ;;  %vm423_vm5 = vcmask 191616   ;;  %vm452_vm6 = vcmask 257216  }
  0x33   : > { %v405_v28 = vpack.c.bf16 %v401_v27, %v401_v27  ;;  %v406_v30 = vpack.c.bf16 %v402_v29, %v402_v29  ;;  %v430_v31 = vld [vmem:[#allocation2 + $0x30] sm:$0xff]  ;;  %v431_v32 = vld [vmem:[#allocation2 + $0x40] sm:$0xff]  ;;  %356 = vst.msk [vmem:[#allocation3 + $0xc] sm:$0xf] %vm352_vm2, %v1133_v47  ;;  %v1015_v53 = vld [vmem:[%s1353_s1 + $0x38] sm:$0xff]  ;;  %vm481_vm7 = vcmask 322816  }
  0x34   : > { %v434_v33 = vpack.c.bf16 %v430_v31, %v430_v31  ;;  %v435_v34 = vpack.c.bf16 %v431_v32, %v431_v32  ;;  %v460_v35 = vld [vmem:[#allocation2 + $0x41] sm:$0xff]  ;;  %v519_v39 = vld [vmem:[#allocation2 + $0x50] sm:$0xff]  ;;  %367 = vst.msk [vmem:[#allocation3 + $0x4] sm:$0xf] %vm365_vm3, %v1239_v16  ;;  %687 = vmatpush.bf16.msra.mxu0 %v1015_v53  ;;  %1025 = vmatpush.bf16.msra.mxu1 %v1015_v53  ;;  %vm510_vm8 = vcmask 388416   ;;  %v1011_v63 = vld [vmem:[%s1353_s1 + $0x18] sm:$0xff] }
  0x35   : > { %v464_v36 = vpack.c.bf16 %v460_v35, %v460_v35  ;;  %v489_v37 = vld [vmem:[#allocation2 + $0x42] sm:$0xff]  ;;  %v548_v40 = vld [vmem:[#allocation2 + $0x51] sm:$0xff]  ;;  %v523_v41 = vpack.c.bf16 %v519_v39, %v519_v39  ;;  %368 = vst.msk [vmem:[#allocation3 + $0x8] sm:$0xf] %vm365_vm3, %v1244_v22  ;;  %vm540_vm9 = vcmask 454016   ;;  %vm569_vm10 = vcmask 519616  }
  0x36   : > { %v493_v38 = vpack.c.bf16 %v489_v37, %v489_v37  ;;  %v552_v42 = vpack.c.bf16 %v548_v40, %v548_v40  ;;  %v577_v43 = vld [vmem:[#allocation2 + $0x52] sm:$0xff]  ;;  %v357_v45 = vld [vmem:[#allocation2] sm:$0xff]  ;;  %369 = vst.msk [vmem:[#allocation3 + $0xc] sm:$0xf] %vm365_vm3, %v434_v33  ;;  %v1013_v58 = vld [vmem:[%s1353_s1 + $0x28] sm:$0xff]  ;;  %vm598_vm11 = vcmask 585216  }
  0x37   : > { %v581_v44 = vpack.c.bf16 %v577_v43, %v577_v43  ;;  %v361_v46 = vpack.c.bf16 %v357_v45, %v357_v45  ;;  %v1014_v54 = vld [vmem:[%s1353_s1 + $0x30] sm:$0xff]  ;;  %v1012_v59 = vld [vmem:[%s1353_s1 + $0x20] sm:$0xff]  ;;  %v1009_v3 = vld [vmem:[%s1353_s1 + $0x8] sm:$0xff]  ;;  %vm744_vm12 = vcmask 125952   ;;  %vm706_vm13 = vcmask 130048  }
  0x38   : > { %688 = vmatpush.bf16.msra.mxu0 %v1014_v54  ;;  %1026 = vmatpush.bf16.msra.mxu1 %v1014_v54  ;;  %v1010_v0 = vld [vmem:[%s1353_s1 + $0x10] sm:$0xff]  ;;  %v1008_v5 = vld [vmem:[%s1353_s1] sm:$0xff]  ;;  %vm737_vm14 = vcmask 122880  }
  0x39   : > { %413 = vrot.lane.b32.xlu1 %v404_v20, %s1125_s22  ;;  %442 = vrot.lane.b32.xlu2 %v1244_v22, %s1127_s15  ;;  %366 = vst.msk [vmem:[#allocation3] sm:$0xf] %vm365_vm3, %v361_v46 }
  0x3a   : > { %384 = vrot.lane.b32.xlu0 %v375_v21, %s1126_s27 }
  0x3c   : > { %689 = vmatpush.bf16.msra.mxu0 %v1013_v58  ;;  %1027 = vmatpush.bf16.msra.mxu1 %v1013_v58 }
  0x40   : > { %690 = vmatpush.bf16.msra.mxu0 %v1012_v59  ;;  %1028 = vmatpush.bf16.msra.mxu1 %v1012_v59 }
  0x41   : > { %471 = vrot.lane.b32.xlu1 %v462_v24, %s1128_s28  ;;  %386 = vrot.lane.b32.xlu2 %v462_v24, %s1126_s27 }
  0x42   : > { %469 = vrot.lane.b32.xlu0 %v375_v21, %s1128_s28 }
  0x44   : > { %691 = vmatpush.bf16.msra.mxu0 %v1011_v63  ;;  %1029 = vmatpush.bf16.msra.mxu1 %v1011_v63 }
  0x48   : > { %692 = vmatpush.bf16.msra.mxu0 %v1010_v0  ;;  %1030 = vmatpush.bf16.msra.mxu1 %v1010_v0 }
  0x49   : > { %498 = vrot.lane.b32.xlu1 %v404_v20, %s1129_s29  ;;  %500 = vrot.lane.b32.xlu2 %v405_v28, %s1129_s29 }
  0x4a   : > { %388 = vrot.lane.b32.xlu0 %v377_v26, %s1126_s27 }
  0x4c   : > { %693 = vmatpush.bf16.msra.mxu0 %v1009_v3  ;;  %1031 = vmatpush.bf16.msra.mxu1 %v1009_v3 }
  0x50   : > { %694 = vmatpush.bf16.msra.mxu0 %v1008_v5  ;;  %1032 = vmatpush.bf16.msra.mxu1 %v1008_v5 }
  0x51   : > { %417 = vrot.lane.b32.xlu1 %v406_v30, %s1125_s22  ;;  %528 = vrot.lane.b32.xlu2 %v1244_v22, %s1130_s30 }
  0x52   : > { %415 = vrot.lane.b32.xlu0 %v405_v28, %s1125_s22 }
  0x59   : > { %444 = vrot.lane.b32.xlu1 %v434_v33, %s1127_s15  ;;  %446 = vrot.lane.b32.xlu2 %v435_v34, %s1127_s15 }
  0x5a   : > { %530 = vrot.lane.b32.xlu0 %v434_v33, %s1130_s30 }
  0x61   : > { %559 = vrot.lane.b32.xlu1 %v377_v26, %s1131_s5  ;;  %473 = vrot.lane.b32.xlu2 %v377_v26, %s1128_s28  ;;  %v1083_v26 = vld [vmem:[%s1354_s2] ss:$0 sm:$0xff] }
  0x62   : > { %557 = vrot.lane.b32.xlu0 %v462_v24, %s1131_s5 }
  0x69   : > { %586 = vrot.lane.b32.xlu1 %v405_v28, %s1132_s6  ;;  %588 = vrot.lane.b32.xlu2 %v406_v30, %s1132_s6 }
  0x6a   : > { %475 = vrot.lane.b32.xlu0 %v464_v36, %s1128_s28 }
  0x71   : > { %504 = vrot.lane.b32.xlu1 %v493_v38, %s1129_s29  ;;  %532 = vrot.lane.b32.xlu2 %v435_v34, %s1130_s30 }
  0x72   : > { %502 = vrot.lane.b32.xlu0 %v406_v30, %s1129_s29 }
  0x79   : > { %561 = vrot.lane.b32.xlu1 %v464_v36, %s1131_s5  ;;  %563 = vrot.lane.b32.xlu2 %v552_v42, %s1131_s5 }
  0x7a   : > { %534 = vrot.lane.b32.xlu0 %v523_v41, %s1130_s30 }
  0x81   : > { %592 = vrot.lane.b32.xlu1 %v581_v44, %s1132_s6 }
  0x82   : > { %590 = vrot.lane.b32.xlu0 %v493_v38, %s1132_s6 }
  0x8b   : > { %v441_v48 = vpop.permute.xlu2 %440 }
  0x93   : > { %v443_v49 = vpop.permute.xlu2 %442 }
  0x9b   : > { %v387_v50 = vpop.permute.xlu2 %386 }
  0x9c   : > { %397 = vst.msk [vmem:[#allocation3 + $0x8] sm:$0xf] %vm394_vm4, %v387_v50 }
  0xa3   : > { %v412_v51 = vpop.permute.xlu1 %411  ;;  %v501_v55 = vpop.permute.xlu2 %500 }
  0xa4   : > { %v383_v52 = vpop.permute.xlu0 %382 }
  0xa5   : > { %395 = vst.msk [vmem:[#allocation3] sm:$0xf] %vm394_vm4, %v383_v52 }
  0xa6   : > { %424 = vst.msk [vmem:[#allocation3] sm:$0xf] %vm423_vm5, %v412_v51 }
  0xa7   : > { %453 = vst.msk [vmem:[#allocation3] sm:$0xf] %vm452_vm6, %v441_v48 }
  0xab   : > { %v414_v56 = vpop.permute.xlu1 %413  ;;  %v529_v62 = vpop.permute.xlu2 %528 }
  0xac   : > { %v385_v57 = vpop.permute.xlu0 %384 }
  0xad   : > { %396 = vst.msk [vmem:[#allocation3 + $0x4] sm:$0xf] %vm394_vm4, %v385_v57 }
  0xae   : > { %425 = vst.msk [vmem:[#allocation3 + $0x4] sm:$0xf] %vm423_vm5, %v414_v56 }
  0xaf   : > { %454 = vst.msk [vmem:[#allocation3 + $0x4] sm:$0xf] %vm452_vm6, %v443_v49 }
  0xb3   : > { %v472_v60 = vpop.permute.xlu1 %471  ;;  %v447_v4 = vpop.permute.xlu2 %446 }
  0xb4   : > { %v470_v61 = vpop.permute.xlu0 %469  ;;  %483 = vst.msk [vmem:[#allocation3 + $0x4] sm:$0xf] %vm481_vm7, %v472_v60 }
  0xb5   : > { %482 = vst.msk [vmem:[#allocation3] sm:$0xf] %vm481_vm7, %v470_v61 }
  0xb6   : > { %512 = vst.msk [vmem:[#allocation3 + $0x4] sm:$0xf] %vm510_vm8, %v501_v55 }
  0xbb   : > { %v499_v1 = vpop.permute.xlu1 %498  ;;  %v474_v8 = vpop.permute.xlu2 %473 }
  0xbc   : > { %v389_v2 = vpop.permute.xlu0 %388  ;;  %511 = vst.msk [vmem:[#allocation3] sm:$0xf] %vm510_vm8, %v499_v1 }
  0xbd   : > { %398 = vst.msk [vmem:[#allocation3 + $0xc] sm:$0xf] %vm394_vm4, %v389_v2 }
  0xbe   : > { %541 = vst.msk [vmem:[#allocation3] sm:$0xf] %vm540_vm9, %v529_v62 }
  0xc3   : > { %v418_v6 = vpop.permute.xlu1 %417  ;;  %v589_v11 = vpop.permute.xlu2 %588 }
  0xc4   : > { %v416_v7 = vpop.permute.xlu0 %415  ;;  %427 = vst.msk [vmem:[#allocation3 + $0xc] sm:$0xf] %vm423_vm5, %v418_v6 }
  0xc5   : > { %426 = vst.msk [vmem:[#allocation3 + $0x8] sm:$0xf] %vm423_vm5, %v416_v7 }
  0xc6   : > { %456 = vst.msk [vmem:[#allocation3 + $0xc] sm:$0xf] %vm452_vm6, %v447_v4 }
  0xcb   : > { %v445_v9 = vpop.permute.xlu1 %444  ;;  %v533_v16 = vpop.permute.xlu2 %532 }
  0xcc   : > { %v531_v10 = vpop.permute.xlu0 %530  ;;  %455 = vst.msk [vmem:[#allocation3 + $0x8] sm:$0xf] %vm452_vm6, %v445_v9 }
  0xcd   : > { %542 = vst.msk [vmem:[#allocation3 + $0x4] sm:$0xf] %vm540_vm9, %v531_v10 }
  0xce   : > { %484 = vst.msk [vmem:[#allocation3 + $0x8] sm:$0xf] %vm481_vm7, %v474_v8 }
  0xd3   : > { %v560_v12 = vpop.permute.xlu1 %559  ;;  %v564_v20 = vpop.permute.xlu2 %563 }
  0xd4   : > { %v558_v13 = vpop.permute.xlu0 %557  ;;  %571 = vst.msk [vmem:[#allocation3 + $0x4] sm:$0xf] %vm569_vm10, %v560_v12 }
  0xd5   : > { %570 = vst.msk [vmem:[#allocation3] sm:$0xf] %vm569_vm10, %v558_v13 }
  0xd6   : > { %600 = vst.msk [vmem:[#allocation3 + $0x4] sm:$0xf] %vm598_vm11, %v589_v11 }
  0xdb   : > { %v587_v14 = vpop.permute.xlu1 %586 }
  0xdc   : > { %v476_v15 = vpop.permute.xlu0 %475  ;;  %599 = vst.msk [vmem:[#allocation3] sm:$0xf] %vm598_vm11, %v587_v14 }
  0xdd   : > { %485 = vst.msk [vmem:[#allocation3 + $0xc] sm:$0xf] %vm481_vm7, %v476_v15 }
  0xe3   : > { %v505_v17 = vpop.permute.xlu1 %504  ;;  %v1006_v19 = vld [vmem:[#allocation3] sm:$0xff] }
  0xe4   : > { %v503_v18 = vpop.permute.xlu0 %502  ;;  %514 = vst.msk [vmem:[#allocation3 + $0xc] sm:$0xf] %vm510_vm8, %v505_v17  ;;  %695 = vmatmul.bf16.vlgmr.msra.gmra.mxu0 %v1006_v19 }
  0xe5   : > { %513 = vst.msk [vmem:[#allocation3 + $0x8] sm:$0xf] %vm510_vm8, %v503_v18 }
  0xe6   : > { %543 = vst.msk [vmem:[#allocation3 + $0x8] sm:$0xf] %vm540_vm9, %v533_v16 }
  0xeb   : > { %v562_v21 = vpop.permute.xlu1 %561 }
  0xec   : > { %v535_v22 = vpop.permute.xlu0 %534  ;;  %572 = vst.msk [vmem:[#allocation3 + $0x8] sm:$0xf] %vm569_vm10, %v562_v21 }
  0xed   : > { %544 = vst.msk [vmem:[#allocation3 + $0xc] sm:$0xf] %vm540_vm9, %v535_v22 }
  0xee   : > { %573 = vst.msk [vmem:[#allocation3 + $0xc] sm:$0xf] %vm569_vm10, %v564_v20 }
  0xf3   : > { %v593_v23 = vpop.permute.xlu1 %592 }
  0xf4   : > { %v591_v24 = vpop.permute.xlu0 %590  ;;  %602 = vst.msk [vmem:[#allocation3 + $0xc] sm:$0xf] %vm598_vm11, %v593_v23 }
  0xf5   : > { %601 = vst.msk [vmem:[#allocation3 + $0x8] sm:$0xf] %vm598_vm11, %v591_v24 }
  0xfc   : > { %v1007_v25 = vld [vmem:[#allocation3 + $0x8] sm:$0xff] }
  0xfd   : > { %700 = vmatmul.bf16.vlgmr.msra.gmra.mxu1 %v1007_v25 }
 0x161   : > { %v696_v27 = vpop.f32.mrf.mxu0 }
 0x162   : > { %v697_v28 = vadd.f32 %v1083_v26, %v696_v27 }
 0x164   : > { %v740_v29 = vpack.c.bf16 %v697_v28, %v697_v28  ;;  %v720_v37 = vmul.f32 %v697_v28, %v697_v28  ;;  %v707_v40 = vsel %vm706_vm13, %v697_v28, 0.0 }
 0x166   : > { %745 = vst.msk [vmem:[%s1212_s8] sm:$0xf] %vm744_vm12, %v740_v29  ;;  %v724_v45 = vsel %vm706_vm13, %v720_v37, 0.0 }
 0x169   : > { %v698_v30 = vpop.f32.mrf.mxu0 }
 0x16a   : > { %v699_v31 = vadd.f32 %v1083_v26, %v698_v30 }
 0x16c   : > { %v741_v32 = vpack.c.bf16 %v699_v31, %v699_v31  ;;  %v721_v35 = vmul.f32 %v699_v31, %v699_v31  ;;  %v708_v38 = vsel %vm706_vm13, %v699_v31, 0.0 }
 0x16d   : > { %v709_v43 = vadd.f32 %v708_v38, %v707_v40 }
 0x16e   : > { %746 = vst.msk [vmem:[%s1212_s8 + $0x4] sm:$0xf] %vm744_vm12, %v741_v32  ;;  %v725_v41 = vsel %vm706_vm13, %v721_v35, 0.0 }
 0x16f   : > { %v726_v48 = vadd.f32 %v725_v41, %v724_v45 }
 0x17a   : > { %v701_v33 = vpop.f32.mrf.mxu1 }
 0x17b   : > { %v702_v34 = vadd.f32 %v1083_v26, %v701_v33 }
 0x17d   : > { %v742_v36 = vpack.c.bf16 %v702_v34, %v702_v34  ;;  %v722_v39 = vmul.f32 %v702_v34, %v702_v34  ;;  %v710_v42 = vsel %vm706_vm13, %v702_v34, 0.0 }
 0x17e   : > { %v711_v49 = vadd.f32 %v710_v42, %v709_v43 }
 0x17f   : > { %747 = vst.msk [vmem:[%s1212_s8 + $0x8] sm:$0xf] %vm744_vm12, %v742_v36  ;;  %v727_v46 = vsel %vm706_vm13, %v722_v39, 0.0 }
 0x180   : > { %v728_v53 = vadd.f32 %v727_v46, %v726_v48 }
 0x182   : > { %v703_v44 = vpop.f32.mrf.mxu1 }
 0x183   : > { %v704_v47 = vadd.f32 %v1083_v26, %v703_v44 }
 0x185   : > { %v712_v50 = vsel %vm706_vm13, %v704_v47, 0.0  ;;  %v723_v51 = vmul.f32 %v704_v47, %v704_v47  ;;  %v743_v52 = vpack.c.bf16 %v704_v47, %v704_v47 }
 0x186   : > { %v713_v54 = vadd.f32 %v712_v50, %v711_v49 }
 0x187   : > { %v729_v55 = vsel %vm706_vm13, %v723_v51, 0.0  ;;  %748 = vst.msk [vmem:[%s1212_s8 + $0xc] sm:$0xf] %vm744_vm12, %v743_v52 }
 0x188   : > { %v714_v56 = vrot.slane %v713_v54, 4  ;;  %v730_v57 = vadd.f32 %v729_v55, %v728_v53 }
 0x18a   : > { %v715_v58 = vadd.f32 %v714_v56, %v713_v54  ;;  %v731_v59 = vrot.slane %v730_v57, 4 }
 0x18c   : > { %v716_v60 = vrot.slane %v715_v58, 2  ;;  %v732_v61 = vadd.f32 %v731_v59, %v730_v57 }
 0x18e   : > { %v717_v62 = vadd.f32 %v716_v60, %v715_v58  ;;  %v733_v63 = vrot.slane %v732_v61, 2 }
 0x190   : > { %v718_v0 = vrot.slane %v717_v62, 1  ;;  %v734_v1 = vadd.f32 %v733_v63, %v732_v61 }
 0x192   : > { %v719_v2 = vadd.f32 %v718_v0, %v717_v62  ;;  %v735_v3 = vrot.slane %v734_v1, 1 }
 0x194   : > { %v736_v4 = vadd.f32 %v735_v3, %v734_v1  ;;  %738 = vst.msk [vmem:[%s1227_s23] sm:$0x1] %vm737_vm14, %v719_v2 }
 0x196   : > { %739 = vst.msk [vmem:[%s1227_s23 + $0x1] sm:$0x1] %vm737_vm14, %v736_v4 }
 0x197 PF: > { %s15_s19 = sadd.s32 1, %s1122_s19   ;;  %s1357_s15 = smov %s1114_s17 }
 0x198   : > { %p12_p10 = scmp.ge.s32.totalorder %s15_s19, 6   ;;  %s1358_s16 = smov %s1118_s18 }
 0x199   : > { %s1359_s17 = smov %s1362_s20  ;;  %s1360_s18 = smov %s1366_s21 }
 0x19a   :  { %14 = sbr.rel (!%p12_p10) target bundleno = 3 (0x3), region = 98 }

// kernel: vgg_forward.14
= control target key start
LH: loop header
LB: loop body
LE: loop exit
PB: predicated region body
PF: predicated region fallthrough
CT: control target
= control target key end

     0   :  { %s527_s9 = smov 0   ;;  %s529_s10 = smov 0   ;;  %s596_s0 = inlined_call_operand.vmem [shape: bf16[2,8,8,16], index: 0, kind: input, shape index: {}]   ;;  %s597_s1 = inlined_call_operand.vmem [shape: f32[2,16], index: 1, kind: input, shape index: {}]   ;;  %s598_s2 = inlined_call_operand.vmem [shape: bf16[2,4,4,16], index: 2, kind: output, shape index: {}]  }
   0x1   :  { %s531_s11 = smov 0   ;;  %s533_s12 = smov 0  }
   0x2   :  { %s535_s13 = smov 0  }
   0x3 LB: > { %s27_s14 = sadd.s32 1, %s502_s11  ;;  %s31_s15 = sadd.s32 1, %s506_s12  ;;  %s510_s13 = sphi %s535_s13, %s12_s13   ;;  %s506_s12 = sphi %s533_s12, %s602_s12   ;;  %s502_s11 = sphi %s531_s11, %s601_s11   ;;  %s498_s10 = sphi %s529_s10, %s600_s10   ;;  %s494_s9 = sphi %s527_s9, %s599_s9  }
   0x4   : > { %p29_p0 = scmp.ge.s32.totalorder %s27_s14, 2  ;;  %p412_p1 = scmp.ge.s32.totalorder %s510_s13, 1 }
   0x5   : > { %p156_p2 = scmp.lt.s32.totalorder %s510_s13, 5 }
   0x6   : > { %s604_s14 = smov (%p29_p0, %s27_s14), 0  ;;  %s606_s15 = smov (!%p29_p0, %s31_s15), %s506_s12 }
   0x7   : > { %p157_p3 = pnand %p412_p1, %p156_p2  ;;  %p33_p4 = scmp.ge.s32.totalorder %s606_s15, 2 }
   0x8   : > { %s413_s16 = sshll.u32 (!%p157_p3), %s494_s9, 2  ;;  %p197_p5 = scmp.lt.s32.totalorder (!%p157_p3), %s498_s10, 1 }
   0x9   : > { %s608_s15 = smov (%p33_p4, %s606_s15), 0  ;;  %160 = sbr.rel (%p157_p3) target bundleno = 48 (0x30), region = 28 }
   0xa   : > { %p199_p6 = scmp.lt.s32.totalorder (!%p157_p3), %s413_s16, 7  ;;  %s416_s27 = sshll.u32 (!%p157_p3), %s494_s9, 1 }
   0xb   : > { %p216_p7 = scmp.lt.s32.totalorder (!%p157_p3), %s416_s27, 3 }
   0xe   : > { %s610_s10 = smov (!%p197_p5, %s498_s10), 1  ;;  %s612_s16 = smov (!%p199_p6, %s413_s16), 7  ;;  %v470_v0 = vld [vmem:[%s597_s1] ss:$0 sm:$0xff]  ;;  %v471_v4 = vld [vmem:[%s597_s1 + $0x1] ss:$0 sm:$0xff] }
   0xf   : > { %s414_s17 = sshll.u32 %s610_s10, 3  ;;  %vm250_vm0 = vcmask 130048   ;;  %s614_s27 = smov (!%p216_p7, %s416_s27), 3  ;;  %vm274_vm1 = vcmask 125952   ;;  %vm283_vm2 = vcmask 123904  }
  0x10   : > { %s205_s18 = sadd.s32 %s414_s17, %s612_s16  ;;  %s417_s28 = sshll.u32 %s610_s10, 2 }
  0x11   : > { %s415_s19 = sshll.u32 %s205_s18, 2  ;;  %s222_s29 = sadd.s32 %s417_s28, %s614_s27 }
  0x12   : > { %s207_s22 = scalar_lea.vmem %s596_s0, %s415_s19  ;;  %s418_s30 = sshll.u32 %s222_s29, 1 }
  0x13   : > { %v422_v1 = vld [vmem:[%s207_s22] sm:$0xff]   ;;  %v429_v2 = vld [vmem:[%s207_s22 + $0x8] sm:$0xff]   ;;  %s224_s5 = scalar_lea.vmem %s598_s2, %s418_s30 }
  0x14   : > { %v423_v3 = vunpack.c.l.bf16 %v422_v1  ;;  %v424_v5 = vunpack.c.h.bf16 %v422_v1  ;;  %v427_v6 = vunpack.c.l.bf16 %v429_v2  ;;  %v428_v7 = vunpack.c.h.bf16 %v429_v2 }
  0x16   : > { %v237_v8 = vmul.f32 %v470_v0, %v423_v3  ;;  %v238_v9 = vmul.f32 %v470_v0, %v424_v5  ;;  %v239_v10 = vmul.f32 %v470_v0, %v427_v6  ;;  %v240_v11 = vmul.f32 %v470_v0, %v428_v7 }
  0x18   : > { %v242_v12 = vadd.f32 %v471_v4, %v237_v8  ;;  %v243_v13 = vadd.f32 %v471_v4, %v238_v9  ;;  %v244_v14 = vadd.f32 %v471_v4, %v239_v10  ;;  %v245_v15 = vadd.f32 %v471_v4, %v240_v11 }
  0x1a   : > { %v246_v16 = vmax.f32 %v242_v12, 0.0  ;;  %v247_v17 = vmax.f32 %v243_v13, 0.0  ;;  %v248_v18 = vmax.f32 %v244_v14, 0.0  ;;  %v249_v19 = vmax.f32 %v245_v15, 0.0 }
  0x1c   : > { %251 = vst.msk [vmem:[#allocation2] sm:$0xff] %vm250_vm0, %v246_v16 }
  0x1d   : > { %252 = vst.msk [vmem:[#allocation2 + $0x8] sm:$0xff] %vm250_vm0, %v247_v17 }
  0x1e   : > { %253 = vst.msk [vmem:[#allocation2 + $0x10] sm:$0xff] %vm250_vm0, %v248_v18 }
  0x1f   : > { %254 = vst.msk [vmem:[#allocation2 + $0x18] sm:$0xff] %vm250_vm0, %v249_v19 }
  0x23   : > { %v255_v20 = vld [vmem:[#allocation2] ss:$2 sm:$0xf]  ;;  %v263_v21 = vld [vmem:[#allocation2 + $0x1] ss:$2 sm:$0xf] }
  0x24   : > { %v257_v22 = vld [vmem:[#allocation2 + $0x8] ss:$2 sm:$0xf]  ;;  %v265_v23 = vld [vmem:[#allocation2 + $0x9] ss:$2 sm:$0xf]  ;;  %v270_v24 = vmax.f32 %v255_v20, %v263_v21 }
  0x25   : > { %v271_v25 = vmax.f32 %v257_v22, %v265_v23  ;;  %v259_v26 = vld [vmem:[#allocation2 + $0x10] ss:$2 sm:$0xf]  ;;  %v267_v27 = vld [vmem:[#allocation2 + $0x11] ss:$2 sm:$0xf] }
  0x26   : > { %v275_v28 = vsel %vm274_vm1, %v270_v24, -inf  ;;  %v261_v29 = vld [vmem:[#allocation2 + $0x18] ss:$2 sm:$0xf]  ;;  %v272_v30 = vmax.f32 %v259_v26, %v267_v27 }
  0x27   : > { %v276_v31 = vsel %vm274_vm1, %v271_v25, -inf  ;;  %v269_v32 = vld [vmem:[#allocation2 + $0x19] ss:$2 sm:$0xf] }
  0x28   : > { %v277_v33 = vmax.f32 %v275_v28, %v276_v31  ;;  %v273_v34 = vmax.f32 %v261_v29, %v269_v32  ;;  %v278_v35 = vsel %vm274_vm1, %v272_v30, -inf }
  0x2a   : > { %v281_v36 = vpack.c.bf16 %v277_v33, %v277_v33  ;;  %v279_v37 = vsel %vm274_vm1, %v273_v34, -inf }
  0x2b   : > { %v280_v38 = vmax.f32 %v278_v35, %v279_v37 }
  0x2c   : > { %284 = vst.msk [vmem:[%s224_s5] sm:$0x3] %vm283_vm2, %v281_v36 }
  0x2d   : > { %v282_v39 = vpack.c.bf16 %v280_v38, %v280_v38 }
  0x2f   : > { %285 = vst.msk [vmem:[%s224_s5 + $0x2] sm:$0x3] %vm283_vm2, %v282_v39 }
  0x30 PF: > { %s12_s13 = sadd.s32 1, %s510_s13   ;;  %s599_s9 = smov %s502_s11 }
  0x31   : > { %p9_p8 = scmp.ge.s32.totalorder %s12_s13, 6   ;;  %s600_s10 = smov %s506_s12 }
  0x32   : > { %s601_s11 = smov %s604_s14  ;;  %s602_s12 = smov %s608_s15 }
  0x33   :  { %11 = sbr.rel (!%p9_p8) target bundleno = 3 (0x3), region = 68 }

// kernel: vgg_forward.9
= control target key start
LH: loop header
LB: loop body
LE: loop exit
PB: predicated region body
PF: predicated region fallthrough
CT: control target
= control target key end

     0   :  { %s2128_s15 = smov 0   ;;  %s2130_s16 = smov 0   ;;  %s2895_s0 = inlined_call_operand.vmem [shape: f32[2,16,16,3], index: 0, kind: input, shape index: {}]   ;;  %s2896_s1 = inlined_call_operand.vmem [shape: bf16[128,8], index: 1, kind: input, shape index: {}]   ;;  %s2897_s2 = inlined_call_operand.vmem [shape: f32[1,8], index: 2, kind: input, shape index: {}]   ;;  %s2898_s3 = inlined_call_operand.vmem [shape: bf16[2,16,16,8], index: 3, kind: output, shape index: {0}]   ;;  %s2899_s4 = inlined_call_operand.vmem [shape: f32[2,2,2,8], index: 4, kind: output, shape index: {1}]  }
   0x1   :  { %s2132_s17 = smov 0   ;;  %s2134_s18 = smov 0  }
   0x2   :  { %s2136_s19 = smov 0  }
   0x3 LB: > { %s30_s20 = sadd.s32 1, %s2083_s17  ;;  %s34_s21 = sadd.s32 1, %s2087_s18  ;;  %s2091_s19 = sphi %s2136_s19, %s15_s19   ;;  %s2087_s18 = sphi %s2134_s18, %s2903_s18   ;;  %s2083_s17 = sphi %s2132_s17, %s2902_s17   ;;  %s2079_s16 = sphi %s2130_s16, %s2901_s16   ;;  %s2075_s15 = sphi %s2128_s15, %s2900_s15  }
   0x4   : > { %p32_p0 = scmp.ge.s32.totalorder %s30_s20, 2  ;;  %p1874_p1 = scmp.ge.s32.totalorder %s2091_s19, 1 }
   0x5   : > { %p209_p2 = scmp.lt.s32.totalorder %s2091_s19, 5 }
   0x6   : > { %s2905_s20 = smov (%p32_p0, %s30_s20), 0  ;;  %s2907_s21 = smov (!%p32_p0, %s34_s21), %s2087_s18 }
   0x7   : > { %p210_p3 = pnand %p1874_p1, %p209_p2  ;;  %p36_p4 = scmp.ge.s32.totalorder %s2907_s21, 2 }
   0x8   : > { %p261_p5 = scmp.lt.s32.totalorder (!%p210_p3), %s2079_s16, 1  ;;  %s2161_s22 = sshll.u32 (!%p210_p3), %s2075_s15, 3 }
   0x9   : > { %s2909_s21 = smov (%p36_p4, %s2907_s21), 0  ;;  %213 = sbr.rel (%p210_p3) target bundleno = 697 (0x2b9), region = 32 }
   0xa   : > { %p276_p6 = scmp.lt.s32.totalorder (!%p210_p3), %s2161_s22, 15  ;;  %p289_p7 = scmp.lt.s32.totalorder (!%p210_p3), %s2075_s15, 1 }
   0xb   : > { %p1885_p8 = scmp.le.s32.totalorder (!%p210_p3), %s2075_s15, 0 }
   0xe   : > { %vm304_vm0 = vcmask 23552   ;;  %v2093_v0 = vmov 0.0   ;;  %s2911_s16 = smov (!%p261_p5, %s2079_s16), 1  ;;  %vm307_vm1 = vcmask 17408  }
   0xf   : > { %309 = vst.msk [vmem:[#allocation2 + $0x18] sm:$0xff] %vm304_vm0, %v2093_v0  ;;  %s277_s23 = scalar_select %p276_p6, %s2161_s22, 15 }
  0x10   : > { %305 = vst.msk [vmem:[#allocation2] sm:$0xff] %vm304_vm0, %v2093_v0  ;;  %s1879_s24 = sshll.u32 %s2911_s16, 5  ;;  %s1881_s5 = sshll.u32 %s2911_s16, 1 }
  0x11   : > { %306 = vst.msk [vmem:[#allocation2 + $0x8] sm:$0xff] %vm304_vm0, %v2093_v0  ;;  %s1878_s25 = sshll.u32 %s277_s23, 1  ;;  %s1959_s12 = sshll.u32 %s2911_s16, 8 }
  0x12   : > { %310 = vst.msk [vmem:[#allocation2 + $0x20] sm:$0xff] %vm304_vm0, %v2093_v0  ;;  %s283_s26 = sadd.s32 %s1879_s24, %s1878_s25  ;;  %s2207_s23 = scalar_lea.vmem %s2895_s0, %s1959_s12 }
  0x13   : > { %312 = vst.msk [vmem:[#allocation2 + $0x30] sm:$0xff] %vm304_vm0, %v2093_v0  ;;  %s1880_s27 = sshll.u32 %s283_s26, 2  ;;  %s1960_s24 = sshll.u32 %s2075_s15, 7 }
  0x14   : > { %313 = vst.msk [vmem:[#allocation2 + $0x38] sm:$0xff] %vm304_vm0, %v2093_v0  ;;  %s2180_s30 = scalar_lea.vmem %s2898_s3, %s1880_s27  ;;  %s2214_s16 = scalar_lea.vmem %s2207_s23, %s1960_s24 }
  0x15   : > { %315 = vst.msk [vmem:[#allocation2 + $0x48] sm:$0xff] %vm304_vm0, %v2093_v0  ;;  %s290_s6 = scalar_select %p289_p7, %s2075_s15, 1  ;;  %v338_v1 = vld [vmem:[%s2214_s16] sm:$0xff]  ;;  %v339_v2 = vld [vmem:[%s2214_s16 + $0x8] sm:$0xff]  ;;  %v340_v3 = vld [vmem:[%s2214_s16 + $0x10] sm:$0xff] }
  0x16   : > { %316 = vst.msk [vmem:[#allocation2 + $0x50] sm:$0xff] %vm304_vm0, %v2093_v0  ;;  %v341_v4 = vld [vmem:[%s2214_s16 + $0x18] sm:$0xff]  ;;  %v342_v5 = vld [vmem:[%s2214_s16 + $0x20] sm:$0xff]  ;;  %v343_v6 = vld [vmem:[%s2214_s16 + $0x28] sm:$0xff]  ;;  %s1886_s25 = sadd.s32 (!%p1885_p8), 4294967295, %s2161_s22 }
  0x17   : > { %318 = vst.msk [vmem:[#allocation2 + $0x60] sm:$0xff] %vm304_vm0, %v2093_v0  ;;  %s295_s7 = sadd.s32 %s1881_s5, %s290_s6  ;;  %v344_v7 = vld [vmem:[%s2214_s16 + $0x30] sm:$0xff]  ;;  %v345_v8 = vld [vmem:[%s2214_s16 + $0x38] sm:$0xff]  ;;  %v346_v9 = vld [vmem:[%s2214_s16 + $0x40] sm:$0xff]  ;;  %s1887_s26 = sshll.u32 (!%p1885_p8), %s1886_s25, 4 }
  0x18   : > { %319 = vst.msk [vmem:[#allocation2 + $0x68] sm:$0xff] %vm304_vm0, %v2093_v0  ;;  %s1882_s8 = sshll.u32 %s295_s7, 1  ;;  %v347_v10 = vld [vmem:[%s2214_s16 + $0x48] sm:$0xff]  ;;  %v348_v11 = vld [vmem:[%s2214_s16 + $0x50] sm:$0xff]  ;;  %v349_v12 = vld [vmem:[%s2214_s16 + $0x58] sm:$0xff]  ;;  %s377_s27 = scalar_lea.vmem (!%p1885_p8), %s2207_s23, %s1887_s26 }
  0x19   : > { %321 = vst.msk [vmem:[#allocation2 + $0x78] sm:$0xff] %vm304_vm0, %v2093_v0  ;;  %s2192_s11 = scalar_lea.vmem %s2899_s4, %s1882_s8  ;;  %v350_v13 = vld [vmem:[%s2214_s16 + $0x60] sm:$0xff]  ;;  %v351_v14 = vld [vmem:[%s2214_s16 + $0x68] sm:$0xff]  ;;  %v352_v15 = vld [vmem:[%s2214_s16 + $0x70] sm:$0xff] }
  0x1a   : > { %322 = vst.msk [vmem:[#allocation2 + $0x80] sm:$0xff] %vm304_vm0, %v2093_v0  ;;  %v353_v16 = vld [vmem:[%s2214_s16 + $0x78] sm:$0xff] }
  0x1b   : > { %324 = vst.msk [vmem:[#allocation2 + $0x90] sm:$0xff] %vm304_vm0, %v2093_v0 }
  0x1c   : > { %325 = vst.msk [vmem:[#allocation2 + $0x98] sm:$0xff] %vm304_vm0, %v2093_v0 }
  0x1d   : > { %327 = vst.msk [vmem:[#allocation2 + $0xa8] sm:$0xff] %vm304_vm0, %v2093_v0 }
  0x1e   : > { %328 = vst.msk [vmem:[#allocation2 + $0xb0] sm:$0xff] %vm304_vm0, %v2093_v0 }
  0x1f   : > { %330 = vst.msk [vmem:[#allocation2 + $0xc0] sm:$0xff] %vm304_vm0, %v2093_v0 }
  0x20   : > { %331 = vst.msk [vmem:[#allocation2 + $0xc8] sm:$0xff] %vm304_vm0, %v2093_v0 }
  0x21   : > { %333 = vst.msk [vmem:[#allocation2 + $0xd8] sm:$0xff] %vm304_vm0, %v2093_v0 }
  0x22   : > { %334 = vst.msk [vmem:[#allocation2 + $0xe0] sm:$0xff] %vm304_vm0, %v2093_v0 }
  0x23   : > { %311 = vst.msk [vmem:[#allocation2 + $0x28] sm:$0x3] %vm307_vm1, %v2093_v0 }
  0x24   : > { %308 = vst.msk [vmem:[#allocation2 + $0x10] sm:$0x3] %vm307_vm1, %v2093_v0 }
  0x25   : > { %314 = vst.msk [vmem:[#allocation2 + $0x40] sm:$0x3] %vm307_vm1, %v2093_v0 }
  0x26   : > { %317 = vst.msk [vmem:[#allocation2 + $0x58] sm:$0x3] %vm307_vm1, %v2093_v0 }
  0x27   : > { %320 = vst.msk [vmem:[#allocation2 + $0x70] sm:$0x3] %vm307_vm1, %v2093_v0 }
  0x28   : > { %323 = vst.msk [vmem:[#allocation2 + $0x88] sm:$0x3] %vm307_vm1, %v2093_v0 }
  0x29   : > { %326 = vst.msk [vmem:[#allocation2 + $0xa0] sm:$0x3] %vm307_vm1, %v2093_v0 }
  0x2a   : > { %329 = vst.msk [vmem:[#allocation2 + $0xb8] sm:$0x3] %vm307_vm1, %v2093_v0 }
  0x2b   : > { %332 = vst.msk [vmem:[#allocation2 + $0xd0] sm:$0x3] %vm307_vm1, %v2093_v0 }
  0x2c   : > { %335 = vst.msk [vmem:[#allocation2 + $0xe8] sm:$0x3] %vm307_vm1, %v2093_v0 }
  0x2d   : > { %355 = vst.msk [vmem:[#allocation2 + $0x19] sm:$0xff] %vm304_vm0, %v338_v1 }
  0x2e   : > { %356 = vst.msk [vmem:[#allocation2 + $0x21] sm:$0xff] %vm304_vm0, %v339_v2 }
  0x2f   : > { %357 = vst.msk [vmem:[#allocation2 + $0x31] sm:$0xff] %vm304_vm0, %v340_v3 }
  0x30   : > { %358 = vst.msk [vmem:[#allocation2 + $0x39] sm:$0xff] %vm304_vm0, %v341_v4 }
  0x31   : > { %359 = vst.msk [vmem:[#allocation2 + $0x49] sm:$0xff] %vm304_vm0, %v342_v5 }
  0x32   : > { %360 = vst.msk [vmem:[#allocation2 + $0x51] sm:$0xff] %vm304_vm0, %v343_v6 }
  0x33   : > { %361 = vst.msk [vmem:[#allocation2 + $0x61] sm:$0xff] %vm304_vm0, %v344_v7 }
  0x34   : > { %362 = vst.msk [vmem:[#allocation2 + $0x69] sm:$0xff] %vm304_vm0, %v345_v8 }
  0x35   : > { %363 = vst.msk [vmem:[#allocation2 + $0x79] sm:$0xff] %vm304_vm0, %v346_v9 }
  0x36   : > { %364 = vst.msk [vmem:[#allocation2 + $0x81] sm:$0xff] %vm304_vm0, %v347_v10 }
  0x37   : > { %365 = vst.msk [vmem:[#allocation2 + $0x91] sm:$0xff] %vm304_vm0, %v348_v11 }
  0x38   : > { %366 = vst.msk [vmem:[#allocation2 + $0x99] sm:$0xff] %vm304_vm0, %v349_v12  ;;  %374 = sbr.rel (%p1885_p8) target bundleno = 64 (0x40), region = 40 }
  0x39   : > { %367 = vst.msk [vmem:[#allocation2 + $0xa9] sm:$0xff] %vm304_vm0, %v350_v13 }
  0x3a   : > { %368 = vst.msk [vmem:[#allocation2 + $0xb1] sm:$0xff] %vm304_vm0, %v351_v14 }
  0x3b   : > { %369 = vst.msk [vmem:[#allocation2 + $0xc1] sm:$0xff] %vm304_vm0, %v352_v15 }
  0x3c   : > { %370 = vst.msk [vmem:[#allocation2 + $0xc9] sm:$0xff] %vm304_vm0, %v353_v16 }
  0x3d   : > { %v378_v17 = vld [vmem:[%s377_s27] sm:$0xff]  ;;  %v379_v18 = vld [vmem:[%s377_s27 + $0x8] sm:$0xff] }
  0x3e   : > { %380 = vst.msk [vmem:[#allocation2 + $0x1] sm:$0xff] %vm304_vm0, %v378_v17 }
  0x3f   : > { %381 = vst.msk [vmem:[#allocation2 + $0x9] sm:$0xff] %vm304_vm0, %v379_v18 }
  0x40 PF: > { %p1888_p9 = scmp.ge.s32.totalorder %s2075_s15, 1 }
  0x42   : > { %385 = sbr.rel (%p1888_p9) target bundleno = 74 (0x4a), region = 44 }
  0x47   : > { %v1891_v19 = vld [vmem:[%s2214_s16 + $0x80] sm:$0xff]  ;;  %v1892_v20 = vld [vmem:[%s2214_s16 + $0x88] sm:$0xff] }
  0x48   : > { %392 = vst.msk [vmem:[#allocation2 + $0xd9] sm:$0xff] %vm304_vm0, %v1891_v19 }
  0x49   : > { %393 = vst.msk [vmem:[#allocation2 + $0xe1] sm:$0xff] %vm304_vm0, %v1892_v20 }
  0x4a PF: > { %v462_v21 = vld [vmem:[#allocation2 + $0x19] sm:$0xff]  ;;  %v460_v22 = vld [vmem:[#allocation2 + $0x1] sm:$0xff]  ;;  %v464_v25 = vld [vmem:[#allocation2 + $0x31] sm:$0xff]  ;;  %s2094_s22 = smov 3   ;;  %s2095_s15 = smov 6   ;;  %vm394_vm2 = vcmask 1043672  }
  0x4b   : > { %v2263_v23 = vpack.c.bf16 %v462_v21, %v462_v21  ;;  %v476_v24 = vpack.c.bf16 %v460_v22, %v460_v22  ;;  %v2268_v26 = vpack.c.bf16 %v464_v25, %v464_v25  ;;  %v463_v27 = vld [vmem:[#allocation2 + $0x21] sm:$0xff]  ;;  %v461_v28 = vld [vmem:[#allocation2 + $0x9] sm:$0xff]  ;;  %v465_v29 = vld [vmem:[#allocation2 + $0x39] sm:$0xff]  ;;  %vm443_vm3 = vcmask 19456   ;;  %s2097_s28 = smov 9   ;;  %s2098_s29 = smov 12  }
  0x4c   : > { %v2272_v30 = vpack.c.bf16 %v463_v27, %v463_v27  ;;  %v477_v31 = vpack.c.bf16 %v461_v28, %v461_v28  ;;  %v2274_v32 = vpack.c.bf16 %v465_v29, %v465_v29  ;;  %v467_v33 = vld [vmem:[#allocation2 + $0x51] sm:$0xff]  ;;  %v466_v34 = vld [vmem:[#allocation2 + $0x49] sm:$0xff]  ;;  %v468_v35 = vld [vmem:[#allocation2 + $0x61] sm:$0xff]  ;;  %v2096_v28 = vmov 0   ;;  %s2099_s5 = smov 15   ;;  %s2100_s6 = smov 18  }
  0x4d   : > { %512 = vrot.lane.b32.xlu1 %v2263_v23, %s2094_s22  ;;  %508 = vrot.lane.b32.xlu0 %v476_v24, %s2094_s22  ;;  %v2281_v36 = vpack.c.bf16 %v467_v33, %v467_v33  ;;  %v2283_v37 = vpack.c.bf16 %v466_v34, %v466_v34  ;;  %v2285_v38 = vpack.c.bf16 %v468_v35, %v468_v35  ;;  %v470_v39 = vld [vmem:[#allocation2 + $0x79] sm:$0xff]  ;;  %v469_v40 = vld [vmem:[#allocation2 + $0x69] sm:$0xff]  ;;  %v471_v41 = vld [vmem:[#allocation2 + $0x81] sm:$0xff]  ;;  %vm556_vm4 = vcmask 44056   ;;  %s2101_s7 = smov 21   ;;  %s2102_s8 = smov 24  }
  0x4e   : > { %516 = vrot.lane.b32.xlu2 %v2268_v26, %s2094_s22  ;;  %v2293_v42 = vpack.c.bf16 %v470_v39, %v470_v39  ;;  %v2295_v43 = vpack.c.bf16 %v469_v40, %v469_v40  ;;  %v2297_v44 = vpack.c.bf16 %v471_v41, %v471_v41  ;;  %v473_v45 = vld [vmem:[#allocation2 + $0x99] sm:$0xff]  ;;  %v472_v46 = vld [vmem:[#allocation2 + $0x91] sm:$0xff]  ;;  %v474_v47 = vld [vmem:[#allocation2 + $0xa9] sm:$0xff]  ;;  %399 = vst.msk [vmem:[#allocation3 + $0x10] sm:$0xf] %vm394_vm2, %v2096_v28  ;;  %vm669_vm5 = vcmask 68656  }
  0x4f   : > { %v2305_v48 = vpack.c.bf16 %v473_v45, %v473_v45  ;;  %v2307_v49 = vpack.c.bf16 %v472_v46, %v472_v46  ;;  %v2309_v50 = vpack.c.bf16 %v474_v47, %v474_v47  ;;  %v573_v51 = vld [vmem:[#allocation2 + $0x2] sm:$0xff]  ;;  %v475_v52 = vld [vmem:[#allocation2 + $0xb1] sm:$0xff]  ;;  %v575_v58 = vld [vmem:[#allocation2 + $0x1a] sm:$0xff]  ;;  %395 = vst.msk [vmem:[#allocation3] sm:$0xf] %vm394_vm2, %v2096_v28  ;;  %vm782_vm6 = vcmask 93256  }
  0x50   : > { %v574_v53 = vld [vmem:[#allocation2 + $0xa] sm:$0xff]  ;;  %v589_v54 = vpack.c.bf16 %v573_v51, %v573_v51  ;;  %v2317_v55 = vpack.c.bf16 %v475_v52, %v475_v52  ;;  %v576_v57 = vld [vmem:[#allocation2 + $0x22] sm:$0xff]  ;;  %v577_v59 = vld [vmem:[#allocation2 + $0x32] sm:$0xff]  ;;  %v2325_v61 = vpack.c.bf16 %v575_v58, %v575_v58  ;;  %396 = vst.msk [vmem:[#allocation3 + $0x4] sm:$0xf] %vm394_vm2, %v2096_v28  ;;  %vm895_vm7 = vcmask 117856  }
  0x51   : > { %v590_v56 = vpack.c.bf16 %v574_v53, %v574_v53  ;;  %v2323_v60 = vpack.c.bf16 %v576_v57, %v576_v57  ;;  %v2327_v62 = vpack.c.bf16 %v577_v59, %v577_v59  ;;  %v579_v63 = vld [vmem:[#allocation2 + $0x4a] sm:$0xff]  ;;  %v578_v0 = vld [vmem:[#allocation2 + $0x3a] sm:$0xff]  ;;  %v580_v1 = vld [vmem:[#allocation2 + $0x52] sm:$0xff]  ;;  %397 = vst.msk [vmem:[#allocation3 + $0x8] sm:$0xf] %vm394_vm2, %v2096_v28  ;;  %vm1008_vm8 = vcmask 142456  }
  0x52   : > { %v2335_v2 = vpack.c.bf16 %v579_v63, %v579_v63  ;;  %v2337_v3 = vpack.c.bf16 %v578_v0, %v578_v0  ;;  %v2339_v4 = vpack.c.bf16 %v580_v1, %v580_v1  ;;  %v582_v5 = vld [vmem:[#allocation2 + $0x6a] sm:$0xff]  ;;  %v581_v6 = vld [vmem:[#allocation2 + $0x62] sm:$0xff]  ;;  %v583_v7 = vld [vmem:[#allocation2 + $0x7a] sm:$0xff]  ;;  %398 = vst.msk [vmem:[#allocation3 + $0xc] sm:$0xf] %vm394_vm2, %v2096_v28  ;;  %vm1122_vm9 = vcmask 167056  }
  0x53   : > { %v2347_v8 = vpack.c.bf16 %v582_v5, %v582_v5  ;;  %v2349_v9 = vpack.c.bf16 %v581_v6, %v581_v6  ;;  %v2351_v10 = vpack.c.bf16 %v583_v7, %v583_v7  ;;  %v585_v11 = vld [vmem:[#allocation2 + $0x92] sm:$0xff]  ;;  %v584_v12 = vld [vmem:[#allocation2 + $0x82] sm:$0xff]  ;;  %v586_v13 = vld [vmem:[#allocation2 + $0x9a] sm:$0xff]  ;;  %400 = vst.msk [vmem:[#allocation3 + $0x14] sm:$0xf] %vm394_vm2, %v2096_v28  ;;  %vm1235_vm10 = vcmask 191656  }
  0x54   : > { %v2359_v14 = vpack.c.bf16 %v585_v11, %v585_v11  ;;  %v2361_v15 = vpack.c.bf16 %v584_v12, %v584_v12  ;;  %v2363_v16 = vpack.c.bf16 %v586_v13, %v586_v13  ;;  %v588_v17 = vld [vmem:[#allocation2 + $0xb2] sm:$0xff]  ;;  %v587_v18 = vld [vmem:[#allocation2 + $0xaa] sm:$0xff]  ;;  %v687_v27 = vld [vmem:[#allocation2 + $0x20] sm:$0xff]  ;;  %401 = vst.msk [vmem:[#allocation3 + $0x18] sm:$0xf] %vm394_vm2, %v2096_v28  ;;  %vm1348_vm11 = vcmask 216256  }
  0x55   : > { %514 = vrot.lane.b32.xlu1 %v2272_v30, %s2094_s22  ;;  %510 = vrot.lane.b32.xlu0 %v477_v31, %s2094_s22  ;;  %v686_v19 = vld [vmem:[#allocation2 + $0x18] sm:$0xff]  ;;  %v2371_v20 = vpack.c.bf16 %v588_v17, %v588_v17  ;;  %v2373_v21 = vpack.c.bf16 %v587_v18, %v587_v18  ;;  %v688_v22 = vld [vmem:[#allocation2 + $0x30] sm:$0xff]  ;;  %v703_v31 = vpack.c.bf16 %v687_v27, %v687_v27  ;;  %v690_v35 = vld [vmem:[#allocation2 + $0x48] sm:$0xff]  ;;  %vm1656_vm12 = vcmask 60416  }
  0x56   : > { %518 = vrot.lane.b32.xlu2 %v2274_v32, %s2094_s22  ;;  %v702_v24 = vpack.c.bf16 %v686_v19, %v686_v19  ;;  %v2379_v25 = vpack.c.bf16 %v688_v22, %v688_v22  ;;  %v689_v29 = vld [vmem:[#allocation2 + $0x38] sm:$0xff]  ;;  %v691_v34 = vld [vmem:[#allocation2 + $0x50] sm:$0xff]  ;;  %402 = vst.msk [vmem:[#allocation3 + $0x1c] sm:$0xf] %vm394_vm2, %v2096_v28  ;;  %v692_v39 = vld [vmem:[#allocation2 + $0x60] sm:$0xff]  ;;  %v2403_v41 = vpack.c.bf16 %v690_v35, %v690_v35  ;;  %vm1546_vm13 = vcmask 64512  }
  0x57   : > { %v2388_v33 = vpack.c.bf16 %v689_v29, %v689_v29  ;;  %403 = vst.msk [vmem:[#allocation3 + $0x20] sm:$0xf] %vm394_vm2, %v2096_v28  ;;  %v2401_v40 = vpack.c.bf16 %v691_v34, %v691_v34  ;;  %v411_v46 = vld [vmem:[#allocation2] sm:$0xff]  ;;  %v2408_v47 = vpack.c.bf16 %v692_v39, %v692_v39  ;;  %v694_v52 = vld [vmem:[#allocation2 + $0x78] sm:$0xff]  ;;  %v693_v53 = vld [vmem:[#allocation2 + $0x68] sm:$0xff]  ;;  %vm1637_vm14 = vcmask 57344  }
  0x58   : > { %448 = vst.msk [vmem:[#allocation3 + $0x10] sm:$0xf] %vm443_vm3, %v2379_v25  ;;  %v427_v51 = vpack.c.bf16 %v411_v46, %v411_v46  ;;  %v2421_v57 = vpack.c.bf16 %v694_v52, %v694_v52  ;;  %v2423_v58 = vpack.c.bf16 %v693_v53, %v693_v53  ;;  %v697_v1 = vld [vmem:[#allocation2 + $0x98] sm:$0xff]  ;;  %v696_v5 = vld [vmem:[#allocation2 + $0x90] sm:$0xff]  ;;  %v698_v6 = vld [vmem:[#allocation2 + $0xa8] sm:$0xff] }
  0x59   : > { %404 = vst.msk [vmem:[#allocation3 + $0x24] sm:$0xf] %vm394_vm2, %v2096_v28  ;;  %v2445_v7 = vpack.c.bf16 %v697_v1, %v697_v1  ;;  %v2447_v11 = vpack.c.bf16 %v696_v5, %v696_v5  ;;  %v2452_v13 = vpack.c.bf16 %v698_v6, %v698_v6  ;;  %v699_v17 = vld [vmem:[#allocation2 + $0xb0] sm:$0xff] }
  0x5a   : > { %405 = vst.msk [vmem:[#allocation3 + $0x28] sm:$0xf] %vm394_vm2, %v2096_v28  ;;  %v2472_v22 = vpack.c.bf16 %v699_v17, %v699_v17 }
  0x5b   : > { %406 = vst.msk [vmem:[#allocation3 + $0x2c] sm:$0xf] %vm394_vm2, %v2096_v28 }
  0x5c   : > { %407 = vst.msk [vmem:[#allocation3 + $0x30] sm:$0xf] %vm394_vm2, %v2096_v28 }
  0x5d   : > { %522 = vrot.lane.b32.xlu1 %v2281_v36, %s2094_s22  ;;  %520 = vrot.lane.b32.xlu0 %v2283_v37, %s2094_s22  ;;  %408 = vst.msk [vmem:[#allocation3 + $0x34] sm:$0xf] %vm394_vm2, %v2096_v28 }
  0x5e   : > { %524 = vrot.lane.b32.xlu2 %v2285_v38, %s2094_s22  ;;  %409 = vst.msk [vmem:[#allocation3 + $0x38] sm:$0xf] %vm394_vm2, %v2096_v28 }
  0x5f   : > { %410 = vst.msk [vmem:[#allocation3 + $0x3c] sm:$0xf] %vm394_vm2, %v2096_v28 }
  0x60   : > { %446 = vst.msk [vmem:[#allocation3 + $0x8] sm:$0xf] %vm443_vm3, %v702_v24 }
  0x61   : > { %444 = vst.msk [vmem:[#allocation3] sm:$0xf] %vm443_vm3, %v427_v51 }
  0x62   : > { %449 = vst.msk [vmem:[#allocation3 + $0x14] sm:$0xf] %vm443_vm3, %v2388_v33 }
  0x63   : > { %447 = vst.msk [vmem:[#allocation3 + $0xc] sm:$0xf] %vm443_vm3, %v703_v31 }
  0x64   : > { %452 = vst.msk [vmem:[#allocation3 + $0x20] sm:$0xf] %vm443_vm3, %v2408_v47 }
  0x65   : > { %528 = vrot.lane.b32.xlu1 %v2293_v42, %s2094_s22  ;;  %526 = vrot.lane.b32.xlu0 %v2295_v43, %s2094_s22  ;;  %451 = vst.msk [vmem:[#allocation3 + $0x1c] sm:$0xf] %vm443_vm3, %v2401_v40 }
  0x66   : > { %530 = vrot.lane.b32.xlu2 %v2297_v44, %s2094_s22  ;;  %450 = vst.msk [vmem:[#allocation3 + $0x18] sm:$0xf] %vm443_vm3, %v2403_v41 }
  0x67   : > { %454 = vst.msk [vmem:[#allocation3 + $0x28] sm:$0xf] %vm443_vm3, %v2421_v57 }
  0x68   : > { %453 = vst.msk [vmem:[#allocation3 + $0x24] sm:$0xf] %vm443_vm3, %v2423_v58 }
  0x69   : > { %458 = vst.msk [vmem:[#allocation3 + $0x38] sm:$0xf] %vm443_vm3, %v2452_v13 }
  0x6a   : > { %457 = vst.msk [vmem:[#allocation3 + $0x34] sm:$0xf] %vm443_vm3, %v2445_v7 }
  0x6b   : > { %456 = vst.msk [vmem:[#allocation3 + $0x30] sm:$0xf] %vm443_vm3, %v2447_v11 }
  0x6c   : > { %459 = vst.msk [vmem:[#allocation3 + $0x3c] sm:$0xf] %vm443_vm3, %v2472_v22 }
  0x6d   : > { %534 = vrot.lane.b32.xlu1 %v2305_v48, %s2094_s22  ;;  %532 = vrot.lane.b32.xlu0 %v2307_v49, %s2094_s22 }
  0x6e   : > { %536 = vrot.lane.b32.xlu2 %v2309_v50, %s2094_s22 }
  0x75   : > { %621 = vrot.lane.b32.xlu1 %v589_v54, %s2095_s15  ;;  %538 = vrot.lane.b32.xlu0 %v2317_v55, %s2094_s22  ;;  %v412_v54 = vld [vmem:[#allocation2 + $0x8] sm:$0xff] }
  0x76   : > { %623 = vrot.lane.b32.xlu2 %v590_v56, %s2095_s15  ;;  %v695_v56 = vld [vmem:[#allocation2 + $0x80] sm:$0xff]  ;;  %v428_v63 = vpack.c.bf16 %v412_v54, %v412_v54 }
  0x77   : > { %v2429_v0 = vpack.c.bf16 %v695_v56, %v695_v56 }
  0x78   : > { %445 = vst.msk [vmem:[#allocation3 + $0x4] sm:$0xf] %vm443_vm3, %v428_v63 }
  0x79   : > { %455 = vst.msk [vmem:[#allocation3 + $0x2c] sm:$0xf] %vm443_vm3, %v2429_v0 }
  0x7d   : > { %627 = vrot.lane.b32.xlu1 %v2323_v60, %s2095_s15  ;;  %625 = vrot.lane.b32.xlu0 %v2325_v61, %s2095_s15 }
  0x7e   : > { %629 = vrot.lane.b32.xlu2 %v2327_v62, %s2095_s15 }
  0x85   : > { %633 = vrot.lane.b32.xlu1 %v2335_v2, %s2095_s15  ;;  %631 = vrot.lane.b32.xlu0 %v2337_v3, %s2095_s15 }
  0x86   : > { %635 = vrot.lane.b32.xlu2 %v2339_v4, %s2095_s15 }
  0x8d   : > { %639 = vrot.lane.b32.xlu1 %v2347_v8, %s2095_s15  ;;  %637 = vrot.lane.b32.xlu0 %v2349_v9, %s2095_s15 }
  0x8e   : > { %641 = vrot.lane.b32.xlu2 %v2351_v10, %s2095_s15 }
  0x95   : > { %645 = vrot.lane.b32.xlu1 %v2359_v14, %s2095_s15  ;;  %643 = vrot.lane.b32.xlu0 %v2361_v15, %s2095_s15 }
  0x96   : > { %647 = vrot.lane.b32.xlu2 %v2363_v16, %s2095_s15 }
  0x9d   : > { %651 = vrot.lane.b32.xlu1 %v2371_v20, %s2095_s15  ;;  %649 = vrot.lane.b32.xlu0 %v2373_v21, %s2095_s15 }
  0x9e   : > { %734 = vrot.lane.b32.xlu2 %v702_v24, %s2097_s28 }
  0xa5   : > { %738 = vrot.lane.b32.xlu1 %v2379_v25, %s2097_s28  ;;  %736 = vrot.lane.b32.xlu0 %v703_v31, %s2097_s28 }
  0xa6   : > { %740 = vrot.lane.b32.xlu2 %v2388_v33, %s2097_s28 }
  0xa8   : > { %v517_v45 = vpop.permute.xlu2 %516 }
  0xa9   : > { %561 = vst.msk [vmem:[#allocation3 + $0x10] sm:$0xf] %vm556_vm4, %v517_v45 }
  0xad   : > { %744 = vrot.lane.b32.xlu1 %v2401_v40, %s2097_s28  ;;  %742 = vrot.lane.b32.xlu0 %v2403_v41, %s2097_s28 }
  0xae   : > { %746 = vrot.lane.b32.xlu2 %v2408_v47, %s2097_s28 }
  0xb0   : > { %v519_v59 = vpop.permute.xlu2 %518 }
  0xb1   : > { %562 = vst.msk [vmem:[#allocation3 + $0x14] sm:$0xf] %vm556_vm4, %v519_v59 }
  0xb5   : > { %750 = vrot.lane.b32.xlu1 %v2421_v57, %s2097_s28  ;;  %748 = vrot.lane.b32.xlu0 %v2423_v58, %s2097_s28 }
  0xb6   : > { %752 = vrot.lane.b32.xlu2 %v2429_v0, %s2097_s28 }
  0xb8   : > { %v525_v12 = vpop.permute.xlu2 %524 }
  0xb9   : > { %565 = vst.msk [vmem:[#allocation3 + $0x20] sm:$0xf] %vm556_vm4, %v525_v12 }
  0xbd   : > { %756 = vrot.lane.b32.xlu1 %v2445_v7, %s2097_s28  ;;  %754 = vrot.lane.b32.xlu0 %v2447_v11, %s2097_s28 }
  0xbe   : > { %758 = vrot.lane.b32.xlu2 %v2452_v13, %s2097_s28 }
  0xbf   : > { %v513_v18 = vpop.permute.xlu1 %512  ;;  %v509_v19 = vpop.permute.xlu0 %508 }
  0xc0   : > { %559 = vst.msk [vmem:[#allocation3 + $0x8] sm:$0xf] %vm556_vm4, %v513_v18  ;;  %v531_v24 = vpop.permute.xlu2 %530 }
  0xc1   : > { %557 = vst.msk [vmem:[#allocation3] sm:$0xf] %vm556_vm4, %v509_v19  ;;  %v1038_v19 = vld [vmem:[#allocation2 + $0xc0] sm:$0xff] }
  0xc2   : > { %568 = vst.msk [vmem:[#allocation3 + $0x2c] sm:$0xf] %vm556_vm4, %v531_v24 }
  0xc5   : > { %847 = vrot.lane.b32.xlu1 %v2263_v23, %s2098_s29  ;;  %760 = vrot.lane.b32.xlu0 %v2472_v22, %s2097_s28 }
  0xc6   : > { %849 = vrot.lane.b32.xlu2 %v2272_v30, %s2098_s29 }
  0xc7   : > { %v515_v27 = vpop.permute.xlu1 %514  ;;  %v511_v28 = vpop.permute.xlu0 %510 }
  0xc8   : > { %560 = vst.msk [vmem:[#allocation3 + $0xc] sm:$0xf] %vm556_vm4, %v515_v27  ;;  %v537_v29 = vpop.permute.xlu2 %536 }
  0xc9   : > { %558 = vst.msk [vmem:[#allocation3 + $0x4] sm:$0xf] %vm556_vm4, %v511_v28  ;;  %v1039_v28 = vld [vmem:[#allocation2 + $0xc8] sm:$0xff] }
  0xca   : > { %571 = vst.msk [vmem:[#allocation3 + $0x38] sm:$0xf] %vm556_vm4, %v537_v29  ;;  %v1971_v29 = vld [vmem:[%s2896_s1 + $0x8] sm:$0xff] }
  0xcd   : > { %962 = vrot.lane.b32.xlu1 %v2323_v60, %s2099_s5  ;;  %960 = vrot.lane.b32.xlu0 %v2325_v61, %s2099_s5 }
  0xce   : > { %1074 = vrot.lane.b32.xlu2 %v2379_v25, %s2100_s6 }
  0xcf   : > { %v523_v23 = vpop.permute.xlu1 %522  ;;  %v521_v31 = vpop.permute.xlu0 %520 }
  0xd0   : > { %564 = vst.msk [vmem:[#allocation3 + $0x1c] sm:$0xf] %vm556_vm4, %v523_v23  ;;  %v624_v30 = vpop.permute.xlu2 %623  ;;  %v2624_v23 = vpack.c.bf16 %v1039_v28, %v1039_v28 }
  0xd1   : > { %563 = vst.msk [vmem:[#allocation3 + $0x18] sm:$0xf] %vm556_vm4, %v521_v31 }
  0xd2   : > { %671 = vst.msk [vmem:[#allocation3 + $0x4] sm:$0xf] %vm669_vm5, %v624_v30 }
  0xd5   : > { %1187 = vrot.lane.b32.xlu1 %v2268_v26, %s2101_s7  ;;  %1076 = vrot.lane.b32.xlu0 %v2388_v33, %s2100_s6 }
  0xd6   : > { %1189 = vrot.lane.b32.xlu2 %v2274_v32, %s2101_s7 }
  0xd7   : > { %v529_v60 = vpop.permute.xlu1 %528  ;;  %v527_v61 = vpop.permute.xlu0 %526 }
  0xd8   : > { %567 = vst.msk [vmem:[#allocation3 + $0x28] sm:$0xf] %vm556_vm4, %v529_v60  ;;  %v630_v25 = vpop.permute.xlu2 %629  ;;  %v1151_v60 = vld [vmem:[#allocation2 + $0xc1] sm:$0xff] }
  0xd9   : > { %566 = vst.msk [vmem:[#allocation3 + $0x24] sm:$0xf] %vm556_vm4, %v527_v61 }
  0xda   : > { %674 = vst.msk [vmem:[#allocation3 + $0x10] sm:$0xf] %vm669_vm5, %v630_v25  ;;  %v1264_v25 = vld [vmem:[#allocation2 + $0xc2] sm:$0xff] }
  0xdd   : > { %1302 = vrot.lane.b32.xlu1 %v2337_v3, %s2102_s8  ;;  %1300 = vrot.lane.b32.xlu0 %v2327_v62, %s2102_s8 }
  0xde   : > { %855 = vrot.lane.b32.xlu2 %v2283_v37, %s2098_s29 }
  0xdf   : > { %v535_v33 = vpop.permute.xlu1 %534  ;;  %v533_v34 = vpop.permute.xlu0 %532 }
  0xe0   : > { %570 = vst.msk [vmem:[#allocation3 + $0x34] sm:$0xf] %vm556_vm4, %v535_v33  ;;  %v636_v35 = vpop.permute.xlu2 %635  ;;  %v1152_v33 = vld [vmem:[#allocation2 + $0xc9] sm:$0xff] }
  0xe1   : > { %569 = vst.msk [vmem:[#allocation3 + $0x30] sm:$0xf] %vm556_vm4, %v533_v34 }
  0xe2   : > { %677 = vst.msk [vmem:[#allocation3 + $0x1c] sm:$0xf] %vm669_vm5, %v636_v35 }
  0xe5   : > { %968 = vrot.lane.b32.xlu1 %v2335_v2, %s2099_s5  ;;  %857 = vrot.lane.b32.xlu0 %v2281_v36, %s2098_s29 }
  0xe6   : > { %970 = vrot.lane.b32.xlu2 %v2339_v4, %s2099_s5 }
  0xe7   : > { %v622_v39 = vpop.permute.xlu1 %621  ;;  %v539_v45 = vpop.permute.xlu0 %538 }
  0xe8   : > { %670 = vst.msk [vmem:[#allocation3] sm:$0xf] %vm669_vm5, %v622_v39  ;;  %v642_v46 = vpop.permute.xlu2 %641  ;;  %v1265_v39 = vld [vmem:[#allocation2 + $0xca] sm:$0xff] }
  0xe9   : > { %572 = vst.msk [vmem:[#allocation3 + $0x3c] sm:$0xf] %vm556_vm4, %v539_v45  ;;  %v2648_v45 = vpack.c.bf16 %v1264_v25, %v1264_v25 }
  0xea   : > { %680 = vst.msk [vmem:[#allocation3 + $0x28] sm:$0xf] %vm669_vm5, %v642_v46 }
  0xed   : > { %865 = vrot.lane.b32.xlu1 %v2297_v44, %s2098_s29  ;;  %863 = vrot.lane.b32.xlu0 %v2293_v42, %s2098_s29 }
  0xee   : > { %1082 = vrot.lane.b32.xlu2 %v2408_v47, %s2100_s6 }
  0xef   : > { %v628_v51 = vpop.permute.xlu1 %627  ;;  %v626_v52 = vpop.permute.xlu0 %625 }
  0xf0   : > { %673 = vst.msk [vmem:[#allocation3 + $0xc] sm:$0xf] %vm669_vm5, %v628_v51  ;;  %v648_v53 = vpop.permute.xlu2 %647 }
  0xf1   : > { %672 = vst.msk [vmem:[#allocation3 + $0x8] sm:$0xf] %vm669_vm5, %v626_v52 }
  0xf2   : > { %683 = vst.msk [vmem:[#allocation3 + $0x34] sm:$0xf] %vm669_vm5, %v648_v53 }
  0xf5   : > { %976 = vrot.lane.b32.xlu1 %v2351_v10, %s2099_s5  ;;  %1084 = vrot.lane.b32.xlu0 %v2423_v58, %s2100_s6 }
  0xf6   : > { %978 = vrot.lane.b32.xlu2 %v2361_v15, %s2099_s5 }
  0xf7   : > { %v634_v44 = vpop.permute.xlu1 %633  ;;  %v632_v42 = vpop.permute.xlu0 %631 }
  0xf8   : > { %676 = vst.msk [vmem:[#allocation3 + $0x18] sm:$0xf] %vm669_vm5, %v634_v44  ;;  %v735_v47 = vpop.permute.xlu2 %734 }
  0xf9   : > { %675 = vst.msk [vmem:[#allocation3 + $0x14] sm:$0xf] %vm669_vm5, %v632_v42 }
  0xfa   : > { %783 = vst.msk [vmem:[#allocation3] sm:$0xf] %vm782_vm6, %v735_v47 }
  0xfd   : > { %1197 = vrot.lane.b32.xlu1 %v2295_v43, %s2101_s7  ;;  %1195 = vrot.lane.b32.xlu0 %v2285_v38, %s2101_s7 }
  0xfe   : > { %1090 = vrot.lane.b32.xlu2 %v2447_v11, %s2100_s6  ;;  %v1977_v11 = vld [vmem:[%s2896_s1 + $0x38] sm:$0xff] }
  0xff   : > { %v640_v10 = vpop.permute.xlu1 %639  ;;  %v638_v54 = vpop.permute.xlu0 %637  ;;  %1497 = vmatpush.bf16.msra.mxu0 %v1977_v11  ;;  %1978 = vmatpush.bf16.msra.mxu1 %v1977_v11 }
 0x100   : > { %679 = vst.msk [vmem:[#allocation3 + $0x24] sm:$0xf] %vm669_vm5, %v640_v10  ;;  %v741_v56 = vpop.permute.xlu2 %740  ;;  %1979 = vmatpush.bf16.msra.mxu2 %v1977_v11  ;;  %1980 = vmatpush.bf16.msra.mxu3 %v1977_v11  ;;  %v810_v10 = vld [vmem:[#allocation2 + $0x99] sm:$0xff] }
 0x101   : > { %678 = vst.msk [vmem:[#allocation3 + $0x20] sm:$0xf] %vm669_vm5, %v638_v54  ;;  %v826_v54 = vpack.c.bf16 %v810_v10, %v810_v10 }
 0x102   : > { %786 = vst.msk [vmem:[#allocation3 + $0xc] sm:$0xf] %vm782_vm6, %v741_v56 }
 0x105   : > { %1308 = vrot.lane.b32.xlu1 %v2349_v9, %s2102_s8  ;;  %1092 = vrot.lane.b32.xlu0 %v2445_v7, %s2100_s6 }
 0x106   : > { %1310 = vrot.lane.b32.xlu2 %v2347_v8, %s2102_s8 }
 0x107   : > { %v646_v58 = vpop.permute.xlu1 %645  ;;  %v644_v59 = vpop.permute.xlu0 %643 }
 0x108   : > { %682 = vst.msk [vmem:[#allocation3 + $0x30] sm:$0xf] %vm669_vm5, %v646_v58  ;;  %v747_v63 = vpop.permute.xlu2 %746  ;;  %v922_v58 = vld [vmem:[#allocation2 + $0x92] sm:$0xff] }
 0x109   : > { %681 = vst.msk [vmem:[#allocation3 + $0x2c] sm:$0xf] %vm669_vm5, %v644_v59 }
 0x10a   : > { %789 = vst.msk [vmem:[#allocation3 + $0x18] sm:$0xf] %vm782_vm6, %v747_v63 }
 0x10d   : > { %1205 = vrot.lane.b32.xlu1 %v2305_v48, %s2101_s7  ;;  %1203 = vrot.lane.b32.xlu0 %v2307_v49, %s2101_s7 }
 0x10e   : > { %1316 = vrot.lane.b32.xlu2 %v2359_v14, %s2102_s8 }
 0x10f   : > { %v652_v1 = vpop.permute.xlu1 %651  ;;  %v650_v5 = vpop.permute.xlu0 %649 }
 0x110   : > { %685 = vst.msk [vmem:[#allocation3 + $0x3c] sm:$0xf] %vm669_vm5, %v652_v1  ;;  %v753_v6 = vpop.permute.xlu2 %752 }
 0x111   : > { %684 = vst.msk [vmem:[#allocation3 + $0x38] sm:$0xf] %vm669_vm5, %v650_v5 }
 0x112   : > { %792 = vst.msk [vmem:[#allocation3 + $0x24] sm:$0xf] %vm782_vm6, %v753_v6  ;;  %v1146_v6 = vld [vmem:[#allocation2 + $0x81] sm:$0xff] }
 0x115   : > { %851 = vrot.lane.b32.xlu1 %v2268_v26, %s2098_s29  ;;  %1318 = vrot.lane.b32.xlu0 %v2363_v16, %s2102_s8  ;;  %v1976_v26 = vld [vmem:[%s2896_s1 + $0x30] sm:$0xff] }
 0x116   : > { %853 = vrot.lane.b32.xlu2 %v2274_v32, %s2098_s29  ;;  %1498 = vmatpush.bf16.msra.mxu0 %v1976_v26 }
 0x117   : > { %v739_v48 = vpop.permute.xlu1 %738  ;;  %v737_v7 = vpop.permute.xlu0 %736  ;;  %1981 = vmatpush.bf16.msra.mxu1 %v1976_v26  ;;  %1982 = vmatpush.bf16.msra.mxu2 %v1976_v26 }
 0x118   : > { %785 = vst.msk [vmem:[#allocation3 + $0x8] sm:$0xf] %vm782_vm6, %v739_v48  ;;  %v759_v14 = vpop.permute.xlu2 %758  ;;  %1983 = vmatpush.bf16.msra.mxu3 %v1976_v26  ;;  %v1162_v48 = vpack.c.bf16 %v1146_v6, %v1146_v6 }
 0x119   : > { %784 = vst.msk [vmem:[#allocation3 + $0x4] sm:$0xf] %vm782_vm6, %v737_v7 }
 0x11a   : > { %795 = vst.msk [vmem:[#allocation3 + $0x30] sm:$0xf] %vm782_vm6, %v759_v14  ;;  %v1258_v14 = vld [vmem:[#allocation2 + $0x7a] sm:$0xff] }
 0x11b   : > { %v1274_v11 = vpack.c.bf16 %v1258_v14, %v1258_v14 }
 0x11d   : > { %966 = vrot.lane.b32.xlu1 %v2337_v3, %s2099_s5  ;;  %964 = vrot.lane.b32.xlu0 %v2327_v62, %s2099_s5  ;;  %v1975_v62 = vld [vmem:[%s2896_s1 + $0x28] sm:$0xff] }
 0x11e   : > { %871 = vrot.lane.b32.xlu2 %v2309_v50, %s2098_s29  ;;  %1499 = vmatpush.bf16.msra.mxu0 %v1975_v62  ;;  %v1974_v50 = vld [vmem:[%s2896_s1 + $0x20] sm:$0xff] }
 0x11f   : > { %v745_v32 = vpop.permute.xlu1 %744  ;;  %v743_v12 = vpop.permute.xlu0 %742  ;;  %1984 = vmatpush.bf16.msra.mxu1 %v1975_v62  ;;  %1985 = vmatpush.bf16.msra.mxu2 %v1975_v62 }
 0x120   : > { %788 = vst.msk [vmem:[#allocation3 + $0x14] sm:$0xf] %vm782_vm6, %v745_v32  ;;  %v850_v3 = vpop.permute.xlu2 %849  ;;  %1986 = vmatpush.bf16.msra.mxu3 %v1975_v62  ;;  %v1150_v62 = vld [vmem:[#allocation2 + $0xb1] sm:$0xff] }
 0x121   : > { %787 = vst.msk [vmem:[#allocation3 + $0x10] sm:$0xf] %vm782_vm6, %v743_v12 }
 0x122   : > { %897 = vst.msk [vmem:[#allocation3 + $0x4] sm:$0xf] %vm895_vm7, %v850_v3  ;;  %1500 = vmatpush.bf16.msra.mxu0 %v1974_v50 }
 0x123   : > { %1987 = vmatpush.bf16.msra.mxu1 %v1974_v50  ;;  %1988 = vmatpush.bf16.msra.mxu2 %v1974_v50 }
 0x124   : > { %1989 = vmatpush.bf16.msra.mxu3 %v1974_v50  ;;  %v1262_v50 = vld [vmem:[#allocation2 + $0xaa] sm:$0xff] }
 0x125   : > { %1078 = vrot.lane.b32.xlu1 %v2403_v41, %s2100_s6  ;;  %873 = vrot.lane.b32.xlu0 %v2317_v55, %s2098_s29  ;;  %v1973_v55 = vld [vmem:[%s2896_s1 + $0x18] sm:$0xff] }
 0x126   : > { %1080 = vrot.lane.b32.xlu2 %v2401_v40, %s2100_s6  ;;  %1501 = vmatpush.bf16.msra.mxu0 %v1973_v55  ;;  %v1972_v40 = vld [vmem:[%s2896_s1 + $0x10] sm:$0xff] }
 0x127   : > { %v751_v17 = vpop.permute.xlu1 %750  ;;  %v749_v18 = vpop.permute.xlu0 %748  ;;  %1990 = vmatpush.bf16.msra.mxu1 %v1973_v55  ;;  %1991 = vmatpush.bf16.msra.mxu2 %v1973_v55 }
 0x128   : > { %791 = vst.msk [vmem:[#allocation3 + $0x20] sm:$0xf] %vm782_vm6, %v751_v17  ;;  %v1075_v41 = vpop.permute.xlu2 %1074  ;;  %1992 = vmatpush.bf16.msra.mxu3 %v1973_v55  ;;  %v1278_v55 = vpack.c.bf16 %v1262_v50, %v1262_v50 }
 0x129   : > { %790 = vst.msk [vmem:[#allocation3 + $0x1c] sm:$0xf] %vm782_vm6, %v749_v18 }
 0x12a   : > { %1502 = vmatpush.bf16.msra.mxu0 %v1972_v40 }
 0x12b   : > { %1993 = vmatpush.bf16.msra.mxu1 %v1972_v40  ;;  %1994 = vmatpush.bf16.msra.mxu2 %v1972_v40 }
 0x12c   : > { %1995 = vmatpush.bf16.msra.mxu3 %v1972_v40 }
 0x12d   : > { %986 = vrot.lane.b32.xlu1 %v2371_v20, %s2099_s5  ;;  %984 = vrot.lane.b32.xlu0 %v2373_v21, %s2099_s5  ;;  %v2619_v20 = vpack.c.bf16 %v1038_v19, %v1038_v19 }
 0x12e   : > { %1191 = vrot.lane.b32.xlu2 %v2283_v37, %s2101_s7  ;;  %1503 = vmatpush.bf16.msra.mxu0 %v1971_v29  ;;  %v1970_v37 = vld [vmem:[%s2896_s1] sm:$0xff] }
 0x12f   : > { %v757_v24 = vpop.permute.xlu1 %756  ;;  %v755_v27 = vpop.permute.xlu0 %754  ;;  %1996 = vmatpush.bf16.msra.mxu1 %v1971_v29  ;;  %1997 = vmatpush.bf16.msra.mxu2 %v1971_v29 }
 0x130   : > { %794 = vst.msk [vmem:[#allocation3 + $0x2c] sm:$0xf] %vm782_vm6, %v757_v24  ;;  %v1190_v21 = vpop.permute.xlu2 %1189  ;;  %1998 = vmatpush.bf16.msra.mxu3 %v1971_v29  ;;  %v1040_v29 = vld [vmem:[#allocation2 + $0xd8] sm:$0xff] }
 0x131   : > { %793 = vst.msk [vmem:[#allocation3 + $0x28] sm:$0xf] %vm782_vm6, %v755_v27 }
 0x132   : > { %1504 = vmatpush.bf16.msra.mxu0 %v1970_v37 }
 0x133   : > { %1999 = vmatpush.bf16.msra.mxu1 %v1970_v37  ;;  %2000 = vmatpush.bf16.msra.mxu2 %v1970_v37 }
 0x134   : > { %2001 = vmatpush.bf16.msra.mxu3 %v1970_v37  ;;  %v1056_v37 = vpack.c.bf16 %v1040_v29, %v1040_v29 }
 0x135   : > { %1098 = vrot.lane.b32.xlu1 %v2619_v20, %s2100_s6  ;;  %1193 = vrot.lane.b32.xlu0 %v2281_v36, %s2101_s7  ;;  %v2638_v36 = vpack.c.bf16 %v1151_v60, %v1151_v60 }
 0x136   : > { %1100 = vrot.lane.b32.xlu2 %v2624_v23, %s2100_s6 }
 0x137   : > { %v848_v31 = vpop.permute.xlu1 %847  ;;  %v761_v30 = vpop.permute.xlu0 %760 }
 0x138   : > { %896 = vst.msk [vmem:[#allocation3] sm:$0xf] %vm895_vm7, %v848_v31  ;;  %v856_v61 = vpop.permute.xlu2 %855  ;;  %v1153_v31 = vld [vmem:[#allocation2 + $0xd9] sm:$0xff] }
 0x139   : > { %796 = vst.msk [vmem:[#allocation3 + $0x34] sm:$0xf] %vm782_vm6, %v761_v30 }
 0x13a   : > { %900 = vst.msk [vmem:[#allocation3 + $0x10] sm:$0xf] %vm895_vm7, %v856_v61 }
 0x13d   : > { %1306 = vrot.lane.b32.xlu1 %v2339_v4, %s2102_s8  ;;  %1304 = vrot.lane.b32.xlu0 %v2335_v2, %s2102_s8  ;;  %v2650_v4 = vpack.c.bf16 %v1152_v33, %v1152_v33  ;;  %v2653_v2 = vpack.c.bf16 %v1265_v39, %v1265_v39  ;;  %v1267_v39 = vld [vmem:[#allocation2 + $0xe2] sm:$0xff] }
 0x13e   : > { %1211 = vrot.lane.b32.xlu2 %v2638_v36, %s2101_s7 }
 0x13f   : > { %v963_v34 = vpop.permute.xlu1 %962  ;;  %v961_v35 = vpop.permute.xlu0 %960 }
 0x140   : > { %1010 = vst.msk [vmem:[#allocation3 + $0x4] sm:$0xf] %vm1008_vm8, %v963_v34  ;;  %v971_v46 = vpop.permute.xlu2 %970  ;;  %v1154_v34 = vld [vmem:[#allocation2 + $0xe1] sm:$0xff] }
 0x141   : > { %1009 = vst.msk [vmem:[#allocation3] sm:$0xf] %vm1008_vm8, %v961_v35  ;;  %v1170_v35 = vpack.c.bf16 %v1154_v34, %v1154_v34 }
 0x142   : > { %1123 = vst.msk [vmem:[#allocation3] sm:$0xf] %vm1122_vm9, %v1075_v41 }
 0x145   : > { %1324 = vrot.lane.b32.xlu1 %v2648_v45, %s2102_s8  ;;  %1213 = vrot.lane.b32.xlu0 %v2650_v4, %s2101_s7 }
 0x146   : > { %1326 = vrot.lane.b32.xlu2 %v2653_v2, %s2102_s8 }
 0x147   : > { %v1188_v51 = vpop.permute.xlu1 %1187  ;;  %v1077_v52 = vpop.permute.xlu0 %1076 }
 0x148   : > { %1236 = vst.msk [vmem:[#allocation3] sm:$0xf] %vm1235_vm10, %v1188_v51  ;;  %v1083_v53 = vpop.permute.xlu2 %1082 }
 0x149   : > { %1124 = vst.msk [vmem:[#allocation3 + $0x4] sm:$0xf] %vm1122_vm9, %v1077_v52 }
 0x14a   : > { %1237 = vst.msk [vmem:[#allocation3 + $0x4] sm:$0xf] %vm1235_vm10, %v1190_v21 }
 0x14d   : > { %861 = vrot.lane.b32.xlu1 %v2295_v43, %s2098_s29  ;;  %859 = vrot.lane.b32.xlu0 %v2285_v38, %s2098_s29 }
 0x14e   : > { %972 = vrot.lane.b32.xlu2 %v2349_v9, %s2099_s5 }
 0x14f   : > { %v1303_v44 = vpop.permute.xlu1 %1302  ;;  %v1301_v42 = vpop.permute.xlu0 %1300 }
 0x150   : > { %1350 = vst.msk [vmem:[#allocation3 + $0x4] sm:$0xf] %vm1348_vm11, %v1303_v44  ;;  %v979_v47 = vpop.permute.xlu2 %978 }
 0x151   : > { %1349 = vst.msk [vmem:[#allocation3] sm:$0xf] %vm1348_vm11, %v1301_v42 }
 0x155   : > { %867 = vrot.lane.b32.xlu1 %v2307_v49, %s2098_s29  ;;  %974 = vrot.lane.b32.xlu0 %v2347_v8, %s2099_s5  ;;  %v938_v49 = vpack.c.bf16 %v922_v58, %v922_v58  ;;  %v1145_v8 = vld [vmem:[#allocation2 + $0x79] sm:$0xff] }
 0x156   : > { %869 = vrot.lane.b32.xlu2 %v826_v54, %s2098_s29  ;;  %v1161_v1 = vpack.c.bf16 %v1145_v8, %v1145_v8 }
 0x157   : > { %v969_v38 = vpop.permute.xlu1 %968  ;;  %v858_v43 = vpop.permute.xlu0 %857 }
 0x158   : > { %1013 = vst.msk [vmem:[#allocation3 + $0x10] sm:$0xf] %vm1008_vm8, %v969_v38  ;;  %v1962_v9 = vld [vmem:[#allocation3] sm:$0xff]  ;;  %v1091_v56 = vpop.permute.xlu2 %1090 }
 0x159   : > { %901 = vst.msk [vmem:[#allocation3 + $0x14] sm:$0xf] %vm895_vm7, %v858_v43  ;;  %1505 = vmatmul.bf16.vlgmr.msra.gmra.mxu0 %v1962_v9 }
 0x15a   : > { %1014 = vst.msk [vmem:[#allocation3 + $0x14] sm:$0xf] %vm1008_vm8, %v971_v46 }
 0x15b   : > { %1127 = vst.msk [vmem:[#allocation3 + $0x10] sm:$0xf] %vm1122_vm9, %v1083_v53 }
 0x15d   : > { %1088 = vrot.lane.b32.xlu1 %v2429_v0, %s2100_s6  ;;  %1086 = vrot.lane.b32.xlu0 %v2421_v57, %s2100_s6 }
 0x15e   : > { %980 = vrot.lane.b32.xlu2 %v938_v49, %s2099_s5 }
 0x15f   : > { %v866_v59 = vpop.permute.xlu1 %865  ;;  %v864_v63 = vpop.permute.xlu0 %863 }
 0x160   : > { %905 = vst.msk [vmem:[#allocation3 + $0x24] sm:$0xf] %vm895_vm7, %v866_v59  ;;  %v1311_v5 = vpop.permute.xlu2 %1310 }
 0x161   : > { %904 = vst.msk [vmem:[#allocation3 + $0x20] sm:$0xf] %vm895_vm7, %v864_v63 }
 0x162   : > { %1018 = vst.msk [vmem:[#allocation3 + $0x24] sm:$0xf] %vm1008_vm8, %v979_v47 }
 0x165   : > { %1199 = vrot.lane.b32.xlu1 %v1161_v1, %s2101_s7  ;;  %982 = vrot.lane.b32.xlu0 %v2363_v16, %s2099_s5  ;;  %v1149_v16 = vld [vmem:[#allocation2 + $0xa9] sm:$0xff] }
 0x166   : > { %1201 = vrot.lane.b32.xlu2 %v1162_v48, %s2101_s7  ;;  %v1165_v12 = vpack.c.bf16 %v1149_v16, %v1149_v16 }
 0x167   : > { %v977_v57 = vpop.permute.xlu1 %976  ;;  %v1085_v0 = vpop.permute.xlu0 %1084 }
 0x168   : > { %1017 = vst.msk [vmem:[#allocation3 + $0x20] sm:$0xf] %vm1008_vm8, %v977_v57  ;;  %v1317_v7 = vpop.permute.xlu2 %1316 }
 0x169   : > { %1128 = vst.msk [vmem:[#allocation3 + $0x14] sm:$0xf] %vm1122_vm9, %v1085_v0 }
 0x16a   : > { %1131 = vst.msk [vmem:[#allocation3 + $0x20] sm:$0xf] %vm1122_vm9, %v1091_v56 }
 0x16d   : > { %1096 = vrot.lane.b32.xlu1 %v2472_v22, %s2100_s6  ;;  %1094 = vrot.lane.b32.xlu0 %v2452_v13, %s2100_s6  ;;  %v1166_v22 = vpack.c.bf16 %v1150_v62, %v1150_v62  ;;  %v1263_v13 = vld [vmem:[#allocation2 + $0xb2] sm:$0xff] }
 0x16e   : > { %1312 = vrot.lane.b32.xlu2 %v1274_v11, %s2102_s8  ;;  %v1279_v41 = vpack.c.bf16 %v1263_v13, %v1263_v13  ;;  %v2767_v11 = vld [vmem:[%s2897_s2] ss:$0 sm:$0xff] }
 0x16f   : > { %v1198_v26 = vpop.permute.xlu1 %1197  ;;  %v1196_v32 = vpop.permute.xlu0 %1195 }
 0x170   : > { %1241 = vst.msk [vmem:[#allocation3 + $0x14] sm:$0xf] %vm1235_vm10, %v1198_v26  ;;  %v854_v3 = vpop.permute.xlu2 %853 }
 0x171   : > { %1240 = vst.msk [vmem:[#allocation3 + $0x10] sm:$0xf] %vm1235_vm10, %v1196_v32 }
 0x172   : > { %1354 = vst.msk [vmem:[#allocation3 + $0x14] sm:$0xf] %vm1348_vm11, %v1311_v5 }
 0x173   : > { %899 = vst.msk [vmem:[#allocation3 + $0xc] sm:$0xf] %vm895_vm7, %v854_v3 }
 0x175   : > { %1207 = vrot.lane.b32.xlu1 %v1165_v12, %s2101_s7  ;;  %1314 = vrot.lane.b32.xlu0 %v2361_v15, %s2102_s8 }
 0x176   : > { %1209 = vrot.lane.b32.xlu2 %v1166_v22, %s2101_s7 }
 0x177   : > { %v1309_v17 = vpop.permute.xlu1 %1308  ;;  %v1093_v18 = vpop.permute.xlu0 %1092 }
 0x178   : > { %1353 = vst.msk [vmem:[#allocation3 + $0x10] sm:$0xf] %vm1348_vm11, %v1309_v17  ;;  %v872_v40 = vpop.permute.xlu2 %871 }
 0x179   : > { %1132 = vst.msk [vmem:[#allocation3 + $0x24] sm:$0xf] %vm1122_vm9, %v1093_v18 }
 0x17a   : > { %908 = vst.msk [vmem:[#allocation3 + $0x30] sm:$0xf] %vm895_vm7, %v872_v40 }
 0x17d   : > { %1322 = vrot.lane.b32.xlu1 %v1279_v41, %s2102_s8  ;;  %1320 = vrot.lane.b32.xlu0 %v1278_v55, %s2102_s8 }
 0x17e   : > { %762 = vrot.lane.b32.xlu2 %v2619_v20, %s2097_s28 }
 0x17f   : > { %v1206_v15 = vpop.permute.xlu1 %1205  ;;  %v1204_v19 = vpop.permute.xlu0 %1203  ;;  %v1964_v24 = vld [vmem:[#allocation3 + $0x10] sm:$0xff] }
 0x180   : > { %1245 = vst.msk [vmem:[#allocation3 + $0x24] sm:$0xf] %vm1235_vm10, %v1206_v15  ;;  %1515 = vmatmul.bf16.vlgmr.msra.gmra.mxu1 %v1964_v24  ;;  %v1081_v27 = vpop.permute.xlu2 %1080 }
 0x181   : > { %1244 = vst.msk [vmem:[#allocation3 + $0x20] sm:$0xf] %vm1235_vm10, %v1204_v19 }
 0x182   : > { %1357 = vst.msk [vmem:[#allocation3 + $0x20] sm:$0xf] %vm1348_vm11, %v1317_v7 }
 0x185   : > { %875 = vrot.lane.b32.xlu1 %v2638_v36, %s2098_s29  ;;  %764 = vrot.lane.b32.xlu0 %v2624_v23, %s2097_s28  ;;  %v1041_v23 = vld [vmem:[#allocation2 + $0xe0] sm:$0xff]  ;;  %v1169_v36 = vpack.c.bf16 %v1153_v31, %v1153_v31 }
 0x186   : > { %877 = vrot.lane.b32.xlu2 %v2650_v4, %s2098_s29  ;;  %v1057_v25 = vpack.c.bf16 %v1041_v23, %v1041_v23 }
 0x187   : > { %v852_v28 = vpop.permute.xlu1 %851  ;;  %v1319_v21 = vpop.permute.xlu0 %1318 }
 0x188   : > { %898 = vst.msk [vmem:[#allocation3 + $0x8] sm:$0xf] %vm895_vm7, %v852_v28  ;;  %v1192_v20 = vpop.permute.xlu2 %1191 }
 0x189   : > { %1358 = vst.msk [vmem:[#allocation3 + $0x24] sm:$0xf] %vm1348_vm11, %v1319_v21 }
 0x18d   : > { %990 = vrot.lane.b32.xlu1 %v2653_v2, %s2099_s5  ;;  %988 = vrot.lane.b32.xlu0 %v2648_v45, %s2099_s5  ;;  %v1266_v45 = vld [vmem:[#allocation2 + $0xda] sm:$0xff]  ;;  %v1283_v2 = vpack.c.bf16 %v1267_v39, %v1267_v39 }
 0x18e   : > { %1102 = vrot.lane.b32.xlu2 %v1056_v37, %s2100_s6  ;;  %v1282_v51 = vpack.c.bf16 %v1266_v45, %v1266_v45 }
 0x18f   : > { %v967_v30 = vpop.permute.xlu1 %966  ;;  %v965_v60 = vpop.permute.xlu0 %964 }
 0x190   : > { %1012 = vst.msk [vmem:[#allocation3 + $0xc] sm:$0xf] %vm1008_vm8, %v967_v30  ;;  %v1966_v61 = vld [vmem:[#allocation3 + $0x20] sm:$0xff]  ;;  %v1101_v33 = vpop.permute.xlu2 %1100 }
 0x191   : > { %1011 = vst.msk [vmem:[#allocation3 + $0x8] sm:$0xf] %vm1008_vm8, %v965_v60  ;;  %1525 = vmatmul.bf16.vlgmr.msra.gmra.mxu2 %v1966_v61 }
 0x192   : > { %1126 = vst.msk [vmem:[#allocation3 + $0xc] sm:$0xf] %vm1122_vm9, %v1081_v27 }
 0x195   : > { %1215 = vrot.lane.b32.xlu1 %v1169_v36, %s2101_s7  ;;  %1104 = vrot.lane.b32.xlu0 %v1057_v25, %s2100_s6 }
 0x196   : > { %1217 = vrot.lane.b32.xlu2 %v1170_v35, %s2101_s7 }
 0x197   : > { %v1079_v4 = vpop.permute.xlu1 %1078  ;;  %v874_v46 = vpop.permute.xlu0 %873 }
 0x198   : > { %1125 = vst.msk [vmem:[#allocation3 + $0x8] sm:$0xf] %vm1122_vm9, %v1079_v4  ;;  %v1212_v52 = vpop.permute.xlu2 %1211 }
 0x199   : > { %909 = vst.msk [vmem:[#allocation3 + $0x34] sm:$0xf] %vm895_vm7, %v874_v46 }
 0x19a   : > { %1238 = vst.msk [vmem:[#allocation3 + $0x8] sm:$0xf] %vm1235_vm10, %v1192_v20 }
 0x19d   : > { %1330 = vrot.lane.b32.xlu1 %v1283_v2, %s2102_s8  ;;  %1328 = vrot.lane.b32.xlu0 %v1282_v51, %s2102_s8 }
 0x19f   : > { %v987_v53 = vpop.permute.xlu1 %986  ;;  %v985_v44 = vpop.permute.xlu0 %984 }
 0x1a0   : > { %1022 = vst.msk [vmem:[#allocation3 + $0x34] sm:$0xf] %vm1008_vm8, %v987_v53  ;;  %v1327_v42 = vpop.permute.xlu2 %1326 }
 0x1a1   : > { %1021 = vst.msk [vmem:[#allocation3 + $0x30] sm:$0xf] %vm1008_vm8, %v985_v44 }
 0x1a2   : > { %1136 = vst.msk [vmem:[#allocation3 + $0x34] sm:$0xf] %vm1122_vm9, %v1101_v33 }
 0x1a7   : > { %v1099_v47 = vpop.permute.xlu1 %1098  ;;  %v1194_v10 = vpop.permute.xlu0 %1193 }
 0x1a8   : > { %1135 = vst.msk [vmem:[#allocation3 + $0x30] sm:$0xf] %vm1122_vm9, %v1099_v47  ;;  %v973_v54 = vpop.permute.xlu2 %972 }
 0x1a9   : > { %1239 = vst.msk [vmem:[#allocation3 + $0xc] sm:$0xf] %vm1235_vm10, %v1194_v10 }
 0x1aa   : > { %1248 = vst.msk [vmem:[#allocation3 + $0x30] sm:$0xf] %vm1235_vm10, %v1212_v52 }
 0x1af   : > { %v1307_v38 = vpop.permute.xlu1 %1306  ;;  %v1305_v43 = vpop.permute.xlu0 %1304 }
 0x1b0   : > { %1352 = vst.msk [vmem:[#allocation3 + $0xc] sm:$0xf] %vm1348_vm11, %v1307_v38  ;;  %v870_v9 = vpop.permute.xlu2 %869 }
 0x1b1   : > { %1351 = vst.msk [vmem:[#allocation3 + $0x8] sm:$0xf] %vm1348_vm11, %v1305_v43 }
 0x1b2   : > { %907 = vst.msk [vmem:[#allocation3 + $0x2c] sm:$0xf] %vm895_vm7, %v870_v9 }
 0x1b7   : > { %v1325_v56 = vpop.permute.xlu1 %1324  ;;  %v1214_v58 = vpop.permute.xlu0 %1213 }
 0x1b8   : > { %1361 = vst.msk [vmem:[#allocation3 + $0x30] sm:$0xf] %vm1348_vm11, %v1325_v56  ;;  %v1963_v49 = vld [vmem:[#allocation3 + $0x8] sm:$0xff]  ;;  %v981_v8 = vpop.permute.xlu2 %980 }
 0x1b9   : > { %1249 = vst.msk [vmem:[#allocation3 + $0x34] sm:$0xf] %vm1235_vm10, %v1214_v58  ;;  %1510 = vmatmul.bf16.gmra.mxu0 %v1963_v49 }
 0x1ba   : > { %1362 = vst.msk [vmem:[#allocation3 + $0x34] sm:$0xf] %vm1348_vm11, %v1327_v42 }
 0x1bf   : > { %v862_v59 = vpop.permute.xlu1 %861  ;;  %v860_v63 = vpop.permute.xlu0 %859 }
 0x1c0   : > { %903 = vst.msk [vmem:[#allocation3 + $0x1c] sm:$0xf] %vm895_vm7, %v862_v59  ;;  %v1202_v5 = vpop.permute.xlu2 %1201 }
 0x1c1   : > { %902 = vst.msk [vmem:[#allocation3 + $0x18] sm:$0xf] %vm895_vm7, %v860_v63  ;;  %v1968_v1 = vld [vmem:[#allocation3 + $0x30] sm:$0xff] }
 0x1c2   : > { %1015 = vst.msk [vmem:[#allocation3 + $0x18] sm:$0xf] %vm1008_vm8, %v973_v54  ;;  %1535 = vmatmul.bf16.vlgmr.msra.gmra.mxu3 %v1968_v1 }
 0x1c7   : > { %v868_v6 = vpop.permute.xlu1 %867  ;;  %v975_v48 = vpop.permute.xlu0 %974 }
 0x1c8   : > { %906 = vst.msk [vmem:[#allocation3 + $0x28] sm:$0xf] %vm895_vm7, %v868_v6  ;;  %v1313_v57 = vpop.permute.xlu2 %1312 }
 0x1c9   : > { %1016 = vst.msk [vmem:[#allocation3 + $0x1c] sm:$0xf] %vm1008_vm8, %v975_v48 }
 0x1ca   : > { %1019 = vst.msk [vmem:[#allocation3 + $0x28] sm:$0xf] %vm1008_vm8, %v981_v8 }
 0x1cf   : > { %v1089_v0 = vpop.permute.xlu1 %1088  ;;  %v1087_v7 = vpop.permute.xlu0 %1086 }
 0x1d0   : > { %1130 = vst.msk [vmem:[#allocation3 + $0x1c] sm:$0xf] %vm1122_vm9, %v1089_v0  ;;  %v1210_v14 = vpop.permute.xlu2 %1209 }
 0x1d1   : > { %1129 = vst.msk [vmem:[#allocation3 + $0x18] sm:$0xf] %vm1122_vm9, %v1087_v7 }
 0x1d2   : > { %1243 = vst.msk [vmem:[#allocation3 + $0x1c] sm:$0xf] %vm1235_vm10, %v1202_v5 }
 0x1d6   : > { %v1506_v32 = vpop.f32.mrf.mxu0 }
 0x1d7   : > { %v1200_v16 = vpop.permute.xlu1 %1199  ;;  %v983_v26 = vpop.permute.xlu0 %982  ;;  %v1507_v12 = vadd.f32 %v2767_v11, %v1506_v32 }
 0x1d8   : > { %1242 = vst.msk [vmem:[#allocation3 + $0x18] sm:$0xf] %vm1235_vm10, %v1200_v16  ;;  %v763_v3 = vpop.permute.xlu2 %762 }
 0x1d9   : > { %1020 = vst.msk [vmem:[#allocation3 + $0x2c] sm:$0xf] %vm1008_vm8, %v983_v26  ;;  %v1640_v62 = vpack.c.bf16 %v1507_v12, %v1507_v12  ;;  %v1584_v17 = vmul.f32 %v1507_v12, %v1507_v12  ;;  %v1547_v41 = vsel %vm1546_vm13, %v1507_v12, 0.0 }
 0x1da   : > { %1355 = vst.msk [vmem:[#allocation3 + $0x18] sm:$0xf] %vm1348_vm11, %v1313_v57 }
 0x1db   : > { %797 = vst.msk [vmem:[#allocation3 + $0x38] sm:$0xf] %vm782_vm6, %v763_v3  ;;  %v1600_v24 = vsel %vm1546_vm13, %v1584_v17, 0.0 }
 0x1dc   : > { %1657 = vst.msk [vmem:[%s2180_s30] sm:$0xf] %vm1656_vm12, %v1640_v62 }
 0x1de   : > { %v1508_v50 = vpop.f32.mrf.mxu0 }
 0x1df   : > { %v1097_v22 = vpop.permute.xlu1 %1096  ;;  %v1095_v13 = vpop.permute.xlu0 %1094  ;;  %v1509_v18 = vadd.f32 %v2767_v11, %v1508_v50 }
 0x1e0   : > { %1134 = vst.msk [vmem:[#allocation3 + $0x2c] sm:$0xf] %vm1122_vm9, %v1097_v22  ;;  %v878_v23 = vpop.permute.xlu2 %877 }
 0x1e1   : > { %1133 = vst.msk [vmem:[#allocation3 + $0x28] sm:$0xf] %vm1122_vm9, %v1095_v13  ;;  %v1548_v55 = vsel %vm1546_vm13, %v1509_v18, 0.0  ;;  %v1585_v40 = vmul.f32 %v1509_v18, %v1509_v18  ;;  %v1641_v15 = vpack.c.bf16 %v1509_v18, %v1509_v18 }
 0x1e2   : > { %1247 = vst.msk [vmem:[#allocation3 + $0x2c] sm:$0xf] %vm1235_vm10, %v1210_v14  ;;  %v1549_v19 = vadd.f32 %v1548_v55, %v1547_v41 }
 0x1e3   : > { %v1601_v27 = vsel %vm1546_vm13, %v1585_v40, 0.0  ;;  %1658 = vst.msk [vmem:[%s2180_s30 + $0x4] sm:$0xf] %vm1656_vm12, %v1641_v15 }
 0x1e4   : > { %v1602_v28 = vadd.f32 %v1601_v27, %v1600_v24 }
 0x1e7   : > { %v1208_v21 = vpop.permute.xlu1 %1207  ;;  %v1315_v20 = vpop.permute.xlu0 %1314 }
 0x1e8   : > { %1246 = vst.msk [vmem:[#allocation3 + $0x28] sm:$0xf] %vm1235_vm10, %v1208_v21  ;;  %v1103_v36 = vpop.permute.xlu2 %1102 }
 0x1e9   : > { %1356 = vst.msk [vmem:[#allocation3 + $0x1c] sm:$0xf] %vm1348_vm11, %v1315_v20 }
 0x1ef   : > { %v1323_v29 = vpop.permute.xlu1 %1322  ;;  %v1321_v37 = vpop.permute.xlu0 %1320 }
 0x1f0   : > { %1360 = vst.msk [vmem:[#allocation3 + $0x2c] sm:$0xf] %vm1348_vm11, %v1323_v29  ;;  %v1965_v31 = vld [vmem:[#allocation3 + $0x18] sm:$0xff]  ;;  %v1218_v4 = vpop.permute.xlu2 %1217 }
 0x1f1   : > { %1359 = vst.msk [vmem:[#allocation3 + $0x28] sm:$0xf] %vm1348_vm11, %v1321_v37  ;;  %1520 = vmatmul.bf16.gmra.mxu1 %v1965_v31 }
 0x1f7   : > { %v876_v30 = vpop.permute.xlu1 %875  ;;  %v765_v60 = vpop.permute.xlu0 %764 }
 0x1f8   : > { %910 = vst.msk [vmem:[#allocation3 + $0x38] sm:$0xf] %vm895_vm7, %v876_v30  ;;  %v1967_v61 = vld [vmem:[#allocation3 + $0x28] sm:$0xff] }
 0x1f9   : > { %798 = vst.msk [vmem:[#allocation3 + $0x3c] sm:$0xf] %vm782_vm6, %v765_v60  ;;  %1530 = vmatmul.bf16.gmra.mxu2 %v1967_v61 }
 0x1fa   : > { %911 = vst.msk [vmem:[#allocation3 + $0x3c] sm:$0xf] %vm895_vm7, %v878_v23 }
 0x1fd   : > { %v1516_v25 = vpop.f32.mrf.mxu1 }
 0x1fe   : > { %v1517_v35 = vadd.f32 %v2767_v11, %v1516_v25 }
 0x1ff   : > { %v991_v33 = vpop.permute.xlu1 %990  ;;  %v989_v34 = vpop.permute.xlu0 %988 }
 0x200   : > { %1024 = vst.msk [vmem:[#allocation3 + $0x3c] sm:$0xf] %vm1008_vm8, %v991_v33  ;;  %v1644_v39 = vpack.c.bf16 %v1517_v35, %v1517_v35  ;;  %v1588_v57 = vmul.f32 %v1517_v35, %v1517_v35  ;;  %v1554_v26 = vsel %vm1546_vm13, %v1517_v35, 0.0 }
 0x201   : > { %1023 = vst.msk [vmem:[#allocation3 + $0x38] sm:$0xf] %vm1008_vm8, %v989_v34 }
 0x202   : > { %1137 = vst.msk [vmem:[#allocation3 + $0x38] sm:$0xf] %vm1122_vm9, %v1103_v36  ;;  %v1607_v22 = vsel %vm1546_vm13, %v1588_v57, 0.0 }
 0x203   : > { %1661 = vst.msk [vmem:[%s2180_s30 + $0x10] sm:$0xf] %vm1656_vm12, %v1644_v39 }
 0x205   : > { %v1518_v45 = vpop.f32.mrf.mxu1 }
 0x206   : > { %v1519_v51 = vadd.f32 %v2767_v11, %v1518_v45 }
 0x207   : > { %v1216_v46 = vpop.permute.xlu1 %1215  ;;  %v1105_v2 = vpop.permute.xlu0 %1104 }
 0x208   : > { %1250 = vst.msk [vmem:[#allocation3 + $0x38] sm:$0xf] %vm1235_vm10, %v1216_v46  ;;  %v1645_v52 = vpack.c.bf16 %v1519_v51, %v1519_v51  ;;  %v1589_v32 = vmul.f32 %v1519_v51, %v1519_v51  ;;  %v1556_v13 = vsel %vm1546_vm13, %v1519_v51, 0.0 }
 0x209   : > { %1138 = vst.msk [vmem:[#allocation3 + $0x3c] sm:$0xf] %vm1122_vm9, %v1105_v2 }
 0x20a   : > { %1251 = vst.msk [vmem:[#allocation3 + $0x3c] sm:$0xf] %vm1235_vm10, %v1218_v4  ;;  %v1609_v55 = vsel %vm1546_vm13, %v1589_v32, 0.0 }
 0x20b   : > { %1662 = vst.msk [vmem:[%s2180_s30 + $0x14] sm:$0xf] %vm1656_vm12, %v1645_v52 }
 0x20f   : > { %v1331_v53 = vpop.permute.xlu1 %1330  ;;  %v1329_v44 = vpop.permute.xlu0 %1328 }
 0x210   : > { %1364 = vst.msk [vmem:[#allocation3 + $0x3c] sm:$0xf] %vm1348_vm11, %v1331_v53 }
 0x211   : > { %1363 = vst.msk [vmem:[#allocation3 + $0x38] sm:$0xf] %vm1348_vm11, %v1329_v44 }
 0x214   : > { %v1526_v42 = vpop.f32.mrf.mxu2 }
 0x215   : > { %v1527_v47 = vadd.f32 %v2767_v11, %v1526_v42 }
 0x217   : > { %v1648_v10 = vpack.c.bf16 %v1527_v47, %v1527_v47  ;;  %v1592_v61 = vmul.f32 %v1527_v47, %v1527_v47  ;;  %v1562_v39 = vsel %vm1546_vm13, %v1527_v47, 0.0 }
 0x218   : > { %v1969_v54 = vld [vmem:[#allocation3 + $0x38] sm:$0xff] }
 0x219   : > { %1665 = vst.msk [vmem:[%s2180_s30 + $0x20] sm:$0xf] %vm1656_vm12, %v1648_v10  ;;  %1540 = vmatmul.bf16.gmra.mxu3 %v1969_v54  ;;  %v1615_v52 = vsel %vm1546_vm13, %v1592_v61, 0.0 }
 0x21c   : > { %v1528_v38 = vpop.f32.mrf.mxu2 }
 0x21d   : > { %v2811_v43 = vadd.f32 %v2767_v11, %v1528_v38 }
 0x21f   : > { %v1649_v9 = vpack.c.bf16 %v2811_v43, %v2811_v43  ;;  %v1593_v45 = vmul.f32 %v2811_v43, %v2811_v43  ;;  %v1564_v53 = vsel %vm1546_vm13, %v2811_v43, 0.0 }
 0x221   : > { %1666 = vst.msk [vmem:[%s2180_s30 + $0x24] sm:$0xf] %vm1656_vm12, %v1649_v9  ;;  %v1617_v10 = vsel %vm1546_vm13, %v1593_v45, 0.0 }
 0x236   : > { %v1511_v56 = vpop.f32.mrf.mxu0 }
 0x237   : > { %v1512_v58 = vadd.f32 %v2767_v11, %v1511_v56 }
 0x239   : > { %v1550_v49 = vsel %vm1546_vm13, %v1512_v58, 0.0  ;;  %v1586_v8 = vmul.f32 %v1512_v58, %v1512_v58  ;;  %v1642_v59 = vpack.c.bf16 %v1512_v58, %v1512_v58 }
 0x23a   : > { %v1551_v63 = vadd.f32 %v1550_v49, %v1549_v19 }
 0x23b   : > { %v1603_v1 = vsel %vm1546_vm13, %v1586_v8, 0.0  ;;  %1659 = vst.msk [vmem:[%s2180_s30 + $0x8] sm:$0xf] %vm1656_vm12, %v1642_v59 }
 0x23c   : > { %v1604_v5 = vadd.f32 %v1603_v1, %v1602_v28 }
 0x23e   : > { %v1513_v6 = vpop.f32.mrf.mxu0 }
 0x23f   : > { %v1514_v48 = vadd.f32 %v2767_v11, %v1513_v6 }
 0x241   : > { %v1552_v0 = vsel %vm1546_vm13, %v1514_v48, 0.0  ;;  %v1587_v7 = vmul.f32 %v1514_v48, %v1514_v48  ;;  %v1643_v14 = vpack.c.bf16 %v1514_v48, %v1514_v48 }
 0x242   : > { %v1553_v16 = vadd.f32 %v1552_v0, %v1551_v63 }
 0x243   : > { %v1605_v12 = vsel %vm1546_vm13, %v1587_v7, 0.0  ;;  %1660 = vst.msk [vmem:[%s2180_s30 + $0xc] sm:$0xf] %vm1656_vm12, %v1643_v14 }
 0x244   : > { %v1555_v3 = vadd.f32 %v1554_v26, %v1553_v16  ;;  %v1606_v62 = vadd.f32 %v1605_v12, %v1604_v5 }
 0x245   : > { %v1536_v50 = vpop.f32.mrf.mxu3 }
 0x246   : > { %v1608_v17 = vadd.f32 %v1607_v22, %v1606_v62  ;;  %v1537_v18 = vadd.f32 %v2767_v11, %v1536_v50  ;;  %v1557_v41 = vadd.f32 %v1556_v13, %v1555_v3 }
 0x248   : > { %v1652_v40 = vpack.c.bf16 %v1537_v18, %v1537_v18  ;;  %v1610_v15 = vadd.f32 %v1609_v55, %v1608_v17  ;;  %v1596_v59 = vmul.f32 %v1537_v18, %v1537_v18  ;;  %v1570_v57 = vsel %vm1546_vm13, %v1537_v18, 0.0 }
 0x24a   : > { %1669 = vst.msk [vmem:[%s2180_s30 + $0x30] sm:$0xf] %vm1656_vm12, %v1652_v40  ;;  %v1623_v26 = vsel %vm1546_vm13, %v1596_v59, 0.0 }
 0x24d   : > { %v1538_v19 = vpop.f32.mrf.mxu3 }
 0x24e   : > { %v1539_v24 = vadd.f32 %v2767_v11, %v1538_v19 }
 0x250   : > { %v1653_v27 = vpack.c.bf16 %v1539_v24, %v1539_v24  ;;  %v1597_v0 = vmul.f32 %v1539_v24, %v1539_v24  ;;  %v1572_v32 = vsel %vm1546_vm13, %v1539_v24, 0.0 }
 0x252   : > { %1670 = vst.msk [vmem:[%s2180_s30 + $0x34] sm:$0xf] %vm1656_vm12, %v1653_v27  ;;  %v1625_v62 = vsel %vm1546_vm13, %v1597_v0, 0.0 }
 0x26e   : > { %v1521_v28 = vpop.f32.mrf.mxu1 }
 0x26f   : > { %v1522_v21 = vadd.f32 %v2767_v11, %v1521_v28 }
 0x271   : > { %v1646_v20 = vpack.c.bf16 %v1522_v21, %v1522_v21  ;;  %v1590_v29 = vmul.f32 %v1522_v21, %v1522_v21  ;;  %v1558_v37 = vsel %vm1546_vm13, %v1522_v21, 0.0 }
 0x272   : > { %v1559_v60 = vadd.f32 %v1558_v37, %v1557_v41 }
 0x273   : > { %1663 = vst.msk [vmem:[%s2180_s30 + $0x18] sm:$0xf] %vm1656_vm12, %v1646_v20  ;;  %v1611_v23 = vsel %vm1546_vm13, %v1590_v29, 0.0 }
 0x274   : > { %v1612_v34 = vadd.f32 %v1611_v23, %v1610_v15 }
 0x276   : > { %v1523_v31 = vpop.f32.mrf.mxu1 }
 0x277   : > { %v1524_v30 = vadd.f32 %v2767_v11, %v1523_v31 }
 0x279   : > { %v1560_v36 = vsel %vm1546_vm13, %v1524_v30, 0.0  ;;  %v1591_v25 = vmul.f32 %v1524_v30, %v1524_v30  ;;  %v1647_v33 = vpack.c.bf16 %v1524_v30, %v1524_v30 }
 0x27a   : > { %v1561_v35 = vadd.f32 %v1560_v36, %v1559_v60 }
 0x27b   : > { %v1613_v4 = vsel %vm1546_vm13, %v1591_v25, 0.0  ;;  %1664 = vst.msk [vmem:[%s2180_s30 + $0x1c] sm:$0xf] %vm1656_vm12, %v1647_v33 }
 0x27c   : > { %v1563_v46 = vadd.f32 %v1562_v39, %v1561_v35  ;;  %v1614_v2 = vadd.f32 %v1613_v4, %v1612_v34  ;;  %v1531_v51 = vpop.f32.mrf.mxu2 }
 0x27d   : > { %v1532_v44 = vadd.f32 %v2767_v11, %v1531_v51 }
 0x27e   : > { %v1616_v42 = vadd.f32 %v1615_v52, %v1614_v2  ;;  %v1565_v47 = vadd.f32 %v1564_v53, %v1563_v46 }
 0x27f   : > { %v1650_v54 = vpack.c.bf16 %v1532_v44, %v1532_v44  ;;  %v1594_v9 = vmul.f32 %v1532_v44, %v1532_v44  ;;  %v1566_v56 = vsel %vm1546_vm13, %v1532_v44, 0.0 }
 0x280   : > { %v1618_v38 = vadd.f32 %v1617_v10, %v1616_v42  ;;  %v1567_v43 = vadd.f32 %v1566_v56, %v1565_v47 }
 0x281   : > { %1667 = vst.msk [vmem:[%s2180_s30 + $0x28] sm:$0xf] %vm1656_vm12, %v1650_v54  ;;  %v1619_v49 = vsel %vm1546_vm13, %v1594_v9, 0.0 }
 0x282   : > { %v1620_v6 = vadd.f32 %v1619_v49, %v1618_v38 }
 0x284   : > { %v1533_v58 = vpop.f32.mrf.mxu2 }
 0x285   : > { %v1534_v8 = vadd.f32 %v2767_v11, %v1533_v58 }
 0x287   : > { %v1568_v63 = vsel %vm1546_vm13, %v1534_v8, 0.0  ;;  %v1595_v1 = vmul.f32 %v1534_v8, %v1534_v8  ;;  %v1651_v5 = vpack.c.bf16 %v1534_v8, %v1534_v8 }
 0x288   : > { %v1569_v48 = vadd.f32 %v1568_v63, %v1567_v43 }
 0x289   : > { %v1621_v7 = vsel %vm1546_vm13, %v1595_v1, 0.0  ;;  %1668 = vst.msk [vmem:[%s2180_s30 + $0x2c] sm:$0xf] %vm1656_vm12, %v1651_v5 }
 0x28a   : > { %v1571_v14 = vadd.f32 %v1570_v57, %v1569_v48  ;;  %v1622_v16 = vadd.f32 %v1621_v7, %v1620_v6 }
 0x28c   : > { %v1624_v12 = vadd.f32 %v1623_v26, %v1622_v16  ;;  %v1573_v3 = vadd.f32 %v1572_v32, %v1571_v14 }
 0x28e   : > { %v1626_v22 = vadd.f32 %v1625_v62, %v1624_v12 }
 0x29c   : > { %v1541_v13 = vpop.f32.mrf.mxu3 }
 0x29d   : > { %v1542_v50 = vadd.f32 %v2767_v11, %v1541_v13 }
 0x29f   : > { %v1654_v17 = vpack.c.bf16 %v1542_v50, %v1542_v50  ;;  %v1598_v18 = vmul.f32 %v1542_v50, %v1542_v50  ;;  %v1574_v41 = vsel %vm1546_vm13, %v1542_v50, 0.0 }
 0x2a0   : > { %v1575_v19 = vadd.f32 %v1574_v41, %v1573_v3 }
 0x2a1   : > { %1671 = vst.msk [vmem:[%s2180_s30 + $0x38] sm:$0xf] %vm1656_vm12, %v1654_v17  ;;  %v1627_v40 = vsel %vm1546_vm13, %v1598_v18, 0.0 }
 0x2a2   : > { %v1628_v21 = vadd.f32 %v1627_v40, %v1626_v22 }
 0x2a4   : > { %v1543_v55 = vpop.f32.mrf.mxu3 }
 0x2a5   : > { %v1544_v15 = vadd.f32 %v2767_v11, %v1543_v55 }
 0x2a7   : > { %v1576_v24 = vsel %vm1546_vm13, %v1544_v15, 0.0  ;;  %v1599_v27 = vmul.f32 %v1544_v15, %v1544_v15  ;;  %v1655_v28 = vpack.c.bf16 %v1544_v15, %v1544_v15 }
 0x2a8   : > { %v1577_v20 = vadd.f32 %v1576_v24, %v1575_v19 }
 0x2a9   : > { %v1629_v29 = vsel %vm1546_vm13, %v1599_v27, 0.0  ;;  %1672 = vst.msk [vmem:[%s2180_s30 + $0x3c] sm:$0xf] %vm1656_vm12, %v1655_v28 }
 0x2aa   : > { %v1578_v37 = vrot.slane %v1577_v20, 4  ;;  %v1630_v31 = vadd.f32 %v1629_v29, %v1628_v21 }
 0x2ac   : > { %v1579_v23 = vadd.f32 %v1578_v37, %v1577_v20  ;;  %v1631_v30 = vrot.slane %v1630_v31, 4 }
 0x2ae   : > { %v1580_v60 = vrot.slane %v1579_v23, 2  ;;  %v1632_v61 = vadd.f32 %v1631_v30, %v1630_v31 }
 0x2b0   : > { %v1581_v11 = vadd.f32 %v1580_v60, %v1579_v23  ;;  %v1633_v36 = vrot.slane %v1632_v61, 2 }
 0x2b2   : > { %v1582_v25 = vrot.slane %v1581_v11, 1  ;;  %v1634_v33 = vadd.f32 %v1633_v36, %v1632_v61 }
 0x2b4   : > { %v1583_v34 = vadd.f32 %v1582_v25, %v1581_v11  ;;  %v1635_v35 = vrot.slane %v1634_v33, 1 }
 0x2b6   : > { %v1636_v39 = vadd.f32 %v1635_v35, %v1634_v33  ;;  %1638 = vst.msk [vmem:[%s2192_s11] sm:$0x1] %vm1637_vm14, %v1583_v34 }
 0x2b8   : > { %1639 = vst.msk [vmem:[%s2192_s11 + $0x1] sm:$0x1] %vm1637_vm14, %v1636_v39 }
 0x2b9 PF: > { %s15_s19 = sadd.s32 1, %s2091_s19   ;;  %s2900_s15 = smov %s2083_s17 }
 0x2ba   : > { %p12_p10 = scmp.ge.s32.totalorder %s15_s19, 6   ;;  %s2901_s16 = smov %s2087_s18 }
 0x2bb   : > { %s2902_s17 = smov %s2905_s20  ;;  %s2903_s18 = smov %s2909_s21 }
 0x2bc   :  { %14 = sbr.rel (!%p12_p10) target bundleno = 3 (0x3), region = 98 }

// kernel: vgg_forward.15
= control target key start
LH: loop header
LB: loop body
LE: loop exit
PB: predicated region body
PF: predicated region fallthrough
CT: control target
= control target key end

     0   :  { %vm522_vm0 = vcmask 1041408   ;;  %vm524_vm1 = vcmask 1045508   ;;  %vm526_vm2 = vcmask 1043456   ;;  %s1301_s1 = inlined_call_operand.vmem [shape: bf16[256,512], index: 1, kind: input, shape index: {}]   ;;  %s1302_s0 = inlined_call_operand.vmem [shape: bf16[2,256], index: 0, kind: input, shape index: {}]   ;;  %s1303_s2 = inlined_call_operand.vmem [shape: f32[1,512], index: 2, kind: input, shape index: {}]   ;;  %s1304_s3 = inlined_call_operand.vmem [shape: f32[2,512], index: 3, kind: output, shape index: {}]  }
   0x1   :  { %v669_v0 = vld [vmem:[%s1301_s1 + $0xe0] sm:$0xf]  ;;  %v841_v1 = vld [vmem:[%s1301_s1 + $0xec] sm:$0xf0]  ;;  %v839_v5 = vld [vmem:[%s1301_s1 + $0xe4] sm:$0xf] }
   0x2   :  { %v797_v2 = vld [vmem:[%s1301_s1 + $0x1e0] sm:$0xf]  ;;  %v670_v3 = vor.u32 %v841_v1, %v669_v0  ;;  %v873_v4 = vld [vmem:[%s1301_s1 + $0x1ec] sm:$0xf0]  ;;  %v671_v6 = vld [vmem:[%s1301_s1 + $0xf0] sm:$0xf0] }
   0x3   :  { %v798_v7 = vor.u32 %v873_v4, %v797_v2  ;;  %v674_v8 = vor.u32 %v839_v5, %v671_v6  ;;  %v871_v9 = vld [vmem:[%s1301_s1 + $0x1e4] sm:$0xf]  ;;  %v799_v10 = vld [vmem:[%s1301_s1 + $0x1f0] sm:$0xf0]  ;;  %v653_v11 = vld [vmem:[%s1301_s1 + $0xc0] sm:$0xf] }
   0x4   :  { %411 = vmatpush.bf16.msra.mxu0 %v670_v3  ;;  %v802_v12 = vor.u32 %v871_v9, %v799_v10  ;;  %v837_v13 = vld [vmem:[%s1301_s1 + $0xcc] sm:$0xf0]  ;;  %v781_v14 = vld [vmem:[%s1301_s1 + $0x1c0] sm:$0xf]  ;;  %v835_v18 = vld [vmem:[%s1301_s1 + $0xc4] sm:$0xf] }
   0x5   :  { %v869_v15 = vld [vmem:[%s1301_s1 + $0x1cc] sm:$0xf0]  ;;  %424 = vmatpush.bf16.msra.mxu1 %v798_v7  ;;  %437 = vmatpush.bf16.msra.mxu2 %v674_v8  ;;  %v654_v16 = vor.u32 %v837_v13, %v653_v11  ;;  %v655_v19 = vld [vmem:[%s1301_s1 + $0xd0] sm:$0xf0]  ;;  %v867_v20 = vld [vmem:[%s1301_s1 + $0x1c4] sm:$0xf] }
   0x6   :  { %v782_v17 = vor.u32 %v869_v15, %v781_v14  ;;  %450 = vmatpush.bf16.msra.mxu3 %v802_v12  ;;  %v658_v21 = vor.u32 %v835_v18, %v655_v19  ;;  %v783_v22 = vld [vmem:[%s1301_s1 + $0x1d0] sm:$0xf0]  ;;  %v637_v23 = vld [vmem:[%s1301_s1 + $0xa0] sm:$0xf]  ;;  %v833_v24 = vld [vmem:[%s1301_s1 + $0xac] sm:$0xf0] }
   0x7   :  { %v786_v25 = vor.u32 %v867_v20, %v783_v22  ;;  %v765_v26 = vld [vmem:[%s1301_s1 + $0x1a0] sm:$0xf]  ;;  %v865_v27 = vld [vmem:[%s1301_s1 + $0x1ac] sm:$0xf0]  ;;  %v831_v28 = vld [vmem:[%s1301_s1 + $0xa4] sm:$0xf]  ;;  %v638_v29 = vor.u32 %v833_v24, %v637_v23 }
   0x8   :  { %412 = vmatpush.bf16.msra.mxu0 %v654_v16  ;;  %v639_v30 = vld [vmem:[%s1301_s1 + $0xb0] sm:$0xf0]  ;;  %v863_v31 = vld [vmem:[%s1301_s1 + $0x1a4] sm:$0xf]  ;;  %v766_v33 = vor.u32 %v865_v27, %v765_v26  ;;  %v621_v35 = vld [vmem:[%s1301_s1 + $0x80] sm:$0xf] }
   0x9   :  { %v767_v32 = vld [vmem:[%s1301_s1 + $0x1b0] sm:$0xf0]  ;;  %425 = vmatpush.bf16.msra.mxu1 %v782_v17  ;;  %438 = vmatpush.bf16.msra.mxu2 %v658_v21  ;;  %v642_v34 = vor.u32 %v831_v28, %v639_v30  ;;  %v829_v36 = vld [vmem:[%s1301_s1 + $0x8c] sm:$0xf0]  ;;  %v749_v37 = vld [vmem:[%s1301_s1 + $0x180] sm:$0xf] }
   0xa   :  { %451 = vmatpush.bf16.msra.mxu3 %v786_v25  ;;  %v770_v38 = vor.u32 %v863_v31, %v767_v32  ;;  %v861_v39 = vld [vmem:[%s1301_s1 + $0x18c] sm:$0xf0]  ;;  %v827_v40 = vld [vmem:[%s1301_s1 + $0x84] sm:$0xf]  ;;  %v623_v41 = vld [vmem:[%s1301_s1 + $0x90] sm:$0xf0]  ;;  %v622_v44 = vor.u32 %v829_v36, %v621_v35 }
   0xb   :  { %v859_v42 = vld [vmem:[%s1301_s1 + $0x184] sm:$0xf]  ;;  %v751_v43 = vld [vmem:[%s1301_s1 + $0x190] sm:$0xf0]  ;;  %v750_v45 = vor.u32 %v861_v39, %v749_v37  ;;  %v626_v46 = vor.u32 %v827_v40, %v623_v41  ;;  %v605_v47 = vld [vmem:[%s1301_s1 + $0x60] sm:$0xf] }
   0xc   :  { %413 = vmatpush.bf16.msra.mxu0 %v638_v29  ;;  %v825_v48 = vld [vmem:[%s1301_s1 + $0x6c] sm:$0xf0]  ;;  %v733_v49 = vld [vmem:[%s1301_s1 + $0x160] sm:$0xf]  ;;  %v754_v50 = vor.u32 %v859_v42, %v751_v43  ;;  %v823_v52 = vld [vmem:[%s1301_s1 + $0x64] sm:$0xf] }
   0xd   :  { %426 = vmatpush.bf16.msra.mxu1 %v766_v33  ;;  %439 = vmatpush.bf16.msra.mxu2 %v642_v34  ;;  %v857_v51 = vld [vmem:[%s1301_s1 + $0x16c] sm:$0xf0]  ;;  %v607_v53 = vld [vmem:[%s1301_s1 + $0x70] sm:$0xf0]  ;;  %v855_v54 = vld [vmem:[%s1301_s1 + $0x164] sm:$0xf]  ;;  %v606_v56 = vor.u32 %v825_v48, %v605_v47 }
   0xe   :  { %452 = vmatpush.bf16.msra.mxu3 %v770_v38  ;;  %v735_v55 = vld [vmem:[%s1301_s1 + $0x170] sm:$0xf0]  ;;  %v734_v57 = vor.u32 %v857_v51, %v733_v49  ;;  %v610_v58 = vor.u32 %v823_v52, %v607_v53  ;;  %v589_v59 = vld [vmem:[%s1301_s1 + $0x40] sm:$0xf]  ;;  %v821_v60 = vld [vmem:[%s1301_s1 + $0x4c] sm:$0xf0] }
   0xf   :  { %v717_v61 = vld [vmem:[%s1301_s1 + $0x140] sm:$0xf]  ;;  %v738_v62 = vor.u32 %v855_v54, %v735_v55  ;;  %v853_v63 = vld [vmem:[%s1301_s1 + $0x14c] sm:$0xf0]  ;;  %v819_v0 = vld [vmem:[%s1301_s1 + $0x44] sm:$0xf]  ;;  %v590_v4 = vor.u32 %v821_v60, %v589_v59 }
  0x10   :  { %414 = vmatpush.bf16.msra.mxu0 %v622_v44  ;;  %v591_v1 = vld [vmem:[%s1301_s1 + $0x50] sm:$0xf0]  ;;  %v851_v2 = vld [vmem:[%s1301_s1 + $0x144] sm:$0xf]  ;;  %v718_v5 = vor.u32 %v853_v63, %v717_v61  ;;  %v573_v7 = vld [vmem:[%s1301_s1 + $0x20] sm:$0xf] }
  0x11   :  { %427 = vmatpush.bf16.msra.mxu1 %v750_v45  ;;  %440 = vmatpush.bf16.msra.mxu2 %v626_v46  ;;  %v719_v3 = vld [vmem:[%s1301_s1 + $0x150] sm:$0xf0]  ;;  %v594_v6 = vor.u32 %v819_v0, %v591_v1  ;;  %v817_v8 = vld [vmem:[%s1301_s1 + $0x2c] sm:$0xf0]  ;;  %v701_v9 = vld [vmem:[%s1301_s1 + $0x120] sm:$0xf] }
  0x12   :  { %453 = vmatpush.bf16.msra.mxu3 %v754_v50  ;;  %v722_v10 = vor.u32 %v851_v2, %v719_v3  ;;  %v849_v11 = vld [vmem:[%s1301_s1 + $0x12c] sm:$0xf0]  ;;  %v815_v12 = vld [vmem:[%s1301_s1 + $0x24] sm:$0xf]  ;;  %v575_v13 = vld [vmem:[%s1301_s1 + $0x30] sm:$0xf0]  ;;  %v574_v17 = vor.u32 %v817_v8, %v573_v7 }
  0x13   :  { %v847_v14 = vld [vmem:[%s1301_s1 + $0x124] sm:$0xf]  ;;  %v703_v15 = vld [vmem:[%s1301_s1 + $0x130] sm:$0xf0]  ;;  %v557_v16 = vld [vmem:[%s1301_s1] sm:$0xf]  ;;  %v702_v21 = vor.u32 %v849_v11, %v701_v9  ;;  %v578_v22 = vor.u32 %v815_v12, %v575_v13 }
  0x14   :  { %415 = vmatpush.bf16.msra.mxu0 %v606_v56  ;;  %v813_v18 = vld [vmem:[%s1301_s1 + $0xc] sm:$0xf0]  ;;  %v685_v19 = vld [vmem:[%s1301_s1 + $0x100] sm:$0xf]  ;;  %v811_v23 = vld [vmem:[%s1301_s1 + $0x4] sm:$0xf]  ;;  %v706_v26 = vor.u32 %v847_v14, %v703_v15 }
  0x15   :  { %428 = vmatpush.bf16.msra.mxu1 %v734_v57  ;;  %441 = vmatpush.bf16.msra.mxu2 %v610_v58  ;;  %v845_v20 = vld [vmem:[%s1301_s1 + $0x10c] sm:$0xf0]  ;;  %v559_v24 = vld [vmem:[%s1301_s1 + $0x10] sm:$0xf0]  ;;  %v843_v25 = vld [vmem:[%s1301_s1 + $0x104] sm:$0xf]  ;;  %v558_v33 = vor.u32 %v813_v18, %v557_v16 }
  0x16   :  { %454 = vmatpush.bf16.msra.mxu3 %v738_v62  ;;  %v687_v27 = vld [vmem:[%s1301_s1 + $0x110] sm:$0xf0]  ;;  %v677_v28 = vld [vmem:[%s1301_s1 + $0xe8] sm:$0xf]  ;;  %v842_v29 = vld [vmem:[%s1301_s1 + $0xf4] sm:$0xf0]  ;;  %v686_v36 = vor.u32 %v845_v20, %v685_v19  ;;  %v562_v37 = vor.u32 %v811_v23, %v559_v24 }
  0x17   :  { %v805_v30 = vld [vmem:[%s1301_s1 + $0x1e8] sm:$0xf]  ;;  %v874_v31 = vld [vmem:[%s1301_s1 + $0x1f4] sm:$0xf0]  ;;  %v20_v32 = vld [vmem:[%s1302_s0] sm:$0x3]  ;;  %v690_v40 = vor.u32 %v843_v25, %v687_v27  ;;  %v678_v41 = vor.u32 %v842_v29, %v677_v28 }
  0x18   :  { %416 = vmatpush.bf16.msra.mxu0 %v590_v4  ;;  %v840_v34 = vld [vmem:[%s1301_s1 + $0xec] sm:$0xf]  ;;  %v679_v35 = vld [vmem:[%s1301_s1 + $0xf8] sm:$0xf0]  ;;  %86 = vst [vmem:[#allocation1] ss:$9 sm:$0xff] %v20_v32  ;;  %v806_v42 = vor.u32 %v874_v31, %v805_v30 }
  0x19   :  { %429 = vmatpush.bf16.msra.mxu1 %v718_v5  ;;  %442 = vmatpush.bf16.msra.mxu2 %v594_v6  ;;  %v872_v38 = vld [vmem:[%s1301_s1 + $0x1ec] sm:$0xf]  ;;  %v807_v39 = vld [vmem:[%s1301_s1 + $0x1f8] sm:$0xf0]  ;;  %v682_v43 = vor.u32 %v840_v34, %v679_v35  ;;  %v661_v44 = vld [vmem:[%s1301_s1 + $0xc8] sm:$0xf] }
  0x1a   :  { %455 = vmatpush.bf16.msra.mxu3 %v722_v10  ;;  %v838_v45 = vld [vmem:[%s1301_s1 + $0xd4] sm:$0xf0]  ;;  %v789_v46 = vld [vmem:[%s1301_s1 + $0x1c8] sm:$0xf]  ;;  %v810_v47 = vor.u32 %v872_v38, %v807_v39  ;;  %v836_v49 = vld [vmem:[%s1301_s1 + $0xcc] sm:$0xf] }
  0x1b   :  { %v870_v48 = vld [vmem:[%s1301_s1 + $0x1d4] sm:$0xf0]  ;;  %v663_v50 = vld [vmem:[%s1301_s1 + $0xd8] sm:$0xf0]  ;;  %v868_v51 = vld [vmem:[%s1301_s1 + $0x1cc] sm:$0xf]  ;;  %v662_v53 = vor.u32 %v838_v45, %v661_v44 }
  0x1c   :  { %417 = vmatpush.bf16.msra.mxu0 %v574_v17  ;;  %v791_v52 = vld [vmem:[%s1301_s1 + $0x1d8] sm:$0xf0]  ;;  %v645_v54 = vld [vmem:[%s1301_s1 + $0xa8] sm:$0xf]  ;;  %v834_v55 = vld [vmem:[%s1301_s1 + $0xb4] sm:$0xf0]  ;;  %v790_v56 = vor.u32 %v870_v48, %v789_v46  ;;  %v666_v57 = vor.u32 %v836_v49, %v663_v50 }
  0x1d   :  { %430 = vmatpush.bf16.msra.mxu1 %v702_v21  ;;  %443 = vmatpush.bf16.msra.mxu2 %v578_v22  ;;  %v773_v60 = vld [vmem:[%s1301_s1 + $0x1a8] sm:$0xf]  ;;  %v794_v61 = vor.u32 %v868_v51, %v791_v52  ;;  %v866_v62 = vld [vmem:[%s1301_s1 + $0x1b4] sm:$0xf0]  ;;  %v832_v63 = vld [vmem:[%s1301_s1 + $0xac] sm:$0xf]  ;;  %v646_v3 = vor.u32 %v834_v55, %v645_v54 }
  0x1e   :  { %456 = vmatpush.bf16.msra.mxu3 %v706_v26  ;;  %v647_v0 = vld [vmem:[%s1301_s1 + $0xb8] sm:$0xf0]  ;;  %v864_v1 = vld [vmem:[%s1301_s1 + $0x1ac] sm:$0xf]  ;;  %v774_v4 = vor.u32 %v866_v62, %v773_v60  ;;  %v629_v6 = vld [vmem:[%s1301_s1 + $0x88] sm:$0xf] }
  0x1f   :  { %v1145_v58 = vld [vmem:[#allocation1] sm:$0xff]  ;;  %v1147_v59 = vld [vmem:[#allocation1 + $0x9] sm:$0xff]  ;;  %v775_v2 = vld [vmem:[%s1301_s1 + $0x1b8] sm:$0xf0]  ;;  %v650_v5 = vor.u32 %v832_v63, %v647_v0 }
  0x20   :  { %418 = vmatpush.bf16.msra.mxu0 %v558_v33  ;;  %v830_v7 = vld [vmem:[%s1301_s1 + $0x94] sm:$0xf0]  ;;  %v757_v8 = vld [vmem:[%s1301_s1 + $0x188] sm:$0xf]  ;;  %v778_v9 = vor.u32 %v864_v1, %v775_v2  ;;  %v828_v11 = vld [vmem:[%s1301_s1 + $0x8c] sm:$0xf] }
  0x21   :  { %431 = vmatpush.bf16.msra.mxu1 %v686_v36  ;;  %444 = vmatpush.bf16.msra.mxu2 %v562_v37  ;;  %v862_v10 = vld [vmem:[%s1301_s1 + $0x194] sm:$0xf0]  ;;  %v631_v12 = vld [vmem:[%s1301_s1 + $0x98] sm:$0xf0]  ;;  %v860_v13 = vld [vmem:[%s1301_s1 + $0x18c] sm:$0xf]  ;;  %v630_v15 = vor.u32 %v830_v7, %v629_v6 }
  0x22   :  { %457 = vmatpush.bf16.msra.mxu3 %v690_v40  ;;  %v759_v14 = vld [vmem:[%s1301_s1 + $0x198] sm:$0xf0]  ;;  %v758_v16 = vor.u32 %v862_v10, %v757_v8  ;;  %v634_v17 = vor.u32 %v828_v11, %v631_v12  ;;  %v613_v18 = vld [vmem:[%s1301_s1 + $0x68] sm:$0xf]  ;;  %v826_v19 = vld [vmem:[%s1301_s1 + $0x74] sm:$0xf0] }
  0x23   :  { %419 = vmatmul.bf16.vlgmr.msra.gmra.mxu0 %v1145_v58  ;;  %v741_v20 = vld [vmem:[%s1301_s1 + $0x168] sm:$0xf]  ;;  %v762_v21 = vor.u32 %v860_v13, %v759_v14  ;;  %v858_v22 = vld [vmem:[%s1301_s1 + $0x174] sm:$0xf0]  ;;  %v824_v23 = vld [vmem:[%s1301_s1 + $0x6c] sm:$0xf]  ;;  %v614_v27 = vor.u32 %v826_v19, %v613_v18 }
  0x24   :  { %463 = vmatpush.bf16.msrb.mxu0 %v678_v41  ;;  %445 = vmatmul.bf16.vlgmr.msra.gmra.mxu2 %v1145_v58  ;;  %v615_v24 = vld [vmem:[%s1301_s1 + $0x78] sm:$0xf0]  ;;  %v856_v25 = vld [vmem:[%s1301_s1 + $0x16c] sm:$0xf]  ;;  %v742_v28 = vor.u32 %v858_v22, %v741_v20  ;;  %v597_v30 = vld [vmem:[%s1301_s1 + $0x48] sm:$0xf] }
  0x25   :  { %476 = vmatpush.bf16.msrb.mxu1 %v806_v42  ;;  %489 = vmatpush.bf16.msrb.mxu2 %v682_v43  ;;  %v743_v26 = vld [vmem:[%s1301_s1 + $0x178] sm:$0xf0]  ;;  %v618_v29 = vor.u32 %v824_v23, %v615_v24  ;;  %v822_v31 = vld [vmem:[%s1301_s1 + $0x54] sm:$0xf0]  ;;  %v725_v32 = vld [vmem:[%s1301_s1 + $0x148] sm:$0xf] }
  0x26   :  { %502 = vmatpush.bf16.msrb.mxu3 %v810_v47  ;;  %432 = vmatmul.bf16.vlgmr.msra.gmra.mxu1 %v1147_v59  ;;  %v746_v33 = vor.u32 %v856_v25, %v743_v26  ;;  %v854_v34 = vld [vmem:[%s1301_s1 + $0x154] sm:$0xf0]  ;;  %v820_v35 = vld [vmem:[%s1301_s1 + $0x4c] sm:$0xf]  ;;  %v599_v36 = vld [vmem:[%s1301_s1 + $0x58] sm:$0xf0]  ;;  %v598_v39 = vor.u32 %v822_v31, %v597_v30 }
  0x27   :  { %458 = vmatmul.bf16.vlgmr.msra.gmra.mxu3 %v1147_v59  ;;  %v852_v37 = vld [vmem:[%s1301_s1 + $0x14c] sm:$0xf]  ;;  %v727_v38 = vld [vmem:[%s1301_s1 + $0x158] sm:$0xf0]  ;;  %v726_v40 = vor.u32 %v854_v34, %v725_v32  ;;  %v602_v41 = vor.u32 %v820_v35, %v599_v36  ;;  %v581_v42 = vld [vmem:[%s1301_s1 + $0x28] sm:$0xf] }
  0x28   :  { %464 = vmatpush.bf16.msrb.mxu0 %v662_v53  ;;  %v818_v43 = vld [vmem:[%s1301_s1 + $0x34] sm:$0xf0]  ;;  %v709_v44 = vld [vmem:[%s1301_s1 + $0x128] sm:$0xf]  ;;  %v730_v45 = vor.u32 %v852_v37, %v727_v38  ;;  %v816_v47 = vld [vmem:[%s1301_s1 + $0x2c] sm:$0xf] }
  0x29   :  { %477 = vmatpush.bf16.msrb.mxu1 %v790_v56  ;;  %490 = vmatpush.bf16.msrb.mxu2 %v666_v57  ;;  %v850_v46 = vld [vmem:[%s1301_s1 + $0x134] sm:$0xf0]  ;;  %v583_v48 = vld [vmem:[%s1301_s1 + $0x38] sm:$0xf0]  ;;  %v848_v49 = vld [vmem:[%s1301_s1 + $0x12c] sm:$0xf]  ;;  %v582_v51 = vor.u32 %v818_v43, %v581_v42 }
  0x2a   :  { %503 = vmatpush.bf16.msrb.mxu3 %v794_v61  ;;  %v711_v50 = vld [vmem:[%s1301_s1 + $0x138] sm:$0xf0]  ;;  %v710_v52 = vor.u32 %v850_v46, %v709_v44  ;;  %v586_v53 = vor.u32 %v816_v47, %v583_v48  ;;  %v565_v54 = vld [vmem:[%s1301_s1 + $0x8] sm:$0xf]  ;;  %v814_v55 = vld [vmem:[%s1301_s1 + $0x14] sm:$0xf0] }
  0x2b   :  { %v693_v56 = vld [vmem:[%s1301_s1 + $0x108] sm:$0xf]  ;;  %v714_v57 = vor.u32 %v848_v49, %v711_v50  ;;  %v846_v60 = vld [vmem:[%s1301_s1 + $0x114] sm:$0xf0]  ;;  %v812_v61 = vld [vmem:[%s1301_s1 + $0xc] sm:$0xf]  ;;  %v566_v1 = vor.u32 %v814_v55, %v565_v54 }
  0x2c   :  { %465 = vmatpush.bf16.msrb.mxu0 %v646_v3  ;;  %v567_v62 = vld [vmem:[%s1301_s1 + $0x18] sm:$0xf0]  ;;  %v844_v63 = vld [vmem:[%s1301_s1 + $0x10c] sm:$0xf]  ;;  %v694_v2 = vor.u32 %v846_v60, %v693_v56  ;;  %v535_v13 = vld [vmem:[%s1303_s2] sm:$0xf] }
  0x2d   :  { %478 = vmatpush.bf16.msrb.mxu1 %v774_v4  ;;  %491 = vmatpush.bf16.msrb.mxu2 %v650_v5  ;;  %v695_v0 = vld [vmem:[%s1301_s1 + $0x118] sm:$0xf0]  ;;  %v570_v3 = vor.u32 %v812_v61, %v567_v62  ;;  %v540_v18 = vperm.slane %v535_v13, 3 }
  0x2e   :  { %504 = vmatpush.bf16.msrb.mxu3 %v778_v9  ;;  %v698_v4 = vor.u32 %v844_v63, %v695_v0 }
  0x2f   :  { %v543_v23 = vrot.slane %v540_v18, 2 }
  0x30   :  { %466 = vmatpush.bf16.msrb.mxu0 %v630_v15 }
  0x31   :  { %479 = vmatpush.bf16.msrb.mxu1 %v758_v16  ;;  %492 = vmatpush.bf16.msrb.mxu2 %v634_v17  ;;  %v538_v16 = vperm.slane %v535_v13, 1  ;;  %v539_v17 = vperm.slane %v535_v13, 2 }
  0x32   :  { %505 = vmatpush.bf16.msrb.mxu3 %v762_v21 }
  0x33   :  { %v541_v20 = vrot.slane %v538_v16, 6  ;;  %v542_v22 = vrot.slane %v539_v17, 4 }
  0x34   :  { %467 = vmatpush.bf16.msrb.mxu0 %v614_v27 }
  0x35   :  { %480 = vmatpush.bf16.msrb.mxu1 %v742_v28  ;;  %493 = vmatpush.bf16.msrb.mxu2 %v618_v29 }
  0x36   :  { %506 = vmatpush.bf16.msrb.mxu3 %v746_v33  ;;  %v545_v33 = vsel %vm524_vm1, %v542_v22, %v543_v23 }
  0x38   :  { %468 = vmatpush.bf16.msrb.mxu0 %v598_v39 }
  0x39   :  { %481 = vmatpush.bf16.msrb.mxu1 %v726_v40  ;;  %494 = vmatpush.bf16.msrb.mxu2 %v602_v41 }
  0x3a   :  { %507 = vmatpush.bf16.msrb.mxu3 %v730_v45 }
  0x3c   :  { %469 = vmatpush.bf16.msrb.mxu0 %v582_v51 }
  0x3d   :  { %482 = vmatpush.bf16.msrb.mxu1 %v710_v52  ;;  %495 = vmatpush.bf16.msrb.mxu2 %v586_v53 }
  0x3e   :  { %508 = vmatpush.bf16.msrb.mxu3 %v714_v57 }
  0x40   :  { %470 = vmatpush.bf16.msrb.mxu0 %v566_v1 }
  0x41   :  { %483 = vmatpush.bf16.msrb.mxu1 %v694_v2  ;;  %496 = vmatpush.bf16.msrb.mxu2 %v570_v3 }
  0x42   :  { %509 = vmatpush.bf16.msrb.mxu3 %v698_v4 }
  0x43   :  { %471 = vmatmul.bf16.vlgmr.msrb.gmra.mxu0 %v1145_v58 }
  0x44   :  { %484 = vmatmul.bf16.vlgmr.msrb.gmra.mxu1 %v1147_v59  ;;  %497 = vmatmul.bf16.vlgmr.msrb.gmra.mxu2 %v1145_v58 }
  0x45   :  { %510 = vmatmul.bf16.vlgmr.msrb.gmra.mxu3 %v1147_v59  ;;  %v537_v59 = vperm.slane %v535_v13, 0 }
  0x47   :  { %v544_v31 = vsel %vm522_vm0, %v537_v59, %v541_v20 }
  0x48   :  { %v546_v37 = vsel %vm526_vm2, %v544_v31, %v545_v33 }
  0xa0   :  { %v420_v5 = vpop.f32.mrf.mxu0 }
  0xa3   :  { %v433_v6 = vpop.f32.mrf.mxu1 }
  0xa4   :  { %v434_v26 = vadd.f32 %v433_v6, %v420_v5 }
  0xa7   :  { %v446_v7 = vpop.f32.mrf.mxu2 }
  0xa8   :  { %v422_v9 = vpop.f32.mrf.mxu0 }
  0xaa   :  { %v459_v8 = vpop.f32.mrf.mxu3 }
  0xab   :  { %v435_v10 = vpop.f32.mrf.mxu1  ;;  %v460_v58 = vadd.f32 %v459_v8, %v446_v7 }
  0xad   :  { %v519_v27 = vrot.slane %v460_v58, 6 }
  0xaf   :  { %v448_v11 = vpop.f32.mrf.mxu2  ;;  %v523_v34 = vsel %vm522_vm0, %v434_v26, %v519_v27 }
  0xb2   :  { %v461_v12 = vpop.f32.mrf.mxu3 }
  0xc0   :  { %v472_v14 = vpop.f32.mrf.mxu0 }
  0xc1   :  { %v485_v15 = vpop.f32.mrf.mxu1 }
  0xc2   :  { %v486_v19 = vadd.f32 %v485_v15, %v472_v14 }
  0xc4   :  { %v520_v28 = vrot.slane %v486_v19, 4 }
  0xc7   :  { %v498_v21 = vpop.f32.mrf.mxu2 }
  0xc8   :  { %v511_v24 = vpop.f32.mrf.mxu3  ;;  %v474_v25 = vpop.f32.mrf.mxu0 }
  0xc9   :  { %v512_v29 = vadd.f32 %v511_v24, %v498_v21  ;;  %v487_v30 = vpop.f32.mrf.mxu1 }
  0xcb   :  { %v521_v32 = vrot.slane %v512_v29, 2 }
  0xcd   :  { %v525_v35 = vsel %vm524_vm1, %v520_v28, %v521_v32 }
  0xce   :  { %v527_v36 = vsel %vm526_vm2, %v523_v34, %v525_v35 }
  0xcf   :  { %v500_v38 = vpop.f32.mrf.mxu2  ;;  %v548_v40 = vadd.f32 %v546_v37, %v527_v36 }
  0xd0   :  { %v513_v39 = vpop.f32.mrf.mxu3 }
  0xd1   :  { %v549_v41 = vmax.f32 %v548_v40, 0.0 }
  0xd3   :  { %550 = vst [vmem:[%s1304_s3] sm:$0xff] %v549_v41 }

// kernel: vgg_forward.17
= control target key start
LH: loop header
LB: loop body
LE: loop exit
PB: predicated region body
PF: predicated region fallthrough
CT: control target
= control target key end

     0   :  { %s693_s0 = inlined_call_operand.vmem [shape: f32[2,512], index: 0, kind: input, shape index: {}]   ;;  %s694_s1 = inlined_call_operand.vmem [shape: bf16[512,10], index: 1, kind: input, shape index: {}]   ;;  %s695_s2 = inlined_call_operand.vmem [shape: f32[1,10], index: 2, kind: input, shape index: {}]   ;;  %s696_s3 = inlined_call_operand.hbm [shape: f32[2,10], index: 3, kind: output, shape index: {}]  }
   0x1   :  { %v509_v0 = vld [vmem:[%s694_s1 + $0x38] sm:$0xff]  ;;  %v508_v4 = vld [vmem:[%s694_s1 + $0x30] sm:$0xff]  ;;  %v507_v8 = vld [vmem:[%s694_s1 + $0x28] sm:$0xff] }
   0x2   :  { %v517_v1 = vld [vmem:[%s694_s1 + $0x78] sm:$0xff]  ;;  %293 = vmatpush.bf16.msra.mxu0 %v509_v0  ;;  %v516_v5 = vld [vmem:[%s694_s1 + $0x70] sm:$0xff]  ;;  %v515_v9 = vld [vmem:[%s694_s1 + $0x68] sm:$0xff] }
   0x3   :  { %v525_v2 = vld [vmem:[%s694_s1 + $0xb8] sm:$0xff]  ;;  %306 = vmatpush.bf16.msra.mxu1 %v517_v1  ;;  %v524_v6 = vld [vmem:[%s694_s1 + $0xb0] sm:$0xff]  ;;  %v523_v10 = vld [vmem:[%s694_s1 + $0xa8] sm:$0xff] }
   0x4   :  { %v533_v3 = vld [vmem:[%s694_s1 + $0xf8] sm:$0xff]  ;;  %319 = vmatpush.bf16.msra.mxu2 %v525_v2  ;;  %v532_v7 = vld [vmem:[%s694_s1 + $0xf0] sm:$0xff]  ;;  %v531_v11 = vld [vmem:[%s694_s1 + $0xe8] sm:$0xff] }
   0x5   :  { %332 = vmatpush.bf16.msra.mxu3 %v533_v3  ;;  %v506_v12 = vld [vmem:[%s694_s1 + $0x20] sm:$0xff] }
   0x6   :  { %294 = vmatpush.bf16.msra.mxu0 %v508_v4  ;;  %v514_v13 = vld [vmem:[%s694_s1 + $0x60] sm:$0xff] }
   0x7   :  { %307 = vmatpush.bf16.msra.mxu1 %v516_v5  ;;  %v522_v14 = vld [vmem:[%s694_s1 + $0xa0] sm:$0xff] }
   0x8   :  { %320 = vmatpush.bf16.msra.mxu2 %v524_v6  ;;  %v530_v15 = vld [vmem:[%s694_s1 + $0xe0] sm:$0xff] }
   0x9   :  { %333 = vmatpush.bf16.msra.mxu3 %v532_v7  ;;  %v22_v16 = vld [vmem:[%s693_s0] sm:$0xff] }
   0xa   :  { %295 = vmatpush.bf16.msra.mxu0 %v507_v8  ;;  %24 = vst [vmem:[#allocation1] ss:$4 sm:$0xff] %v22_v16 }
   0xb   :  { %308 = vmatpush.bf16.msra.mxu1 %v515_v9 }
   0xc   :  { %321 = vmatpush.bf16.msra.mxu2 %v523_v10 }
   0xd   :  { %334 = vmatpush.bf16.msra.mxu3 %v531_v11 }
   0xe   :  { %8 = vsyncpa [#allocation3], 0  ;;  %296 = vmatpush.bf16.msra.mxu0 %v506_v12  ;;  %v505_v17 = vld [vmem:[%s694_s1 + $0x18] sm:$0xff]  ;;  %v504_v21 = vld [vmem:[%s694_s1 + $0x10] sm:$0xff]  ;;  %vm19_vm0 = vcmask 74752   ;;  %v563_v41 = vmov 0.0  }
   0xf   :  { %309 = vmatpush.bf16.msra.mxu1 %v514_v13  ;;  %v513_v18 = vld [vmem:[%s694_s1 + $0x58] sm:$0xff]  ;;  %v512_v22 = vld [vmem:[%s694_s1 + $0x50] sm:$0xff]  ;;  %v503_v25 = vld [vmem:[%s694_s1 + $0x8] sm:$0xff]  ;;  %20 = vst.msk [vmem:[#allocation2] sm:$0x3] %vm19_vm0, %v563_v41  ;;  %s564_s24 = smov [#allocation2]  }
  0x10   :  { %322 = vmatpush.bf16.msra.mxu2 %v522_v14  ;;  %v521_v19 = vld [vmem:[%s694_s1 + $0x98] sm:$0xff]  ;;  %v520_v23 = vld [vmem:[%s694_s1 + $0x90] sm:$0xff]  ;;  %v511_v26 = vld [vmem:[%s694_s1 + $0x48] sm:$0xff]  ;;  %s363_s0 = sshll.u32 %s564_s24, 4  ;;  %s365_s27 = sshll.u32 %s696_s3, 4  ;;  %s364_s0 = int_to_ptr.vmem [resolvable:$true] %s363_s0  ;;  %s366_s27 = int_to_ptr.hbm [resolvable:$true] %s365_s27 }
  0x11   :  { %335 = vmatpush.bf16.msra.mxu3 %v530_v15  ;;  %v529_v20 = vld [vmem:[%s694_s1 + $0xd8] sm:$0xff]  ;;  %v528_v24 = vld [vmem:[%s694_s1 + $0xd0] sm:$0xff]  ;;  %v519_v27 = vld [vmem:[%s694_s1 + $0x88] sm:$0xff] }
  0x12   :  { %297 = vmatpush.bf16.msra.mxu0 %v505_v17  ;;  %v527_v28 = vld [vmem:[%s694_s1 + $0xc8] sm:$0xff]  ;;  %v502_v29 = vld [vmem:[%s694_s1] sm:$0xff]  ;;  %v27_v35 = vld.sshfl [vmem:[#allocation1 + $0x10] sm:$0xff pattern:$0x73625140] }
  0x13   :  { %310 = vmatpush.bf16.msra.mxu1 %v513_v18  ;;  %v510_v30 = vld [vmem:[%s694_s1 + $0x40] sm:$0xff]  ;;  %v26_v34 = vld.sshfl [vmem:[#allocation1 + $0x8] sm:$0xff pattern:$0x73625140]  ;;  %v35_v39 = vpack.c.bf16 %v27_v35, %v27_v35 }
  0x14   :  { %323 = vmatpush.bf16.msra.mxu2 %v521_v19  ;;  %v518_v31 = vld [vmem:[%s694_s1 + $0x80] sm:$0xff]  ;;  %v28_v36 = vld.sshfl [vmem:[#allocation1 + $0x18] sm:$0xff pattern:$0x73625140]  ;;  %v34_v38 = vpack.c.bf16 %v26_v34, %v26_v34 }
  0x15   :  { %336 = vmatpush.bf16.msra.mxu3 %v529_v20  ;;  %v526_v32 = vld [vmem:[%s694_s1 + $0xc0] sm:$0xff]  ;;  %v36_v40 = vpack.c.bf16 %v28_v36, %v28_v36 }
  0x16   :  { %298 = vmatpush.bf16.msra.mxu0 %v504_v21  ;;  %v25_v33 = vld.sshfl [vmem:[#allocation1] sm:$0xff pattern:$0x73625140]  ;;  %v21_v50 = vld [vmem:[#allocation2] sm:$0x3] }
  0x17   :  { %311 = vmatpush.bf16.msra.mxu1 %v512_v22  ;;  %v33_v37 = vpack.c.bf16 %v25_v33, %v25_v33  ;;  %v536_v55 = vld [vmem:[%s695_s2] ss:$0 sm:$0xff] }
  0x18   :  { %324 = vmatpush.bf16.msra.mxu2 %v520_v23 }
  0x19   :  { %337 = vmatpush.bf16.msra.mxu3 %v528_v24 }
  0x1a   :  { %299 = vmatpush.bf16.msra.mxu0 %v503_v25 }
  0x1b   :  { %312 = vmatpush.bf16.msra.mxu1 %v511_v26 }
  0x1c   :  { %325 = vmatpush.bf16.msra.mxu2 %v519_v27 }
  0x1d   :  { %338 = vmatpush.bf16.msra.mxu3 %v527_v28 }
  0x1e   :  { %300 = vmatpush.bf16.msra.mxu0 %v502_v29 }
  0x1f   :  { %313 = vmatpush.bf16.msra.mxu1 %v510_v30 }
  0x20   :  { %326 = vmatpush.bf16.msra.mxu2 %v518_v31 }
  0x21   :  { %339 = vmatpush.bf16.msra.mxu3 %v526_v32  ;;  %301 = vmatmul.bf16.vlgmr.msra.gmra.mxu0 %v33_v37 }
  0x22   :  { %314 = vmatmul.bf16.vlgmr.msra.gmra.mxu1 %v34_v38 }
  0x23   :  { %327 = vmatmul.bf16.vlgmr.msra.gmra.mxu2 %v35_v39 }
  0x24   :  { %340 = vmatmul.bf16.vlgmr.msra.gmra.mxu3 %v36_v40 }
  0x9e   :  { %v302_v42 = vpop.f32.mrf.mxu0 }
  0x9f   :  { %v315_v43 = vpop.f32.mrf.mxu1 }
  0xa0   :  { %v316_v44 = vadd.f32 %v315_v43, %v302_v42 }
  0xa6   :  { %v328_v45 = vpop.f32.mrf.mxu2  ;;  %v304_v48 = vpop.f32.mrf.mxu0 }
  0xa7   :  { %v341_v46 = vpop.f32.mrf.mxu3  ;;  %v329_v47 = vadd.f32 %v328_v45, %v316_v44  ;;  %v317_v49 = vpop.f32.mrf.mxu1 }
  0xa9   :  { %v342_v51 = vadd.f32 %v341_v46, %v329_v47 }
  0xab   :  { %v345_v52 = vadd.f32 %v342_v51, %v21_v50 }
  0xad   :  { %347 = vst.msk [vmem:[#allocation2] sm:$0x3] %vm19_vm0, %v345_v52 }
  0xae   :  { %v330_v53 = vpop.f32.mrf.mxu2 }
  0xaf   :  { %v343_v54 = vpop.f32.mrf.mxu3 }
  0xb4   :  { %v351_v56 = vld [vmem:[#allocation2] sm:$0x3] }
  0xb5   :  { %v356_v57 = vadd.f32 %v536_v55, %v351_v56 }
  0xb7   :  { %357 = vst.msk [vmem:[#allocation2] sm:$0x3] %vm19_vm0, %v356_v57 }
  0xb8   :  { %368 = dma.vmem_to_hbm [thread:$0]  %s364_s0, 32, %s366_s27, [#allocation3]  }
  0xb9   :  { %561 = dma.done.wait [#allocation3], 32  }
  0xba   :  { %562 = vsyncadd [#allocation3], 4294967264 }
  0xbb   :  { %373 = vsyncpa [#allocation3], 1 }

// kernel: vgg_forward.16
= control target key start
LH: loop header
LB: loop body
LE: loop exit
PB: predicated region body
PF: predicated region fallthrough
CT: control target
= control target key end

     0   :  { %8 = vsyncpa [#allocation3], 0  ;;  %s1738_s15 = smov [#allocation2]   ;;  %s1739_s17 = smov 256   ;;  %s1797_s0 = inlined_call_operand.vmem [shape: f32[2,512], index: 0, kind: input, shape index: {}]   ;;  %s1798_s1 = inlined_call_operand.hbm [shape: bf16[512,512], index: 1, kind: input, shape index: {}]   ;;  %s1799_s2 = inlined_call_operand.vmem [shape: f32[1,512], index: 2, kind: input, shape index: {}]   ;;  %s1800_s3 = inlined_call_operand.vmem [shape: f32[2,512], index: 3, kind: output, shape index: {}]  }
   0x1   :  { %s15_s14 = sshll.u32 %s1798_s1, 4  ;;  %s17_s16 = sshll.u32 %s1738_s15, 4  ;;  %s16_s14 = int_to_ptr.hbm [resolvable:$true] %s15_s14  ;;  %s18_s16 = int_to_ptr.vmem [resolvable:$true] %s17_s16 }
   0x2   :  { %s1740_s18 = smov 16  }
   0x3   :  { %23 = dma.hbm_to_vmem [thread:$0]  %s16_s14, 16384, %s18_s16, [#allocation3], %s1739_s17, %s1739_s17, %s1740_s18  }
   0x4   :  { %1736 = dma.done.wait [#allocation3], 16384  }
   0x5   :  { %1737 = vsyncadd [#allocation3], 4294950912  ;;  %v1182_v0 = vld [vmem:[#allocation2 + $0xe0] sm:$0xf]  ;;  %v1610_v1 = vld [vmem:[#allocation2 + $0xec] sm:$0xf0] }
   0x6   :  { %v1310_v2 = vld [vmem:[#allocation2 + $0x1e0] sm:$0xf]  ;;  %v1183_v3 = vor.u32 %v1610_v1, %v1182_v0  ;;  %v1642_v4 = vld [vmem:[#allocation2 + $0x1ec] sm:$0xf0]  ;;  %vm1034_vm0 = vcmask 1041408   ;;  %vm1036_vm1 = vcmask 1045508  }
   0x7   :  { %v1438_v5 = vld [vmem:[#allocation2 + $0x2e0] sm:$0xf]  ;;  %v1674_v6 = vld [vmem:[#allocation2 + $0x2ec] sm:$0xf0]  ;;  %v1311_v7 = vor.u32 %v1642_v4, %v1310_v2  ;;  %vm1038_vm2 = vcmask 1043456  }
   0x8   :  { %v1439_v8 = vor.u32 %v1674_v6, %v1438_v5  ;;  %v1566_v9 = vld [vmem:[#allocation2 + $0x3e0] sm:$0xf]  ;;  %v1706_v10 = vld [vmem:[#allocation2 + $0x3ec] sm:$0xf0]  ;;  %819 = vmatpush.bf16.msra.mxu0 %v1183_v3 }
   0x9   :  { %v1166_v11 = vld [vmem:[#allocation2 + $0xc0] sm:$0xf]  ;;  %v1567_v12 = vor.u32 %v1706_v10, %v1566_v9  ;;  %v1606_v13 = vld [vmem:[#allocation2 + $0xcc] sm:$0xf0]  ;;  %832 = vmatpush.bf16.msra.mxu1 %v1311_v7 }
   0xa   :  { %v1294_v14 = vld [vmem:[#allocation2 + $0x1c0] sm:$0xf]  ;;  %v1638_v15 = vld [vmem:[#allocation2 + $0x1cc] sm:$0xf0]  ;;  %845 = vmatpush.bf16.msra.mxu2 %v1439_v8  ;;  %v1167_v16 = vor.u32 %v1606_v13, %v1166_v11 }
   0xb   :  { %v1295_v17 = vor.u32 %v1638_v15, %v1294_v14  ;;  %v1422_v18 = vld [vmem:[#allocation2 + $0x2c0] sm:$0xf]  ;;  %v1670_v19 = vld [vmem:[#allocation2 + $0x2cc] sm:$0xf0]  ;;  %858 = vmatpush.bf16.msra.mxu3 %v1567_v12 }
   0xc   :  { %v1550_v20 = vld [vmem:[#allocation2 + $0x3c0] sm:$0xf]  ;;  %v1423_v21 = vor.u32 %v1670_v19, %v1422_v18  ;;  %v1702_v22 = vld [vmem:[#allocation2 + $0x3cc] sm:$0xf0]  ;;  %820 = vmatpush.bf16.msra.mxu0 %v1167_v16 }
   0xd   :  { %v1150_v23 = vld [vmem:[#allocation2 + $0xa0] sm:$0xf]  ;;  %v1602_v24 = vld [vmem:[#allocation2 + $0xac] sm:$0xf0]  ;;  %v1551_v25 = vor.u32 %v1702_v22, %v1550_v20  ;;  %833 = vmatpush.bf16.msra.mxu1 %v1295_v17 }
   0xe   :  { %v1278_v26 = vld [vmem:[#allocation2 + $0x1a0] sm:$0xf]  ;;  %v1634_v27 = vld [vmem:[#allocation2 + $0x1ac] sm:$0xf0]  ;;  %v1151_v29 = vor.u32 %v1602_v24, %v1150_v23  ;;  %846 = vmatpush.bf16.msra.mxu2 %v1423_v21 }
   0xf   :  { %v1406_v28 = vld [vmem:[#allocation2 + $0x2a0] sm:$0xf]  ;;  %v1666_v30 = vld [vmem:[#allocation2 + $0x2ac] sm:$0xf0]  ;;  %v1279_v33 = vor.u32 %v1634_v27, %v1278_v26  ;;  %859 = vmatpush.bf16.msra.mxu3 %v1551_v25 }
  0x10   :  { %v1534_v31 = vld [vmem:[#allocation2 + $0x3a0] sm:$0xf]  ;;  %v1698_v32 = vld [vmem:[#allocation2 + $0x3ac] sm:$0xf0]  ;;  %v1407_v34 = vor.u32 %v1666_v30, %v1406_v28  ;;  %821 = vmatpush.bf16.msra.mxu0 %v1151_v29  ;;  %v1608_v28 = vld [vmem:[#allocation2 + $0xe4] sm:$0xf] }
  0x11   :  { %v1134_v35 = vld [vmem:[#allocation2 + $0x80] sm:$0xf]  ;;  %v1598_v36 = vld [vmem:[#allocation2 + $0x8c] sm:$0xf0]  ;;  %v1535_v38 = vor.u32 %v1698_v32, %v1534_v31  ;;  %834 = vmatpush.bf16.msra.mxu1 %v1279_v33  ;;  %v1184_v29 = vld [vmem:[#allocation2 + $0xf0] sm:$0xf0] }
  0x12   :  { %v1262_v37 = vld [vmem:[#allocation2 + $0x180] sm:$0xf]  ;;  %v1630_v39 = vld [vmem:[#allocation2 + $0x18c] sm:$0xf0]  ;;  %v1135_v44 = vor.u32 %v1598_v36, %v1134_v35  ;;  %847 = vmatpush.bf16.msra.mxu2 %v1407_v34  ;;  %v1640_v30 = vld [vmem:[#allocation2 + $0x1e4] sm:$0xf] }
  0x13   :  { %v1390_v40 = vld [vmem:[#allocation2 + $0x280] sm:$0xf]  ;;  %v1662_v41 = vld [vmem:[#allocation2 + $0x28c] sm:$0xf0]  ;;  %v1263_v45 = vor.u32 %v1630_v39, %v1262_v37  ;;  %860 = vmatpush.bf16.msra.mxu3 %v1535_v38  ;;  %v1312_v32 = vld [vmem:[#allocation2 + $0x1f0] sm:$0xf0] }
  0x14   :  { %v1518_v42 = vld [vmem:[#allocation2 + $0x380] sm:$0xf]  ;;  %v1694_v43 = vld [vmem:[#allocation2 + $0x38c] sm:$0xf0]  ;;  %v1391_v46 = vor.u32 %v1662_v41, %v1390_v40  ;;  %822 = vmatpush.bf16.msra.mxu0 %v1135_v44  ;;  %v1672_v33 = vld [vmem:[#allocation2 + $0x2e4] sm:$0xf]  ;;  %v1187_v40 = vor.u32 %v1608_v28, %v1184_v29  ;;  %v1315_v41 = vor.u32 %v1640_v30, %v1312_v32 }
  0x15   :  { %v1118_v47 = vld [vmem:[#allocation2 + $0x60] sm:$0xf]  ;;  %v1594_v48 = vld [vmem:[#allocation2 + $0x6c] sm:$0xf0]  ;;  %v1519_v50 = vor.u32 %v1694_v43, %v1518_v42  ;;  %835 = vmatpush.bf16.msra.mxu1 %v1263_v45  ;;  %v1440_v34 = vld [vmem:[#allocation2 + $0x2f0] sm:$0xf0] }
  0x16   :  { %v1246_v49 = vld [vmem:[#allocation2 + $0x160] sm:$0xf]  ;;  %v1626_v51 = vld [vmem:[#allocation2 + $0x16c] sm:$0xf0]  ;;  %v1119_v56 = vor.u32 %v1594_v48, %v1118_v47  ;;  %848 = vmatpush.bf16.msra.mxu2 %v1391_v46  ;;  %v1704_v37 = vld [vmem:[#allocation2 + $0x3e4] sm:$0xf]  ;;  %v1443_v42 = vor.u32 %v1672_v33, %v1440_v34 }
  0x17   :  { %v1374_v52 = vld [vmem:[#allocation2 + $0x260] sm:$0xf]  ;;  %v1658_v53 = vld [vmem:[#allocation2 + $0x26c] sm:$0xf0]  ;;  %v1247_v57 = vor.u32 %v1626_v51, %v1246_v49  ;;  %861 = vmatpush.bf16.msra.mxu3 %v1519_v50  ;;  %v1568_v38 = vld [vmem:[#allocation2 + $0x3f0] sm:$0xf0] }
  0x18   :  { %v1502_v54 = vld [vmem:[#allocation2 + $0x360] sm:$0xf]  ;;  %v1690_v55 = vld [vmem:[#allocation2 + $0x36c] sm:$0xf0]  ;;  %v1375_v58 = vor.u32 %v1658_v53, %v1374_v52  ;;  %823 = vmatpush.bf16.msra.mxu0 %v1119_v56  ;;  %v1604_v43 = vld [vmem:[#allocation2 + $0xc4] sm:$0xf]  ;;  %v1571_v46 = vor.u32 %v1704_v37, %v1568_v38 }
  0x19   :  { %v1102_v59 = vld [vmem:[#allocation2 + $0x40] sm:$0xf]  ;;  %v1590_v60 = vld [vmem:[#allocation2 + $0x4c] sm:$0xf0]  ;;  %v1503_v62 = vor.u32 %v1690_v55, %v1502_v54  ;;  %836 = vmatpush.bf16.msra.mxu1 %v1247_v57  ;;  %v1168_v44 = vld [vmem:[#allocation2 + $0xd0] sm:$0xf0] }
  0x1a   :  { %v1230_v61 = vld [vmem:[#allocation2 + $0x140] sm:$0xf]  ;;  %v1622_v63 = vld [vmem:[#allocation2 + $0x14c] sm:$0xf0]  ;;  %v1103_v4 = vor.u32 %v1590_v60, %v1102_v59  ;;  %849 = vmatpush.bf16.msra.mxu2 %v1375_v58  ;;  %v1636_v45 = vld [vmem:[#allocation2 + $0x1c4] sm:$0xf]  ;;  %v1171_v53 = vor.u32 %v1604_v43, %v1168_v44 }
  0x1b   :  { %v1358_v0 = vld [vmem:[#allocation2 + $0x240] sm:$0xf]  ;;  %v1654_v1 = vld [vmem:[#allocation2 + $0x24c] sm:$0xf0]  ;;  %v1231_v5 = vor.u32 %v1622_v63, %v1230_v61  ;;  %862 = vmatpush.bf16.msra.mxu3 %v1503_v62  ;;  %v1296_v47 = vld [vmem:[#allocation2 + $0x1d0] sm:$0xf0] }
  0x1c   :  { %v1486_v2 = vld [vmem:[#allocation2 + $0x340] sm:$0xf]  ;;  %v1686_v3 = vld [vmem:[#allocation2 + $0x34c] sm:$0xf0]  ;;  %v1359_v6 = vor.u32 %v1654_v1, %v1358_v0  ;;  %824 = vmatpush.bf16.msra.mxu0 %v1103_v4  ;;  %v1668_v48 = vld [vmem:[#allocation2 + $0x2c4] sm:$0xf]  ;;  %v1299_v54 = vor.u32 %v1636_v45, %v1296_v47 }
  0x1d   :  { %v1086_v7 = vld [vmem:[#allocation2 + $0x20] sm:$0xf]  ;;  %v1586_v8 = vld [vmem:[#allocation2 + $0x2c] sm:$0xf0]  ;;  %v1487_v10 = vor.u32 %v1686_v3, %v1486_v2  ;;  %837 = vmatpush.bf16.msra.mxu1 %v1231_v5  ;;  %v1424_v49 = vld [vmem:[#allocation2 + $0x2d0] sm:$0xf0] }
  0x1e   :  { %v1214_v9 = vld [vmem:[#allocation2 + $0x120] sm:$0xf]  ;;  %v1618_v11 = vld [vmem:[#allocation2 + $0x12c] sm:$0xf0]  ;;  %v1087_v16 = vor.u32 %v1586_v8, %v1086_v7  ;;  %850 = vmatpush.bf16.msra.mxu2 %v1359_v6  ;;  %v1700_v50 = vld [vmem:[#allocation2 + $0x3c4] sm:$0xf]  ;;  %v1427_v55 = vor.u32 %v1668_v48, %v1424_v49 }
  0x1f   :  { %v1342_v12 = vld [vmem:[#allocation2 + $0x220] sm:$0xf]  ;;  %v1650_v13 = vld [vmem:[#allocation2 + $0x22c] sm:$0xf0]  ;;  %v1215_v19 = vor.u32 %v1618_v11, %v1214_v9  ;;  %863 = vmatpush.bf16.msra.mxu3 %v1487_v10  ;;  %v1552_v51 = vld [vmem:[#allocation2 + $0x3d0] sm:$0xf0] }
  0x20   :  { %v1470_v14 = vld [vmem:[#allocation2 + $0x320] sm:$0xf]  ;;  %v1682_v15 = vld [vmem:[#allocation2 + $0x32c] sm:$0xf0]  ;;  %v1343_v20 = vor.u32 %v1650_v13, %v1342_v12  ;;  %825 = vmatpush.bf16.msra.mxu0 %v1087_v16  ;;  %v36_v52 = vld [vmem:[%s1797_s0] sm:$0xff]  ;;  %v1555_v59 = vor.u32 %v1700_v50, %v1552_v51 }
  0x21   :  { %v1070_v17 = vld [vmem:[#allocation2] sm:$0xf]  ;;  %v1582_v18 = vld [vmem:[#allocation2 + $0xc] sm:$0xf0]  ;;  %v1471_v24 = vor.u32 %v1682_v15, %v1470_v14  ;;  %838 = vmatpush.bf16.msra.mxu1 %v1215_v19  ;;  %38 = vst [vmem:[#allocation1] ss:$4 sm:$0xff] %v36_v52 }
  0x22   :  { %v1198_v21 = vld [vmem:[#allocation2 + $0x100] sm:$0xf]  ;;  %v1614_v22 = vld [vmem:[#allocation2 + $0x10c] sm:$0xf0]  ;;  %v1071_v31 = vor.u32 %v1582_v18, %v1070_v17  ;;  %851 = vmatpush.bf16.msra.mxu2 %v1343_v20  ;;  %v1600_v56 = vld [vmem:[#allocation2 + $0xa4] sm:$0xf] }
  0x23   :  { %v1326_v23 = vld [vmem:[#allocation2 + $0x200] sm:$0xf]  ;;  %v1646_v25 = vld [vmem:[#allocation2 + $0x20c] sm:$0xf0]  ;;  %v1199_v35 = vor.u32 %v1614_v22, %v1198_v21  ;;  %864 = vmatpush.bf16.msra.mxu3 %v1471_v24  ;;  %v1152_v57 = vld [vmem:[#allocation2 + $0xb0] sm:$0xf0] }
  0x24   :  { %v1454_v26 = vld [vmem:[#allocation2 + $0x300] sm:$0xf]  ;;  %v1678_v27 = vld [vmem:[#allocation2 + $0x30c] sm:$0xf0]  ;;  %v1327_v36 = vor.u32 %v1646_v25, %v1326_v23  ;;  %826 = vmatpush.bf16.msra.mxu0 %v1071_v31  ;;  %v1632_v58 = vld [vmem:[#allocation2 + $0x1a4] sm:$0xf]  ;;  %v1155_v1 = vor.u32 %v1600_v56, %v1152_v57 }
  0x25   :  { %v1455_v39 = vor.u32 %v1678_v27, %v1454_v26  ;;  %839 = vmatpush.bf16.msra.mxu1 %v1199_v35  ;;  %v1280_v60 = vld [vmem:[#allocation2 + $0x1b0] sm:$0xf0]  ;;  %v1664_v61 = vld [vmem:[#allocation2 + $0x2a4] sm:$0xf] }
  0x26   :  { %852 = vmatpush.bf16.msra.mxu2 %v1327_v36  ;;  %v1408_v62 = vld [vmem:[#allocation2 + $0x2b0] sm:$0xf0]  ;;  %v1696_v63 = vld [vmem:[#allocation2 + $0x3a4] sm:$0xf]  ;;  %v1283_v4 = vor.u32 %v1632_v58, %v1280_v60 }
  0x27   :  { %865 = vmatpush.bf16.msra.mxu3 %v1455_v39  ;;  %v1536_v0 = vld [vmem:[#allocation2 + $0x3b0] sm:$0xf0]  ;;  %v1596_v2 = vld [vmem:[#allocation2 + $0x84] sm:$0xf]  ;;  %v1411_v5 = vor.u32 %v1664_v61, %v1408_v62 }
  0x28   :  { %871 = vmatpush.bf16.msrb.mxu0 %v1187_v40  ;;  %v1136_v3 = vld [vmem:[#allocation2 + $0x90] sm:$0xf0]  ;;  %v1628_v6 = vld [vmem:[#allocation2 + $0x184] sm:$0xf]  ;;  %v1539_v9 = vor.u32 %v1696_v63, %v1536_v0 }
  0x29   :  { %884 = vmatpush.bf16.msrb.mxu1 %v1315_v41  ;;  %v1264_v7 = vld [vmem:[#allocation2 + $0x190] sm:$0xf0]  ;;  %v1660_v8 = vld [vmem:[#allocation2 + $0x284] sm:$0xf]  ;;  %v1139_v15 = vor.u32 %v1596_v2, %v1136_v3 }
  0x2a   :  { %897 = vmatpush.bf16.msrb.mxu2 %v1443_v42  ;;  %v1392_v10 = vld [vmem:[#allocation2 + $0x290] sm:$0xf0]  ;;  %v1692_v11 = vld [vmem:[#allocation2 + $0x384] sm:$0xf]  ;;  %v1267_v16 = vor.u32 %v1628_v6, %v1264_v7  ;;  %v1611_v6 = vld [vmem:[#allocation2 + $0xf4] sm:$0xf0] }
  0x2b   :  { %910 = vmatpush.bf16.msrb.mxu3 %v1571_v46  ;;  %v1520_v12 = vld [vmem:[#allocation2 + $0x390] sm:$0xf0]  ;;  %v41_v13 = vld.sshfl [vmem:[#allocation1 + $0x10] sm:$0xff pattern:$0x73625140]  ;;  %v1395_v21 = vor.u32 %v1660_v8, %v1392_v10 }
  0x2c   :  { %872 = vmatpush.bf16.msrb.mxu0 %v1171_v53  ;;  %v42_v14 = vld.sshfl [vmem:[#allocation1 + $0x18] sm:$0xff pattern:$0x73625140]  ;;  %v1767_v17 = vpack.c.bf16 %v41_v13, %v41_v13  ;;  %v39_v19 = vld.sshfl [vmem:[#allocation1] sm:$0xff pattern:$0x73625140]  ;;  %v1523_v27 = vor.u32 %v1692_v11, %v1520_v12 }
  0x2d   :  { %885 = vmatpush.bf16.msrb.mxu1 %v1299_v54  ;;  %v1769_v18 = vpack.c.bf16 %v42_v14, %v42_v14  ;;  %v40_v20 = vld.sshfl [vmem:[#allocation1 + $0x8] sm:$0xff pattern:$0x73625140]  ;;  %v1120_v23 = vld [vmem:[#allocation2 + $0x70] sm:$0xf0]  ;;  %v1771_v25 = vpack.c.bf16 %v39_v19, %v39_v19 }
  0x2e   :  { %898 = vmatpush.bf16.msrb.mxu2 %v1427_v55  ;;  %v1592_v22 = vld [vmem:[#allocation2 + $0x64] sm:$0xf]  ;;  %v1773_v26 = vpack.c.bf16 %v40_v20, %v40_v20  ;;  %v1248_v28 = vld [vmem:[#allocation2 + $0x170] sm:$0xf0]  ;;  %v1318_v7 = vld [vmem:[#allocation2 + $0x1e8] sm:$0xf] }
  0x2f   :  { %911 = vmatpush.bf16.msrb.mxu3 %v1555_v59  ;;  %v1624_v24 = vld [vmem:[#allocation2 + $0x164] sm:$0xf]  ;;  %853 = vmatmul.bf16.vlgmr.msra.gmra.mxu2 %v1767_v17  ;;  %v1376_v30 = vld [vmem:[#allocation2 + $0x270] sm:$0xf0]  ;;  %v1123_v33 = vor.u32 %v1592_v22, %v1120_v23  ;;  %v1446_v10 = vld [vmem:[#allocation2 + $0x2e8] sm:$0xf] }
  0x30   :  { %873 = vmatpush.bf16.msrb.mxu0 %v1155_v1  ;;  %v1656_v29 = vld [vmem:[#allocation2 + $0x264] sm:$0xf]  ;;  %v1504_v32 = vld [vmem:[#allocation2 + $0x370] sm:$0xf0]  ;;  %866 = vmatmul.bf16.vlgmr.msra.gmra.mxu3 %v1769_v18  ;;  %v1251_v34 = vor.u32 %v1624_v24, %v1248_v28  ;;  %v1675_v11 = vld [vmem:[#allocation2 + $0x2f4] sm:$0xf0] }
  0x31   :  { %886 = vmatpush.bf16.msrb.mxu1 %v1283_v4  ;;  %v1688_v31 = vld [vmem:[#allocation2 + $0x364] sm:$0xf]  ;;  %827 = vmatmul.bf16.vlgmr.msra.gmra.mxu0 %v1771_v25  ;;  %v1379_v35 = vor.u32 %v1656_v29, %v1376_v30  ;;  %v1104_v37 = vld [vmem:[#allocation2 + $0x50] sm:$0xf0]  ;;  %v1574_v14 = vld [vmem:[#allocation2 + $0x3e8] sm:$0xf] }
  0x32   :  { %899 = vmatpush.bf16.msrb.mxu2 %v1411_v5  ;;  %840 = vmatmul.bf16.vlgmr.msra.gmra.mxu1 %v1773_v26  ;;  %v1588_v36 = vld [vmem:[#allocation2 + $0x44] sm:$0xf]  ;;  %v1507_v39 = vor.u32 %v1688_v31, %v1504_v32  ;;  %v1232_v40 = vld [vmem:[#allocation2 + $0x150] sm:$0xf0]  ;;  %v1190_v5 = vld [vmem:[#allocation2 + $0xe8] sm:$0xf] }
  0x33   :  { %912 = vmatpush.bf16.msrb.mxu3 %v1539_v9  ;;  %v1620_v38 = vld [vmem:[#allocation2 + $0x144] sm:$0xf]  ;;  %v1360_v42 = vld [vmem:[#allocation2 + $0x250] sm:$0xf0]  ;;  %v1107_v45 = vor.u32 %v1588_v36, %v1104_v37  ;;  %v1643_v9 = vld [vmem:[#allocation2 + $0x1f4] sm:$0xf0]  ;;  %v1191_v19 = vor.u32 %v1611_v6, %v1190_v5 }
  0x34   :  { %874 = vmatpush.bf16.msrb.mxu0 %v1139_v15  ;;  %v1652_v41 = vld [vmem:[#allocation2 + $0x244] sm:$0xf]  ;;  %v1488_v44 = vld [vmem:[#allocation2 + $0x350] sm:$0xf0]  ;;  %v1235_v46 = vor.u32 %v1620_v38, %v1232_v40  ;;  %v1707_v15 = vld [vmem:[#allocation2 + $0x3f4] sm:$0xf0]  ;;  %v1319_v20 = vor.u32 %v1643_v9, %v1318_v7 }
  0x35   :  { %887 = vmatpush.bf16.msrb.mxu1 %v1267_v16  ;;  %v1684_v43 = vld [vmem:[#allocation2 + $0x344] sm:$0xf]  ;;  %v1363_v47 = vor.u32 %v1652_v41, %v1360_v42  ;;  %v1088_v49 = vld [vmem:[#allocation2 + $0x30] sm:$0xf0]  ;;  %v1174_v22 = vld [vmem:[#allocation2 + $0xc8] sm:$0xf] }
  0x36   :  { %900 = vmatpush.bf16.msrb.mxu2 %v1395_v21  ;;  %v1584_v48 = vld [vmem:[#allocation2 + $0x24] sm:$0xf]  ;;  %v1491_v51 = vor.u32 %v1684_v43, %v1488_v44  ;;  %v1216_v52 = vld [vmem:[#allocation2 + $0x130] sm:$0xf0]  ;;  %v1447_v21 = vor.u32 %v1675_v11, %v1446_v10  ;;  %v1607_v23 = vld [vmem:[#allocation2 + $0xd4] sm:$0xf0] }
  0x37   :  { %913 = vmatpush.bf16.msrb.mxu3 %v1523_v27  ;;  %v1616_v50 = vld [vmem:[#allocation2 + $0x124] sm:$0xf]  ;;  %v1344_v54 = vld [vmem:[#allocation2 + $0x230] sm:$0xf0]  ;;  %v1091_v57 = vor.u32 %v1584_v48, %v1088_v49  ;;  %v1302_v24 = vld [vmem:[#allocation2 + $0x1c8] sm:$0xf]  ;;  %v1575_v27 = vor.u32 %v1707_v15, %v1574_v14 }
  0x38   :  { %875 = vmatpush.bf16.msrb.mxu0 %v1123_v33  ;;  %v1648_v53 = vld [vmem:[#allocation2 + $0x224] sm:$0xf]  ;;  %v1472_v56 = vld [vmem:[#allocation2 + $0x330] sm:$0xf0]  ;;  %v1219_v60 = vor.u32 %v1616_v50, %v1216_v52  ;;  %v1639_v28 = vld [vmem:[#allocation2 + $0x1d4] sm:$0xf0]  ;;  %v1175_v33 = vor.u32 %v1607_v23, %v1174_v22 }
  0x39   :  { %888 = vmatpush.bf16.msrb.mxu1 %v1251_v34  ;;  %v1680_v55 = vld [vmem:[#allocation2 + $0x324] sm:$0xf]  ;;  %v1072_v59 = vld [vmem:[#allocation2 + $0x10] sm:$0xf0]  ;;  %v1347_v61 = vor.u32 %v1648_v53, %v1344_v54  ;;  %v1430_v29 = vld [vmem:[#allocation2 + $0x2c8] sm:$0xf]  ;;  %v1303_v34 = vor.u32 %v1639_v28, %v1302_v24 }
  0x3a   :  { %901 = vmatpush.bf16.msrb.mxu2 %v1379_v35  ;;  %v1580_v58 = vld [vmem:[#allocation2 + $0x4] sm:$0xf]  ;;  %v1200_v63 = vld [vmem:[#allocation2 + $0x110] sm:$0xf0]  ;;  %v1475_v1 = vor.u32 %v1680_v55, %v1472_v56  ;;  %v1671_v30 = vld [vmem:[#allocation2 + $0x2d4] sm:$0xf0] }
  0x3b   :  { %914 = vmatpush.bf16.msrb.mxu3 %v1507_v39  ;;  %v1612_v62 = vld [vmem:[#allocation2 + $0x104] sm:$0xf]  ;;  %v1328_v2 = vld [vmem:[#allocation2 + $0x210] sm:$0xf0]  ;;  %v1075_v8 = vor.u32 %v1580_v58, %v1072_v59  ;;  %v1558_v31 = vld [vmem:[#allocation2 + $0x3c8] sm:$0xf]  ;;  %v1431_v35 = vor.u32 %v1671_v30, %v1430_v29 }
  0x3c   :  { %876 = vmatpush.bf16.msrb.mxu0 %v1107_v45  ;;  %v1644_v0 = vld [vmem:[#allocation2 + $0x204] sm:$0xf]  ;;  %v1456_v4 = vld [vmem:[#allocation2 + $0x310] sm:$0xf0]  ;;  %v1203_v12 = vor.u32 %v1612_v62, %v1200_v63  ;;  %v1703_v32 = vld [vmem:[#allocation2 + $0x3d4] sm:$0xf0] }
  0x3d   :  { %889 = vmatpush.bf16.msrb.mxu1 %v1235_v46  ;;  %v1676_v3 = vld [vmem:[#allocation2 + $0x304] sm:$0xf]  ;;  %v1331_v13 = vor.u32 %v1644_v0, %v1328_v2  ;;  %v1158_v36 = vld [vmem:[#allocation2 + $0xa8] sm:$0xf]  ;;  %v1603_v37 = vld [vmem:[#allocation2 + $0xb4] sm:$0xf0]  ;;  %v1559_v39 = vor.u32 %v1703_v32, %v1558_v31 }
  0x3e   :  { %902 = vmatpush.bf16.msrb.mxu2 %v1363_v47  ;;  %v1459_v16 = vor.u32 %v1676_v3, %v1456_v4  ;;  %v1286_v38 = vld [vmem:[#allocation2 + $0x1a8] sm:$0xf]  ;;  %v1635_v40 = vld [vmem:[#allocation2 + $0x1b4] sm:$0xf0]  ;;  %v1159_v45 = vor.u32 %v1603_v37, %v1158_v36 }
  0x3f   :  { %915 = vmatpush.bf16.msrb.mxu3 %v1491_v51  ;;  %v1414_v41 = vld [vmem:[#allocation2 + $0x2a8] sm:$0xf]  ;;  %v1667_v42 = vld [vmem:[#allocation2 + $0x2b4] sm:$0xf0]  ;;  %v1287_v46 = vor.u32 %v1635_v40, %v1286_v38 }
  0x40   :  { %877 = vmatpush.bf16.msrb.mxu0 %v1091_v57  ;;  %v1542_v43 = vld [vmem:[#allocation2 + $0x3a8] sm:$0xf]  ;;  %v1699_v44 = vld [vmem:[#allocation2 + $0x3b4] sm:$0xf0]  ;;  %v1415_v47 = vor.u32 %v1667_v42, %v1414_v41 }
  0x41   :  { %890 = vmatpush.bf16.msrb.mxu1 %v1219_v60  ;;  %v1142_v48 = vld [vmem:[#allocation2 + $0x88] sm:$0xf]  ;;  %v1599_v49 = vld [vmem:[#allocation2 + $0x94] sm:$0xf0]  ;;  %v1543_v51 = vor.u32 %v1699_v44, %v1542_v43 }
  0x42   :  { %903 = vmatpush.bf16.msrb.mxu2 %v1347_v61  ;;  %v1270_v50 = vld [vmem:[#allocation2 + $0x188] sm:$0xf]  ;;  %v1631_v52 = vld [vmem:[#allocation2 + $0x194] sm:$0xf0]  ;;  %v1143_v57 = vor.u32 %v1599_v49, %v1142_v48  ;;  %v1320_v49 = vld [vmem:[#allocation2 + $0x1f8] sm:$0xf0] }
  0x43   :  { %916 = vmatpush.bf16.msrb.mxu3 %v1475_v1  ;;  %v1398_v53 = vld [vmem:[#allocation2 + $0x288] sm:$0xf]  ;;  %v1663_v54 = vld [vmem:[#allocation2 + $0x294] sm:$0xf0]  ;;  %v1271_v58 = vor.u32 %v1631_v52, %v1270_v50  ;;  %v1673_v50 = vld [vmem:[#allocation2 + $0x2ec] sm:$0xf] }
  0x44   :  { %878 = vmatpush.bf16.msrb.mxu0 %v1075_v8  ;;  %v1526_v55 = vld [vmem:[#allocation2 + $0x388] sm:$0xf]  ;;  %v1695_v56 = vld [vmem:[#allocation2 + $0x394] sm:$0xf0]  ;;  %v1399_v59 = vor.u32 %v1663_v54, %v1398_v53  ;;  %v1705_v54 = vld [vmem:[#allocation2 + $0x3ec] sm:$0xf] }
  0x45   :  { %891 = vmatpush.bf16.msrb.mxu1 %v1203_v12  ;;  %v1126_v60 = vld [vmem:[#allocation2 + $0x68] sm:$0xf]  ;;  %v1595_v61 = vld [vmem:[#allocation2 + $0x74] sm:$0xf0]  ;;  %v1527_v63 = vor.u32 %v1695_v56, %v1526_v55  ;;  %v1576_v55 = vld [vmem:[#allocation2 + $0x3f8] sm:$0xf0] }
  0x46   :  { %904 = vmatpush.bf16.msrb.mxu2 %v1331_v13  ;;  %v1254_v62 = vld [vmem:[#allocation2 + $0x168] sm:$0xf]  ;;  %v1627_v0 = vld [vmem:[#allocation2 + $0x174] sm:$0xf0]  ;;  %v1127_v5 = vor.u32 %v1595_v61, %v1126_v60  ;;  %v1605_v60 = vld [vmem:[#allocation2 + $0xcc] sm:$0xf] }
  0x47   :  { %917 = vmatpush.bf16.msrb.mxu3 %v1459_v16  ;;  %879 = vmatmul.bf16.vlgmr.msrb.gmra.mxu0 %v1771_v25  ;;  %v1382_v1 = vld [vmem:[#allocation2 + $0x268] sm:$0xf]  ;;  %v1659_v2 = vld [vmem:[#allocation2 + $0x274] sm:$0xf0]  ;;  %v1255_v6 = vor.u32 %v1627_v0, %v1254_v62  ;;  %v1176_v61 = vld [vmem:[#allocation2 + $0xd8] sm:$0xf0] }
  0x48   :  { %923 = vmatpush.bf16.msra.mxu0 %v1191_v19  ;;  %892 = vmatmul.bf16.vlgmr.msrb.gmra.mxu1 %v1773_v26  ;;  %v1510_v3 = vld [vmem:[#allocation2 + $0x368] sm:$0xf]  ;;  %v1691_v4 = vld [vmem:[#allocation2 + $0x374] sm:$0xf0]  ;;  %v1383_v7 = vor.u32 %v1659_v2, %v1382_v1  ;;  %v1637_v62 = vld [vmem:[#allocation2 + $0x1cc] sm:$0xf] }
  0x49   :  { %936 = vmatpush.bf16.msra.mxu1 %v1319_v20  ;;  %905 = vmatmul.bf16.vlgmr.msrb.gmra.mxu2 %v1767_v17  ;;  %v1110_v8 = vld [vmem:[#allocation2 + $0x48] sm:$0xf]  ;;  %v1591_v9 = vld [vmem:[#allocation2 + $0x54] sm:$0xf0]  ;;  %v1511_v11 = vor.u32 %v1691_v4, %v1510_v3  ;;  %v1304_v0 = vld [vmem:[#allocation2 + $0x1d8] sm:$0xf0] }
  0x4a   :  { %949 = vmatpush.bf16.msra.mxu2 %v1447_v21  ;;  %918 = vmatmul.bf16.vlgmr.msrb.gmra.mxu3 %v1769_v18  ;;  %v1238_v10 = vld [vmem:[#allocation2 + $0x148] sm:$0xf]  ;;  %v1623_v12 = vld [vmem:[#allocation2 + $0x154] sm:$0xf0]  ;;  %v1111_v19 = vor.u32 %v1591_v9, %v1110_v8  ;;  %v1669_v1 = vld [vmem:[#allocation2 + $0x2cc] sm:$0xf] }
  0x4b   :  { %962 = vmatpush.bf16.msra.mxu3 %v1575_v27  ;;  %v1366_v13 = vld [vmem:[#allocation2 + $0x248] sm:$0xf]  ;;  %v1655_v14 = vld [vmem:[#allocation2 + $0x254] sm:$0xf0]  ;;  %v1239_v20 = vor.u32 %v1623_v12, %v1238_v10  ;;  %v1432_v2 = vld [vmem:[#allocation2 + $0x2d8] sm:$0xf0] }
  0x4c   :  { %924 = vmatpush.bf16.msra.mxu0 %v1175_v33  ;;  %v1494_v15 = vld [vmem:[#allocation2 + $0x348] sm:$0xf]  ;;  %v1687_v16 = vld [vmem:[#allocation2 + $0x354] sm:$0xf0]  ;;  %v1367_v21 = vor.u32 %v1655_v14, %v1366_v13  ;;  %v1701_v3 = vld [vmem:[#allocation2 + $0x3cc] sm:$0xf] }
  0x4d   :  { %937 = vmatpush.bf16.msra.mxu1 %v1303_v34  ;;  %v1094_v22 = vld [vmem:[#allocation2 + $0x28] sm:$0xf]  ;;  %v1587_v23 = vld [vmem:[#allocation2 + $0x34] sm:$0xf0]  ;;  %v1495_v27 = vor.u32 %v1687_v16, %v1494_v15  ;;  %v1560_v4 = vld [vmem:[#allocation2 + $0x3d8] sm:$0xf0] }
  0x4e   :  { %950 = vmatpush.bf16.msra.mxu2 %v1431_v35  ;;  %v1222_v24 = vld [vmem:[#allocation2 + $0x128] sm:$0xf]  ;;  %v1619_v28 = vld [vmem:[#allocation2 + $0x134] sm:$0xf0]  ;;  %v1095_v33 = vor.u32 %v1587_v23, %v1094_v22  ;;  %v1601_v8 = vld [vmem:[#allocation2 + $0xac] sm:$0xf] }
  0x4f   :  { %963 = vmatpush.bf16.msra.mxu3 %v1559_v39  ;;  %v1350_v29 = vld [vmem:[#allocation2 + $0x228] sm:$0xf]  ;;  %v1651_v30 = vld [vmem:[#allocation2 + $0x234] sm:$0xf0]  ;;  %v1223_v36 = vor.u32 %v1619_v28, %v1222_v24  ;;  %v1160_v9 = vld [vmem:[#allocation2 + $0xb8] sm:$0xf0] }
  0x50   :  { %925 = vmatpush.bf16.msra.mxu0 %v1159_v45  ;;  %v1478_v31 = vld [vmem:[#allocation2 + $0x328] sm:$0xf]  ;;  %v1683_v32 = vld [vmem:[#allocation2 + $0x334] sm:$0xf0]  ;;  %v1351_v37 = vor.u32 %v1651_v30, %v1350_v29  ;;  %v1609_v45 = vld [vmem:[#allocation2 + $0xec] sm:$0xf] }
  0x51   :  { %938 = vmatpush.bf16.msra.mxu1 %v1287_v46  ;;  %v1078_v34 = vld [vmem:[#allocation2 + $0x8] sm:$0xf]  ;;  %v1583_v35 = vld [vmem:[#allocation2 + $0x14] sm:$0xf0]  ;;  %v1479_v41 = vor.u32 %v1683_v32, %v1478_v31  ;;  %v1192_v46 = vld [vmem:[#allocation2 + $0xf8] sm:$0xf0] }
  0x52   :  { %951 = vmatpush.bf16.msra.mxu2 %v1415_v47  ;;  %v1206_v38 = vld [vmem:[#allocation2 + $0x108] sm:$0xf]  ;;  %v1615_v39 = vld [vmem:[#allocation2 + $0x114] sm:$0xf0]  ;;  %v1641_v47 = vld [vmem:[#allocation2 + $0x1ec] sm:$0xf]  ;;  %v1079_v48 = vor.u32 %v1583_v35, %v1078_v34 }
  0x53   :  { %964 = vmatpush.bf16.msra.mxu3 %v1543_v51  ;;  %v1334_v40 = vld [vmem:[#allocation2 + $0x208] sm:$0xf]  ;;  %v1647_v42 = vld [vmem:[#allocation2 + $0x214] sm:$0xf0]  ;;  %v1448_v51 = vld [vmem:[#allocation2 + $0x2f8] sm:$0xf0]  ;;  %v1207_v52 = vor.u32 %v1615_v39, %v1206_v38 }
  0x54   :  { %926 = vmatpush.bf16.msra.mxu0 %v1143_v57  ;;  %v1462_v43 = vld [vmem:[#allocation2 + $0x308] sm:$0xf]  ;;  %v1679_v44 = vld [vmem:[#allocation2 + $0x314] sm:$0xf0]  ;;  %v1335_v53 = vor.u32 %v1647_v42, %v1334_v40  ;;  %v1195_v57 = vor.u32 %v1609_v45, %v1192_v46  ;;  %v1633_v10 = vld [vmem:[#allocation2 + $0x1ac] sm:$0xf] }
  0x55   :  { %939 = vmatpush.bf16.msra.mxu1 %v1271_v58  ;;  %v1463_v56 = vor.u32 %v1679_v44, %v1462_v43  ;;  %v1323_v58 = vor.u32 %v1641_v47, %v1320_v49  ;;  %v1288_v12 = vld [vmem:[#allocation2 + $0x1b8] sm:$0xf0]  ;;  %v1665_v13 = vld [vmem:[#allocation2 + $0x2ac] sm:$0xf] }
  0x56   :  { %952 = vmatpush.bf16.msra.mxu2 %v1399_v59  ;;  %v1451_v59 = vor.u32 %v1673_v50, %v1448_v51  ;;  %v1416_v14 = vld [vmem:[#allocation2 + $0x2b8] sm:$0xf0]  ;;  %v1697_v15 = vld [vmem:[#allocation2 + $0x3ac] sm:$0xf] }
  0x57   :  { %965 = vmatpush.bf16.msra.mxu3 %v1527_v63  ;;  %v1579_v63 = vor.u32 %v1705_v54, %v1576_v55  ;;  %v1544_v16 = vld [vmem:[#allocation2 + $0x3b8] sm:$0xf0]  ;;  %v1597_v22 = vld [vmem:[#allocation2 + $0x8c] sm:$0xf] }
  0x58   :  { %927 = vmatpush.bf16.msra.mxu0 %v1127_v5  ;;  %v1179_v5 = vor.u32 %v1605_v60, %v1176_v61  ;;  %v1144_v23 = vld [vmem:[#allocation2 + $0x98] sm:$0xf0]  ;;  %v1629_v24 = vld [vmem:[#allocation2 + $0x18c] sm:$0xf] }
  0x59   :  { %940 = vmatpush.bf16.msra.mxu1 %v1255_v6  ;;  %v1307_v6 = vor.u32 %v1637_v62, %v1304_v0  ;;  %v1272_v28 = vld [vmem:[#allocation2 + $0x198] sm:$0xf0]  ;;  %v1661_v29 = vld [vmem:[#allocation2 + $0x28c] sm:$0xf] }
  0x5a   :  { %953 = vmatpush.bf16.msra.mxu2 %v1383_v7  ;;  %v1435_v7 = vor.u32 %v1669_v1, %v1432_v2  ;;  %v1400_v30 = vld [vmem:[#allocation2 + $0x298] sm:$0xf0]  ;;  %v1693_v31 = vld [vmem:[#allocation2 + $0x38c] sm:$0xf]  ;;  %v1275_v34 = vor.u32 %v1629_v24, %v1272_v28 }
  0x5b   :  { %966 = vmatpush.bf16.msra.mxu3 %v1511_v11  ;;  %v1563_v11 = vor.u32 %v1701_v3, %v1560_v4  ;;  %v1528_v32 = vld [vmem:[#allocation2 + $0x398] sm:$0xf0]  ;;  %v1403_v35 = vor.u32 %v1661_v29, %v1400_v30  ;;  %v1625_v38 = vld [vmem:[#allocation2 + $0x16c] sm:$0xf] }
  0x5c   :  { %928 = vmatpush.bf16.msra.mxu0 %v1111_v19  ;;  %v1163_v19 = vor.u32 %v1601_v8, %v1160_v9  ;;  %v1531_v39 = vor.u32 %v1693_v31, %v1528_v32  ;;  %v1256_v40 = vld [vmem:[#allocation2 + $0x178] sm:$0xf0]  ;;  %v1689_v43 = vld [vmem:[#allocation2 + $0x36c] sm:$0xf] }
  0x5d   :  { %941 = vmatpush.bf16.msra.mxu1 %v1239_v20  ;;  %v1291_v20 = vor.u32 %v1633_v10, %v1288_v12  ;;  %v1384_v42 = vld [vmem:[#allocation2 + $0x278] sm:$0xf0]  ;;  %v1259_v46 = vor.u32 %v1625_v38, %v1256_v40  ;;  %v1621_v50 = vld [vmem:[#allocation2 + $0x14c] sm:$0xf] }
  0x5e   :  { %954 = vmatpush.bf16.msra.mxu2 %v1367_v21  ;;  %v1419_v21 = vor.u32 %v1665_v13, %v1416_v14  ;;  %v1512_v44 = vld [vmem:[#allocation2 + $0x378] sm:$0xf0]  ;;  %v1685_v55 = vld [vmem:[#allocation2 + $0x34c] sm:$0xf] }
  0x5f   :  { %967 = vmatpush.bf16.msra.mxu3 %v1495_v27  ;;  %v1547_v27 = vor.u32 %v1697_v15, %v1544_v16  ;;  %v1112_v49 = vld [vmem:[#allocation2 + $0x58] sm:$0xf0]  ;;  %v1515_v51 = vor.u32 %v1689_v43, %v1512_v44  ;;  %v1585_v60 = vld [vmem:[#allocation2 + $0x2c] sm:$0xf] }
  0x60   :  { %929 = vmatpush.bf16.msra.mxu0 %v1095_v33  ;;  %v1147_v33 = vor.u32 %v1597_v22, %v1144_v23  ;;  %v1368_v54 = vld [vmem:[#allocation2 + $0x258] sm:$0xf0]  ;;  %v1617_v62 = vld [vmem:[#allocation2 + $0x12c] sm:$0xf] }
  0x61   :  { %942 = vmatpush.bf16.msra.mxu1 %v1223_v36  ;;  %v1593_v36 = vld [vmem:[#allocation2 + $0x6c] sm:$0xf]  ;;  %v1096_v61 = vld [vmem:[#allocation2 + $0x38] sm:$0xf0] }
  0x62   :  { %955 = vmatpush.bf16.msra.mxu2 %v1351_v37  ;;  %v1128_v37 = vld [vmem:[#allocation2 + $0x78] sm:$0xf0]  ;;  %v1649_v1 = vld [vmem:[#allocation2 + $0x22c] sm:$0xf] }
  0x63   :  { %968 = vmatpush.bf16.msra.mxu3 %v1479_v41  ;;  %v1657_v41 = vld [vmem:[#allocation2 + $0x26c] sm:$0xf]  ;;  %v1131_v45 = vor.u32 %v1593_v36, %v1128_v37  ;;  %v1224_v0 = vld [vmem:[#allocation2 + $0x138] sm:$0xf0] }
  0x64   :  { %930 = vmatpush.bf16.msra.mxu0 %v1079_v48  ;;  %v1387_v47 = vor.u32 %v1657_v41, %v1384_v42  ;;  %v1589_v48 = vld [vmem:[#allocation2 + $0x4c] sm:$0xf]  ;;  %v1352_v2 = vld [vmem:[#allocation2 + $0x238] sm:$0xf0] }
  0x65   :  { %943 = vmatpush.bf16.msra.mxu1 %v1207_v52  ;;  %v1240_v52 = vld [vmem:[#allocation2 + $0x158] sm:$0xf0]  ;;  %v1681_v3 = vld [vmem:[#allocation2 + $0x32c] sm:$0xf] }
  0x66   :  { %956 = vmatpush.bf16.msra.mxu2 %v1335_v53  ;;  %v1653_v53 = vld [vmem:[#allocation2 + $0x24c] sm:$0xf]  ;;  %v1480_v4 = vld [vmem:[#allocation2 + $0x338] sm:$0xf0] }
  0x67   :  { %969 = vmatpush.bf16.msra.mxu3 %v1463_v56  ;;  %931 = vmatmul.bf16.vlgmr.msra.gmra.mxu0 %v1771_v25  ;;  %v1496_v56 = vld [vmem:[#allocation2 + $0x358] sm:$0xf0]  ;;  %v1581_v8 = vld [vmem:[#allocation2 + $0xc] sm:$0xf] }
  0x68   :  { %975 = vmatpush.bf16.msrb.mxu0 %v1195_v57  ;;  %944 = vmatmul.bf16.vlgmr.msra.gmra.mxu1 %v1773_v26  ;;  %v1115_v57 = vor.u32 %v1589_v48, %v1112_v49  ;;  %v1080_v9 = vld [vmem:[#allocation2 + $0x18] sm:$0xf0]  ;;  %v1613_v10 = vld [vmem:[#allocation2 + $0x10c] sm:$0xf]  ;;  %v1047_v49 = vld [vmem:[%s1799_s2] sm:$0xf] }
  0x69   :  { %988 = vmatpush.bf16.msrb.mxu1 %v1323_v58  ;;  %957 = vmatmul.bf16.vlgmr.msra.gmra.mxu2 %v1767_v17  ;;  %v1243_v58 = vor.u32 %v1621_v50, %v1240_v52  ;;  %v1208_v12 = vld [vmem:[#allocation2 + $0x118] sm:$0xf0]  ;;  %v1645_v13 = vld [vmem:[#allocation2 + $0x20c] sm:$0xf] }
  0x6a   :  { %1001 = vmatpush.bf16.msrb.mxu2 %v1451_v59  ;;  %970 = vmatmul.bf16.vlgmr.msra.gmra.mxu3 %v1769_v18  ;;  %v1371_v59 = vor.u32 %v1653_v53, %v1368_v54  ;;  %v1336_v14 = vld [vmem:[#allocation2 + $0x218] sm:$0xf0]  ;;  %v1677_v15 = vld [vmem:[#allocation2 + $0x30c] sm:$0xf]  ;;  %v1050_v54 = vperm.slane %v1047_v49, 1 }
  0x6b   :  { %1014 = vmatpush.bf16.msrb.mxu3 %v1579_v63  ;;  %v1499_v63 = vor.u32 %v1685_v55, %v1496_v56  ;;  %v1464_v16 = vld [vmem:[#allocation2 + $0x318] sm:$0xf0] }
  0x6c   :  { %976 = vmatpush.bf16.msrb.mxu0 %v1179_v5  ;;  %v1099_v5 = vor.u32 %v1585_v60, %v1096_v61  ;;  %v1467_v22 = vor.u32 %v1677_v15, %v1464_v16  ;;  %v1049_v60 = vperm.slane %v1047_v49, 0  ;;  %v1053_v61 = vrot.slane %v1050_v54, 6 }
  0x6d   :  { %989 = vmatpush.bf16.msrb.mxu1 %v1307_v6  ;;  %v1227_v6 = vor.u32 %v1617_v62, %v1224_v0 }
  0x6e   :  { %1002 = vmatpush.bf16.msrb.mxu2 %v1435_v7  ;;  %v1355_v7 = vor.u32 %v1649_v1, %v1352_v2 }
  0x6f   :  { %1015 = vmatpush.bf16.msrb.mxu3 %v1563_v11  ;;  %v1483_v11 = vor.u32 %v1681_v3, %v1480_v4 }
  0x70   :  { %977 = vmatpush.bf16.msrb.mxu0 %v1163_v19  ;;  %v1083_v19 = vor.u32 %v1581_v8, %v1080_v9  ;;  %v1056_v8 = vsel %vm1034_vm0, %v1049_v60, %v1053_v61 }
  0x71   :  { %990 = vmatpush.bf16.msrb.mxu1 %v1291_v20  ;;  %v1211_v20 = vor.u32 %v1613_v10, %v1208_v12 }
  0x72   :  { %1003 = vmatpush.bf16.msrb.mxu2 %v1419_v21  ;;  %v1339_v21 = vor.u32 %v1645_v13, %v1336_v14 }
  0x73   :  { %1016 = vmatpush.bf16.msrb.mxu3 %v1547_v27 }
  0x74   :  { %978 = vmatpush.bf16.msrb.mxu0 %v1147_v33 }
  0x75   :  { %991 = vmatpush.bf16.msrb.mxu1 %v1275_v34 }
  0x76   :  { %1004 = vmatpush.bf16.msrb.mxu2 %v1403_v35 }
  0x77   :  { %1017 = vmatpush.bf16.msrb.mxu3 %v1531_v39 }
  0x78   :  { %979 = vmatpush.bf16.msrb.mxu0 %v1131_v45 }
  0x79   :  { %992 = vmatpush.bf16.msrb.mxu1 %v1259_v46 }
  0x7a   :  { %1005 = vmatpush.bf16.msrb.mxu2 %v1387_v47 }
  0x7b   :  { %1018 = vmatpush.bf16.msrb.mxu3 %v1515_v51 }
  0x7c   :  { %980 = vmatpush.bf16.msrb.mxu0 %v1115_v57  ;;  %v1051_v57 = vperm.slane %v1047_v49, 2 }
  0x7d   :  { %993 = vmatpush.bf16.msrb.mxu1 %v1243_v58  ;;  %v1052_v58 = vperm.slane %v1047_v49, 3 }
  0x7e   :  { %1006 = vmatpush.bf16.msrb.mxu2 %v1371_v59  ;;  %v1054_v2 = vrot.slane %v1051_v57, 4 }
  0x7f   :  { %1019 = vmatpush.bf16.msrb.mxu3 %v1499_v63  ;;  %v1055_v3 = vrot.slane %v1052_v58, 2 }
  0x80   :  { %981 = vmatpush.bf16.msrb.mxu0 %v1099_v5 }
  0x81   :  { %994 = vmatpush.bf16.msrb.mxu1 %v1227_v6 }
  0x82   :  { %1007 = vmatpush.bf16.msrb.mxu2 %v1355_v7 }
  0x83   :  { %1020 = vmatpush.bf16.msrb.mxu3 %v1483_v11  ;;  %v1057_v11 = vsel %vm1036_vm1, %v1054_v2, %v1055_v3 }
  0x84   :  { %982 = vmatpush.bf16.msrb.mxu0 %v1083_v19  ;;  %v1058_v15 = vsel %vm1038_vm2, %v1056_v8, %v1057_v11 }
  0x85   :  { %995 = vmatpush.bf16.msrb.mxu1 %v1211_v20 }
  0x86   :  { %1008 = vmatpush.bf16.msrb.mxu2 %v1339_v21 }
  0x87   :  { %1021 = vmatpush.bf16.msrb.mxu3 %v1467_v22  ;;  %983 = vmatmul.bf16.vlgmr.msrb.gmra.mxu0 %v1771_v25 }
  0x88   :  { %996 = vmatmul.bf16.vlgmr.msrb.gmra.mxu1 %v1773_v26 }
  0x89   :  { %1009 = vmatmul.bf16.vlgmr.msrb.gmra.mxu2 %v1767_v17 }
  0x8a   :  { %1022 = vmatmul.bf16.vlgmr.msrb.gmra.mxu3 %v1769_v18 }
  0xae   :  { %v828_v23 = vpop.f32.mrf.mxu0 }
  0xaf   :  { %v841_v24 = vpop.f32.mrf.mxu1 }
  0xb0   :  { %v842_v27 = vadd.f32 %v841_v24, %v828_v23 }
  0xb2   :  { %v854_v28 = vpop.f32.mrf.mxu2 }
  0xb3   :  { %v855_v29 = vadd.f32 %v854_v28, %v842_v27  ;;  %v867_v30 = vpop.f32.mrf.mxu3 }
  0xb5   :  { %v868_v31 = vadd.f32 %v867_v30, %v855_v29 }
  0xb6   :  { %v830_v32 = vpop.f32.mrf.mxu0 }
  0xb7   :  { %v843_v33 = vpop.f32.mrf.mxu1 }
  0xba   :  { %v856_v34 = vpop.f32.mrf.mxu2 }
  0xbb   :  { %v869_v35 = vpop.f32.mrf.mxu3 }
  0xc4   :  { %v880_v36 = vpop.f32.mrf.mxu0 }
  0xc5   :  { %v893_v37 = vpop.f32.mrf.mxu1 }
  0xc6   :  { %v894_v48 = vadd.f32 %v893_v37, %v880_v36 }
  0xcc   :  { %v906_v25 = vpop.f32.mrf.mxu2  ;;  %v882_v26 = vpop.f32.mrf.mxu0 }
  0xcd   :  { %v919_v38 = vpop.f32.mrf.mxu3  ;;  %v895_v39 = vpop.f32.mrf.mxu1  ;;  %v907_v53 = vadd.f32 %v906_v25, %v894_v48 }
  0xcf   :  { %v920_v59 = vadd.f32 %v919_v38, %v907_v53 }
  0xd1   :  { %v1031_v6 = vrot.slane %v920_v59, 6 }
  0xd3   :  { %v1035_v12 = vsel %vm1034_vm0, %v868_v31, %v1031_v6 }
  0xd4   :  { %v908_v17 = vpop.f32.mrf.mxu2 }
  0xd5   :  { %v921_v40 = vpop.f32.mrf.mxu3 }
  0xe4   :  { %v932_v18 = vpop.f32.mrf.mxu0 }
  0xe5   :  { %v945_v41 = vpop.f32.mrf.mxu1 }
  0xe6   :  { %v946_v50 = vadd.f32 %v945_v41, %v932_v18 }
  0xec   :  { %v958_v42 = vpop.f32.mrf.mxu2  ;;  %v934_v44 = vpop.f32.mrf.mxu0 }
  0xed   :  { %v971_v43 = vpop.f32.mrf.mxu3  ;;  %v947_v45 = vpop.f32.mrf.mxu1  ;;  %v959_v55 = vadd.f32 %v958_v42, %v946_v50 }
  0xef   :  { %v972_v63 = vadd.f32 %v971_v43, %v959_v55 }
  0xf1   :  { %v1032_v9 = vrot.slane %v972_v63, 4 }
  0xf4   :  { %v960_v46 = vpop.f32.mrf.mxu2 }
  0xf5   :  { %v973_v47 = vpop.f32.mrf.mxu3 }
 0x104   :  { %v984_v51 = vpop.f32.mrf.mxu0 }
 0x105   :  { %v997_v52 = vpop.f32.mrf.mxu1 }
 0x106   :  { %v998_v56 = vadd.f32 %v997_v52, %v984_v51 }
 0x10c   :  { %v1010_v62 = vpop.f32.mrf.mxu2  ;;  %v986_v4 = vpop.f32.mrf.mxu0 }
 0x10d   :  { %v1011_v0 = vadd.f32 %v1010_v62, %v998_v56  ;;  %v1023_v1 = vpop.f32.mrf.mxu3  ;;  %v999_v5 = vpop.f32.mrf.mxu1 }
 0x10f   :  { %v1024_v7 = vadd.f32 %v1023_v1, %v1011_v0 }
 0x111   :  { %v1033_v10 = vrot.slane %v1024_v7, 2 }
 0x113   :  { %v1037_v13 = vsel %vm1036_vm1, %v1032_v9, %v1033_v10 }
 0x114   :  { %v1039_v14 = vsel %vm1038_vm2, %v1035_v12, %v1037_v13  ;;  %v1012_v16 = vpop.f32.mrf.mxu2 }
 0x115   :  { %v1025_v19 = vpop.f32.mrf.mxu3  ;;  %v1060_v20 = vadd.f32 %v1058_v15, %v1039_v14 }
 0x117   :  { %v1061_v21 = vmax.f32 %v1060_v20, 0.0 }
 0x119   :  { %1062 = vst [vmem:[%s1800_s3] sm:$0xff] %v1061_v21 }
 0x11a   :  { %1067 = vsyncpa [#allocation3], 1 }

</bundles_post_ra>
